<compile_context>
chip_gen: v7x
topology: tpu7x:2x2x1
jax: 0.10.0
libtpu: 0.0.40
codegen_flags: <defaults>
</compile_context>

<pallas_src>
import functools

import jax
import jax.numpy as jnp
from jax.experimental import pallas as pl
from jax.experimental.pallas import tpu as pltpu

# ---- small config consistent with Decoder_MR's structure ----
TIME_STEPS = 8       # T  (reference default 121)
FEATURE_DIM = 32     # D  (reference default 256)
HEAD_NUM = 4
K_MODES = 6          # k
F_FUTURES = 6        # F
FFN_MULT = 4
LN_EPS = 1e-5
BN_EPS = 1e-5


# ------------------------------ fused kernel --------------------------------

def _decoder_kernel(sf_ref, bias_ref, twd_ref, fb_ref,
                    ln1g_ref, ln1b_ref, wqkv_ref, bqkv_ref, wo_ref, bo_ref,
                    ln2g_ref, ln2b_ref, w1_ref, b1_ref, w2_ref, b2_ref,
                    yg_ref, yb_ref, z1w_ref, z1b_ref,
                    o_ref, *, A, T, D, H):
    """One grid step == one future mode.  Everything stays in VMEM/vregs."""
    Dh = D // H
    scale = 1.0 / float(Dh) ** 0.5

    sf = sf_ref[...]                                   # [A*T, D]
    bias_aa = bias_ref[...]                            # [A, A] additive (0 / -1e9)

    def ln(v, g, b):
        mu = jnp.mean(v, axis=-1, keepdims=True)
        var = jnp.mean(jnp.square(v - mu), axis=-1, keepdims=True)
        return (v - mu) * jax.lax.rsqrt(var + LN_EPS) * g + b

    def softmax_rows(s):
        s = s - jnp.max(s, axis=-1, keepdims=True)
        p = jnp.exp(s)
        return p * pl.reciprocal(jnp.sum(p, axis=-1, keepdims=True), approx=True)

    def attention(h, wqkv, bqkv, wo, bo, across_time):
        # fused QKV projection: [A*T, 3D]
        qkv = jnp.dot(h, wqkv, preferred_element_type=jnp.float32) + bqkv
        q = qkv[:, 0:D]
        k = qkv[:, D:2 * D]
        v = qkv[:, 2 * D:3 * D]

        if across_time:
            # independent attention over T per (agent, head); no mask
            agent_outs = []
            for a in range(A):
                rs = slice(a * T, (a + 1) * T)
                head_outs = []
                for hh in range(H):
                    cs = slice(hh * Dh, (hh + 1) * Dh)
                    qa, ka, va = q[rs, cs], k[rs, cs], v[rs, cs]        # [T, Dh]
                    s = jnp.dot(qa, ka.T, preferred_element_type=jnp.float32) * scale
                    p = softmax_rows(s)                                  # [T, T]
                    head_outs.append(
                        jnp.dot(p, va, preferred_element_type=jnp.float32))
                agent_outs.append(jnp.concatenate(head_outs, axis=-1))   # [T, D]
            o = jnp.concatenate(agent_outs, axis=0)                      # [A*T, D]
        else:
            # attention over agents at each time step, with batch_mask bias
            per_agent = [[None] * H for _ in range(A)]
            for hh in range(H):
                cs = slice(hh * Dh, (hh + 1) * Dh)
                qs = [q[a * T:(a + 1) * T, cs] for a in range(A)]        # [T, Dh]
                ks = [k[a * T:(a + 1) * T, cs] for a in range(A)]
                vs = [v[a * T:(a + 1) * T, cs] for a in range(A)]
                for i in range(A):
                    cols = [jnp.sum(qs[i] * ks[j], axis=-1, keepdims=True) * scale
                            for j in range(A)]
                    s = jnp.concatenate(cols, axis=-1) + bias_aa[i:i + 1, :]  # [T, A]
                    p = softmax_rows(s)
                    o_i = p[:, 0:1] * vs[0]
                    for j in range(1, A):
                        o_i = o_i + p[:, j:j + 1] * vs[j]                # [T, Dh]
                    per_agent[i][hh] = o_i
            o = jnp.concatenate(
                [jnp.concatenate(per_agent[a], axis=-1) for a in range(A)], axis=0)

        return jnp.dot(o, wo, preferred_element_type=jnp.float32) + bo   # [A*T, D]

    # ---- layer_T: ReLU(state_feat @ T_w[:D] + (T_w[D+f] + T_b)) ----
    x = jnp.dot(sf, twd_ref[...], preferred_element_type=jnp.float32) + fb_ref[0]
    x = jnp.maximum(x, 0.0)

    # ---- layers U (time), V (agents), W (time), X (agents) ----
    for li in range(4):
        across_time = (li % 2 == 0)
        h = ln(x, ln1g_ref[li], ln1b_ref[li])
        x = x + attention(h, wqkv_ref[li], bqkv_ref[li],
                          wo_ref[li], bo_ref[li], across_time)
        h2 = ln(x, ln2g_ref[li], ln2b_ref[li])
        f = jnp.dot(h2, w1_ref[li], preferred_element_type=jnp.float32) + b1_ref[li]
        f = jnp.maximum(f, 0.0)
        f = jnp.dot(f, w2_ref[li], preferred_element_type=jnp.float32) + b2_ref[li]
        x = x + f

    # ---- layer_Y (LayerNorm) + layer_Z1 Linear(D->k)+ReLU ----
    y = ln(x, yg_ref[...], yb_ref[...])
    z = jnp.dot(y, z1w_ref[...], preferred_element_type=jnp.float32) + z1b_ref[...]
    z = jnp.maximum(z, 0.0)                                              # [A*T, k]
    o_ref[0] = z.astype(o_ref.dtype)


# --------------------------- forward (wrapper) -------------------------------

def decoder_forward(params, state_feat, batch_mask, padding_mask=None, hidden_mask=None):
    A, T, D = state_feat.shape
    assert T == TIME_STEPS and D == FEATURE_DIM
    F_, k, H = F_FUTURES, K_MODES, HEAD_NUM
    FFN = FFN_MULT * D
    layers = ("U", "V", "W", "X")

    # --- tiny one-time packing of parameters for the fused kernel ---
    T_wD = params["T_w"][:D, :]                                          # [D, D]
    fut_bias = (params["T_w"][D:, :] + params["T_b"][None, :]).reshape(F_, 1, D)

    def stack_w(name):
        return jnp.stack([params[l][name] for l in layers], axis=0)

    def stack_b(name, n):
        return jnp.stack([params[l][name].reshape(1, n) for l in layers], axis=0)

    wqkv = jnp.stack([jnp.concatenate(
        [params[l]["wq"], params[l]["wk"], params[l]["wv"]], axis=1) for l in layers], axis=0)
    bqkv = jnp.stack([jnp.concatenate(
        [params[l]["bq"], params[l]["bk"], params[l]["bv"]], axis=0).reshape(1, 3 * D)
        for l in layers], axis=0)

    ln1g, ln1b = stack_b("ln1_g", D), stack_b("ln1_b", D)
    wo, bo = stack_w("wo"), stack_b("bo", D)
    ln2g, ln2b = stack_b("ln2_g", D), stack_b("ln2_b", D)
    w1, b1 = stack_w("w1"), stack_b("b1", FFN)
    w2, b2 = stack_w("w2"), stack_b("b2", D)

    bias_aa = jnp.where(batch_mask > 0, 0.0, -1e9).astype(jnp.float32)   # [A, A]
    sf2d = state_feat.reshape(A * T, D).astype(jnp.float32)

    full = lambda f: (0, 0)
    full3 = lambda f: (0, 0, 0)

    z = pl.pallas_call(
        functools.partial(_decoder_kernel, A=A, T=T, D=D, H=H),
        out_shape=jax.ShapeDtypeStruct((F_, A * T, k), jnp.float32),
        grid=(F_,),
        in_specs=[
            pl.BlockSpec((A * T, D), full),            # state_feat
            pl.BlockSpec((A, A), full),                # additive agent mask
            pl.BlockSpec((D, D), full),                # T_w[:D]
            pl.BlockSpec((1, 1, D), lambda f: (f, 0, 0)),   # per-future bias row
            pl.BlockSpec((4, 1, D), full3),            # ln1_g
            pl.BlockSpec((4, 1, D), full3),            # ln1_b
            pl.BlockSpec((4, D, 3 * D), full3),        # wqkv
            pl.BlockSpec((4, 1, 3 * D), full3),        # bqkv
            pl.BlockSpec((4, D, D), full3),            # wo
            pl.BlockSpec((4, 1, D), full3),            # bo
            pl.BlockSpec((4, 1, D), full3),            # ln2_g
            pl.BlockSpec((4, 1, D), full3),            # ln2_b
            pl.BlockSpec((4, D, FFN), full3),          # w1
            pl.BlockSpec((4, 1, FFN), full3),          # b1
            pl.BlockSpec((4, FFN, D), full3),          # w2
            pl.BlockSpec((4, 1, D), full3),            # b2
            pl.BlockSpec((1, D), full),                # Y_g
            pl.BlockSpec((1, D), full),                # Y_b
            pl.BlockSpec((D, k), full),                # Z1_w
            pl.BlockSpec((1, k), full),                # Z1_b
        ],
        out_specs=pl.BlockSpec((1, A * T, k), lambda f: (f, 0, 0)),
        compiler_params=pltpu.CompilerParams(dimension_semantics=("parallel",)),
    )(sf2d, bias_aa, T_wD, fut_bias,
      ln1g, ln1b, wqkv, bqkv, wo, bo, ln2g, ln2b, w1, b1, w2, b2,
      params["Y_g"].reshape(1, D), params["Y_b"].reshape(1, D),
      params["Z1_w"], params["Z1_b"].reshape(1, k))

    # ---- layer_Z1 tail: Permute(1,3,0,2) -> BatchNorm2d(k) train-mode -> Softplus
    #      -> Permute(2,0,3,1)  (plain-JAX glue, needs cross-future statistics) ----
    z = z.reshape(F_, A, T, k)
    zp = jnp.transpose(z, (1, 3, 0, 2))                                  # [A, k, F, T]
    mean = jnp.mean(zp, axis=(0, 2, 3), keepdims=True)
    var = jnp.var(zp, axis=(0, 2, 3), keepdims=True)
    zp = (zp - mean) * jax.lax.rsqrt(var + BN_EPS)
    zp = zp * params["bn_g"].reshape(1, k, 1, 1) + params["bn_b"].reshape(1, k, 1, 1)
    zp = jax.nn.softplus(zp)
    out = jnp.transpose(zp, (2, 0, 3, 1))                                # [F, A, T, k]
    return out


# --------------------------- deterministic init ------------------------------

def _dense(key, fan_in, fan_out, scale=0.05):
    w = scale * jax.random.normal(key, (fan_in, fan_out), jnp.float32)
    b = jnp.zeros((fan_out,), jnp.float32)
    return w, b


def _att_layer_params(key, D, ffn):
    ks = jax.random.split(key, 6)
    wq, bq = _dense(ks[0], D, D)
    wk, bk = _dense(ks[1], D, D)
    wv, bv = _dense(ks[2], D, D)
    wo, bo = _dense(ks[3], D, D)
    w1, b1 = _dense(ks[4], D, ffn)
    w2, b2 = _dense(ks[5], ffn, D)
    return dict(
        ln1_g=jnp.ones((D,), jnp.float32), ln1_b=jnp.zeros((D,), jnp.float32),
        wq=wq, bq=bq, wk=wk, bk=bk, wv=wv, bv=bv, wo=wo, bo=bo,
        ln2_g=jnp.ones((D,), jnp.float32), ln2_b=jnp.zeros((D,), jnp.float32),
        w1=w1, b1=b1, w2=w2, b2=b2,
    )


def init_params(key):
    D, F_, k = FEATURE_DIM, F_FUTURES, K_MODES
    ffn = FFN_MULT * D
    ks = jax.random.split(key, 7)
    T_w, T_b = _dense(ks[0], D + F_, D)
    Z1_w, Z1_b = _dense(ks[5], D, k)
    return dict(
        T_w=T_w, T_b=T_b,
        U=_att_layer_params(ks[1], D, ffn),
        V=_att_layer_params(ks[2], D, ffn),
        W=_att_layer_params(ks[3], D, ffn),
        X=_att_layer_params(ks[4], D, ffn),
        Y_g=jnp.ones((D,), jnp.float32), Y_b=jnp.zeros((D,), jnp.float32),
        Z1_w=Z1_w, Z1_b=Z1_b,
        bn_g=jnp.ones((k,), jnp.float32), bn_b=jnp.zeros((k,), jnp.float32),
    )


# --------------------------------- main --------------------------------------

if __name__ == "__main__":
    key = jax.random.PRNGKey(0)
    kp, kx = jax.random.split(key)

    params = init_params(kp)

    A = 2
    state_feat = jax.random.normal(kx, (A, TIME_STEPS, FEATURE_DIM), jnp.float32)
    batch_mask = jnp.ones((A, A), jnp.float32)                 # all agents may attend
    padding_mask = jnp.ones((A, TIME_STEPS), jnp.float32)      # unused, like the reference

    fwd = jax.jit(decoder_forward)
    out = fwd(params, state_feat, batch_mask, padding_mask)
    out = jax.block_until_ready(out)

    assert out.shape == (F_FUTURES, A, TIME_STEPS, K_MODES), out.shape
    assert bool(jnp.all(jnp.isfinite(out)))
    print("KERNEL_OK")
</pallas_src>

<mosaic_0001>
module attributes {stable_mosaic.version = 11 : i64} {
  func.func @_decoder_kernel(%arg0: i32, %arg1: memref<16x32xf32, #tpu.memory_space<vmem>>, %arg2: memref<2x2xf32, #tpu.memory_space<vmem>>, %arg3: memref<32x32xf32, #tpu.memory_space<vmem>>, %arg4: memref<1x1x32xf32, #tpu.memory_space<vmem>>, %arg5: memref<4x1x32xf32, #tpu.memory_space<vmem>>, %arg6: memref<4x1x32xf32, #tpu.memory_space<vmem>>, %arg7: memref<4x32x96xf32, #tpu.memory_space<vmem>>, %arg8: memref<4x1x96xf32, #tpu.memory_space<vmem>>, %arg9: memref<4x32x32xf32, #tpu.memory_space<vmem>>, %arg10: memref<4x1x32xf32, #tpu.memory_space<vmem>>, %arg11: memref<4x1x32xf32, #tpu.memory_space<vmem>>, %arg12: memref<4x1x32xf32, #tpu.memory_space<vmem>>, %arg13: memref<4x32x128xf32, #tpu.memory_space<vmem>>, %arg14: memref<4x1x128xf32, #tpu.memory_space<vmem>>, %arg15: memref<4x128x32xf32, #tpu.memory_space<vmem>>, %arg16: memref<4x1x32xf32, #tpu.memory_space<vmem>>, %arg17: memref<1x32xf32, #tpu.memory_space<vmem>>, %arg18: memref<1x32xf32, #tpu.memory_space<vmem>>, %arg19: memref<32x6xf32, #tpu.memory_space<vmem>>, %arg20: memref<1x6xf32, #tpu.memory_space<vmem>>, %arg21: memref<1x16x6xf32, #tpu.memory_space<vmem>>) attributes {dimension_semantics = [#tpu.dimension_semantics<parallel>], iteration_bounds = array<i64: 6>, scalar_prefetch = 0 : i64, scratch_operands = 0 : i64, tpu.core_type = #tpu.core_type<tc>, window_params = [{pipeline_mode = #tpu.pipeline_mode<synchronous>, transform_indices = @transform_0, window_bounds = array<i64: 16, 32>}, {pipeline_mode = #tpu.pipeline_mode<synchronous>, transform_indices = @transform_1, window_bounds = array<i64: 2, 2>}, {pipeline_mode = #tpu.pipeline_mode<synchronous>, transform_indices = @transform_2, window_bounds = array<i64: 32, 32>}, {transform_indices = @transform_3, window_bounds = array<i64: 1, 1, 32>}, {pipeline_mode = #tpu.pipeline_mode<synchronous>, transform_indices = @transform_4, window_bounds = array<i64: 4, 1, 32>}, {pipeline_mode = #tpu.pipeline_mode<synchronous>, transform_indices = @transform_5, window_bounds = array<i64: 4, 1, 32>}, {pipeline_mode = #tpu.pipeline_mode<synchronous>, transform_indices = @transform_6, window_bounds = array<i64: 4, 32, 96>}, {pipeline_mode = #tpu.pipeline_mode<synchronous>, transform_indices = @transform_7, window_bounds = array<i64: 4, 1, 96>}, {pipeline_mode = #tpu.pipeline_mode<synchronous>, transform_indices = @transform_8, window_bounds = array<i64: 4, 32, 32>}, {pipeline_mode = #tpu.pipeline_mode<synchronous>, transform_indices = @transform_9, window_bounds = array<i64: 4, 1, 32>}, {pipeline_mode = #tpu.pipeline_mode<synchronous>, transform_indices = @transform_10, window_bounds = array<i64: 4, 1, 32>}, {pipeline_mode = #tpu.pipeline_mode<synchronous>, transform_indices = @transform_11, window_bounds = array<i64: 4, 1, 32>}, {pipeline_mode = #tpu.pipeline_mode<synchronous>, transform_indices = @transform_12, window_bounds = array<i64: 4, 32, 128>}, {pipeline_mode = #tpu.pipeline_mode<synchronous>, transform_indices = @transform_13, window_bounds = array<i64: 4, 1, 128>}, {pipeline_mode = #tpu.pipeline_mode<synchronous>, transform_indices = @transform_14, window_bounds = array<i64: 4, 128, 32>}, {pipeline_mode = #tpu.pipeline_mode<synchronous>, transform_indices = @transform_15, window_bounds = array<i64: 4, 1, 32>}, {pipeline_mode = #tpu.pipeline_mode<synchronous>, transform_indices = @transform_16, window_bounds = array<i64: 1, 32>}, {pipeline_mode = #tpu.pipeline_mode<synchronous>, transform_indices = @transform_17, window_bounds = array<i64: 1, 32>}, {pipeline_mode = #tpu.pipeline_mode<synchronous>, transform_indices = @transform_18, window_bounds = array<i64: 32, 6>}, {pipeline_mode = #tpu.pipeline_mode<synchronous>, transform_indices = @transform_19, window_bounds = array<i64: 1, 6>}, {transform_indices = @transform_20, window_bounds = array<i64: 1, 16, 6>}]} {
    %c0 = arith.constant 0 : index
    %c0_0 = arith.constant 0 : index
    %0 = vector.load %arg1[%c0, %c0_0] : memref<16x32xf32, #tpu.memory_space<vmem>>, vector<16x32xf32>
    %c0_1 = arith.constant 0 : index
    %c0_2 = arith.constant 0 : index
    %1 = vector.load %arg2[%c0_1, %c0_2] : memref<2x2xf32, #tpu.memory_space<vmem>>, vector<2x2xf32>
    %c0_3 = arith.constant 0 : index
    %c0_4 = arith.constant 0 : index
    %2 = vector.load %arg3[%c0_3, %c0_4] : memref<32x32xf32, #tpu.memory_space<vmem>>, vector<32x32xf32>
    %cst = arith.constant dense<0.000000e+00> : vector<16x32xf32>
    %3 = tpu.matmul %0, %2, %cst {dimension_numbers = #tpu.dot_dimension_numbers<[1], [0], [0], [1], [0, 0, 1, 1], [], []>} : vector<16x32xf32>, vector<32x32xf32>, vector<16x32xf32> -> vector<16x32xf32>
    %c0_5 = arith.constant 0 : index
    %c0_6 = arith.constant 0 : index
    %c0_7 = arith.constant 0 : index
    %4 = vector.load %arg4[%c0_5, %c0_6, %c0_7] : memref<1x1x32xf32, #tpu.memory_space<vmem>>, vector<1x1x32xf32>
    %5 = vector.shape_cast %4 : vector<1x1x32xf32> to vector<1x32xf32>
    %6 = vector.broadcast %5 : vector<1x32xf32> to vector<16x32xf32>
    %7 = arith.addf %3, %6 : vector<16x32xf32>
    %cst_8 = arith.constant 0.000000e+00 : f32
    %8 = vector.broadcast %cst_8 : f32 to vector<16x32xf32>
    %9 = arith.maximumf %7, %8 : vector<16x32xf32>
    %c0_9 = arith.constant 0 : index
    %c0_10 = arith.constant 0 : index
    %c0_11 = arith.constant 0 : index
    %10 = vector.load %arg5[%c0_9, %c0_10, %c0_11] : memref<4x1x32xf32, #tpu.memory_space<vmem>>, vector<1x1x32xf32>
    %11 = vector.shape_cast %10 : vector<1x1x32xf32> to vector<1x32xf32>
    %c0_12 = arith.constant 0 : index
    %c0_13 = arith.constant 0 : index
    %c0_14 = arith.constant 0 : index
    %12 = vector.load %arg6[%c0_12, %c0_13, %c0_14] : memref<4x1x32xf32, #tpu.memory_space<vmem>>, vector<1x1x32xf32>
    %13 = vector.shape_cast %12 : vector<1x1x32xf32> to vector<1x32xf32>
    %cst_15 = arith.constant dense<0.000000e+00> : vector<16xf32>
    %14 = vector.multi_reduction <add>, %9, %cst_15 [1] : vector<16x32xf32> to vector<16xf32>
    %15 = vector.shape_cast %14 : vector<16xf32> to vector<16x1xf32>
    %cst_16 = arith.constant 3.200000e+01 : f32
    %16 = vector.broadcast %cst_16 : f32 to vector<16x1xf32>
    %17 = arith.divf %15, %16 : vector<16x1xf32>
    %18 = vector.broadcast %17 : vector<16x1xf32> to vector<16x32xf32>
    %19 = arith.subf %9, %18 : vector<16x32xf32>
    %20 = arith.mulf %19, %19 : vector<16x32xf32>
    %cst_17 = arith.constant dense<0.000000e+00> : vector<16xf32>
    %21 = vector.multi_reduction <add>, %20, %cst_17 [1] : vector<16x32xf32> to vector<16xf32>
    %22 = vector.shape_cast %21 : vector<16xf32> to vector<16x1xf32>
    %cst_18 = arith.constant 3.200000e+01 : f32
    %23 = vector.broadcast %cst_18 : f32 to vector<16x1xf32>
    %24 = arith.divf %22, %23 : vector<16x1xf32>
    %25 = vector.broadcast %17 : vector<16x1xf32> to vector<16x32xf32>
    %26 = arith.subf %9, %25 : vector<16x32xf32>
    %cst_19 = arith.constant 9.99999974E-6 : f32
    %27 = vector.broadcast %cst_19 : f32 to vector<16x1xf32>
    %28 = arith.addf %24, %27 : vector<16x1xf32>
    %29 = math.rsqrt %28 : vector<16x1xf32>
    %30 = vector.broadcast %29 : vector<16x1xf32> to vector<16x32xf32>
    %31 = arith.mulf %26, %30 : vector<16x32xf32>
    %32 = vector.broadcast %11 : vector<1x32xf32> to vector<16x32xf32>
    %33 = arith.mulf %31, %32 : vector<16x32xf32>
    %34 = vector.broadcast %13 : vector<1x32xf32> to vector<16x32xf32>
    %35 = arith.addf %33, %34 : vector<16x32xf32>
    %c0_20 = arith.constant 0 : index
    %c0_21 = arith.constant 0 : index
    %c0_22 = arith.constant 0 : index
    %36 = vector.load %arg7[%c0_20, %c0_21, %c0_22] : memref<4x32x96xf32, #tpu.memory_space<vmem>>, vector<1x32x96xf32>
    %37 = vector.shape_cast %36 : vector<1x32x96xf32> to vector<32x96xf32>
    %c0_23 = arith.constant 0 : index
    %c0_24 = arith.constant 0 : index
    %c0_25 = arith.constant 0 : index
    %38 = vector.load %arg8[%c0_23, %c0_24, %c0_25] : memref<4x1x96xf32, #tpu.memory_space<vmem>>, vector<1x1x96xf32>
    %39 = vector.shape_cast %38 : vector<1x1x96xf32> to vector<1x96xf32>
    %c0_26 = arith.constant 0 : index
    %c0_27 = arith.constant 0 : index
    %c0_28 = arith.constant 0 : index
    %40 = vector.load %arg9[%c0_26, %c0_27, %c0_28] : memref<4x32x32xf32, #tpu.memory_space<vmem>>, vector<1x32x32xf32>
    %41 = vector.shape_cast %40 : vector<1x32x32xf32> to vector<32x32xf32>
    %c0_29 = arith.constant 0 : index
    %c0_30 = arith.constant 0 : index
    %c0_31 = arith.constant 0 : index
    %42 = vector.load %arg10[%c0_29, %c0_30, %c0_31] : memref<4x1x32xf32, #tpu.memory_space<vmem>>, vector<1x1x32xf32>
    %43 = vector.shape_cast %42 : vector<1x1x32xf32> to vector<1x32xf32>
    %cst_32 = arith.constant dense<0.000000e+00> : vector<16x96xf32>
    %44 = tpu.matmul %35, %37, %cst_32 {dimension_numbers = #tpu.dot_dimension_numbers<[1], [0], [0], [1], [0, 0, 1, 1], [], []>} : vector<16x32xf32>, vector<32x96xf32>, vector<16x96xf32> -> vector<16x96xf32>
    %45 = vector.broadcast %39 : vector<1x96xf32> to vector<16x96xf32>
    %46 = arith.addf %44, %45 : vector<16x96xf32>
    %47 = vector.extract_strided_slice %46 {offsets = [0, 0], sizes = [16, 32], strides = [1, 1]} : vector<16x96xf32> to vector<16x32xf32>
    %48 = vector.extract_strided_slice %46 {offsets = [0, 32], sizes = [16, 32], strides = [1, 1]} : vector<16x96xf32> to vector<16x32xf32>
    %49 = vector.extract_strided_slice %46 {offsets = [0, 64], sizes = [16, 32], strides = [1, 1]} : vector<16x96xf32> to vector<16x32xf32>
    %50 = vector.extract_strided_slice %47 {offsets = [0, 0], sizes = [8, 8], strides = [1, 1]} : vector<16x32xf32> to vector<8x8xf32>
    %51 = vector.extract_strided_slice %48 {offsets = [0, 0], sizes = [8, 8], strides = [1, 1]} : vector<16x32xf32> to vector<8x8xf32>
    %52 = vector.extract_strided_slice %49 {offsets = [0, 0], sizes = [8, 8], strides = [1, 1]} : vector<16x32xf32> to vector<8x8xf32>
    %53 = tpu.transpose %51, [1, 0] : vector<8x8xf32> -> vector<8x8xf32>
    %cst_33 = arith.constant dense<0.000000e+00> : vector<8x8xf32>
    %54 = tpu.matmul %50, %53, %cst_33 {dimension_numbers = #tpu.dot_dimension_numbers<[1], [0], [0], [1], [0, 0, 1, 1], [], []>} : vector<8x8xf32>, vector<8x8xf32>, vector<8x8xf32> -> vector<8x8xf32>
    %cst_34 = arith.constant 0.353553385 : f32
    %55 = vector.broadcast %cst_34 : f32 to vector<8x8xf32>
    %56 = arith.mulf %54, %55 : vector<8x8xf32>
    %cst_35 = arith.constant dense<0xFF800000> : vector<8xf32>
    %57 = vector.multi_reduction <maximumf>, %56, %cst_35 [1] : vector<8x8xf32> to vector<8xf32>
    %58 = vector.shape_cast %57 : vector<8xf32> to vector<8x1xf32>
    %59 = vector.broadcast %58 : vector<8x1xf32> to vector<8x8xf32>
    %60 = arith.subf %56, %59 : vector<8x8xf32>
    %61 = math.exp %60 : vector<8x8xf32>
    %cst_36 = arith.constant dense<0.000000e+00> : vector<8xf32>
    %62 = vector.multi_reduction <add>, %61, %cst_36 [1] : vector<8x8xf32> to vector<8xf32>
    %63 = vector.shape_cast %62 : vector<8xf32> to vector<8x1xf32>
    %64 = tpu.reciprocal %63 {approx = true} : vector<8x1xf32> -> vector<8x1xf32>
    %65 = vector.broadcast %64 : vector<8x1xf32> to vector<8x8xf32>
    %66 = arith.mulf %61, %65 : vector<8x8xf32>
    %cst_37 = arith.constant dense<0.000000e+00> : vector<8x8xf32>
    %67 = tpu.matmul %66, %52, %cst_37 {dimension_numbers = #tpu.dot_dimension_numbers<[1], [0], [0], [1], [0, 0, 1, 1], [], []>} : vector<8x8xf32>, vector<8x8xf32>, vector<8x8xf32> -> vector<8x8xf32>
    %68 = vector.extract_strided_slice %47 {offsets = [0, 8], sizes = [8, 8], strides = [1, 1]} : vector<16x32xf32> to vector<8x8xf32>
    %69 = vector.extract_strided_slice %48 {offsets = [0, 8], sizes = [8, 8], strides = [1, 1]} : vector<16x32xf32> to vector<8x8xf32>
    %70 = vector.extract_strided_slice %49 {offsets = [0, 8], sizes = [8, 8], strides = [1, 1]} : vector<16x32xf32> to vector<8x8xf32>
    %71 = tpu.transpose %69, [1, 0] : vector<8x8xf32> -> vector<8x8xf32>
    %cst_38 = arith.constant dense<0.000000e+00> : vector<8x8xf32>
    %72 = tpu.matmul %68, %71, %cst_38 {dimension_numbers = #tpu.dot_dimension_numbers<[1], [0], [0], [1], [0, 0, 1, 1], [], []>} : vector<8x8xf32>, vector<8x8xf32>, vector<8x8xf32> -> vector<8x8xf32>
    %cst_39 = arith.constant 0.353553385 : f32
    %73 = vector.broadcast %cst_39 : f32 to vector<8x8xf32>
    %74 = arith.mulf %72, %73 : vector<8x8xf32>
    %cst_40 = arith.constant dense<0xFF800000> : vector<8xf32>
    %75 = vector.multi_reduction <maximumf>, %74, %cst_40 [1] : vector<8x8xf32> to vector<8xf32>
    %76 = vector.shape_cast %75 : vector<8xf32> to vector<8x1xf32>
    %77 = vector.broadcast %76 : vector<8x1xf32> to vector<8x8xf32>
    %78 = arith.subf %74, %77 : vector<8x8xf32>
    %79 = math.exp %78 : vector<8x8xf32>
    %cst_41 = arith.constant dense<0.000000e+00> : vector<8xf32>
    %80 = vector.multi_reduction <add>, %79, %cst_41 [1] : vector<8x8xf32> to vector<8xf32>
    %81 = vector.shape_cast %80 : vector<8xf32> to vector<8x1xf32>
    %82 = tpu.reciprocal %81 {approx = true} : vector<8x1xf32> -> vector<8x1xf32>
    %83 = vector.broadcast %82 : vector<8x1xf32> to vector<8x8xf32>
    %84 = arith.mulf %79, %83 : vector<8x8xf32>
    %cst_42 = arith.constant dense<0.000000e+00> : vector<8x8xf32>
    %85 = tpu.matmul %84, %70, %cst_42 {dimension_numbers = #tpu.dot_dimension_numbers<[1], [0], [0], [1], [0, 0, 1, 1], [], []>} : vector<8x8xf32>, vector<8x8xf32>, vector<8x8xf32> -> vector<8x8xf32>
    %86 = vector.extract_strided_slice %47 {offsets = [0, 16], sizes = [8, 8], strides = [1, 1]} : vector<16x32xf32> to vector<8x8xf32>
    %87 = vector.extract_strided_slice %48 {offsets = [0, 16], sizes = [8, 8], strides = [1, 1]} : vector<16x32xf32> to vector<8x8xf32>
    %88 = vector.extract_strided_slice %49 {offsets = [0, 16], sizes = [8, 8], strides = [1, 1]} : vector<16x32xf32> to vector<8x8xf32>
    %89 = tpu.transpose %87, [1, 0] : vector<8x8xf32> -> vector<8x8xf32>
    %cst_43 = arith.constant dense<0.000000e+00> : vector<8x8xf32>
    %90 = tpu.matmul %86, %89, %cst_43 {dimension_numbers = #tpu.dot_dimension_numbers<[1], [0], [0], [1], [0, 0, 1, 1], [], []>} : vector<8x8xf32>, vector<8x8xf32>, vector<8x8xf32> -> vector<8x8xf32>
    %cst_44 = arith.constant 0.353553385 : f32
    %91 = vector.broadcast %cst_44 : f32 to vector<8x8xf32>
    %92 = arith.mulf %90, %91 : vector<8x8xf32>
    %cst_45 = arith.constant dense<0xFF800000> : vector<8xf32>
    %93 = vector.multi_reduction <maximumf>, %92, %cst_45 [1] : vector<8x8xf32> to vector<8xf32>
    %94 = vector.shape_cast %93 : vector<8xf32> to vector<8x1xf32>
    %95 = vector.broadcast %94 : vector<8x1xf32> to vector<8x8xf32>
    %96 = arith.subf %92, %95 : vector<8x8xf32>
    %97 = math.exp %96 : vector<8x8xf32>
    %cst_46 = arith.constant dense<0.000000e+00> : vector<8xf32>
    %98 = vector.multi_reduction <add>, %97, %cst_46 [1] : vector<8x8xf32> to vector<8xf32>
    %99 = vector.shape_cast %98 : vector<8xf32> to vector<8x1xf32>
    %100 = tpu.reciprocal %99 {approx = true} : vector<8x1xf32> -> vector<8x1xf32>
    %101 = vector.broadcast %100 : vector<8x1xf32> to vector<8x8xf32>
    %102 = arith.mulf %97, %101 : vector<8x8xf32>
    %cst_47 = arith.constant dense<0.000000e+00> : vector<8x8xf32>
    %103 = tpu.matmul %102, %88, %cst_47 {dimension_numbers = #tpu.dot_dimension_numbers<[1], [0], [0], [1], [0, 0, 1, 1], [], []>} : vector<8x8xf32>, vector<8x8xf32>, vector<8x8xf32> -> vector<8x8xf32>
    %104 = vector.extract_strided_slice %47 {offsets = [0, 24], sizes = [8, 8], strides = [1, 1]} : vector<16x32xf32> to vector<8x8xf32>
    %105 = vector.extract_strided_slice %48 {offsets = [0, 24], sizes = [8, 8], strides = [1, 1]} : vector<16x32xf32> to vector<8x8xf32>
    %106 = vector.extract_strided_slice %49 {offsets = [0, 24], sizes = [8, 8], strides = [1, 1]} : vector<16x32xf32> to vector<8x8xf32>
    %107 = tpu.transpose %105, [1, 0] : vector<8x8xf32> -> vector<8x8xf32>
    %cst_48 = arith.constant dense<0.000000e+00> : vector<8x8xf32>
    %108 = tpu.matmul %104, %107, %cst_48 {dimension_numbers = #tpu.dot_dimension_numbers<[1], [0], [0], [1], [0, 0, 1, 1], [], []>} : vector<8x8xf32>, vector<8x8xf32>, vector<8x8xf32> -> vector<8x8xf32>
    %cst_49 = arith.constant 0.353553385 : f32
    %109 = vector.broadcast %cst_49 : f32 to vector<8x8xf32>
    %110 = arith.mulf %108, %109 : vector<8x8xf32>
    %cst_50 = arith.constant dense<0xFF800000> : vector<8xf32>
    %111 = vector.multi_reduction <maximumf>, %110, %cst_50 [1] : vector<8x8xf32> to vector<8xf32>
    %112 = vector.shape_cast %111 : vector<8xf32> to vector<8x1xf32>
    %113 = vector.broadcast %112 : vector<8x1xf32> to vector<8x8xf32>
    %114 = arith.subf %110, %113 : vector<8x8xf32>
    %115 = math.exp %114 : vector<8x8xf32>
    %cst_51 = arith.constant dense<0.000000e+00> : vector<8xf32>
    %116 = vector.multi_reduction <add>, %115, %cst_51 [1] : vector<8x8xf32> to vector<8xf32>
    %117 = vector.shape_cast %116 : vector<8xf32> to vector<8x1xf32>
    %118 = tpu.reciprocal %117 {approx = true} : vector<8x1xf32> -> vector<8x1xf32>
    %119 = vector.broadcast %118 : vector<8x1xf32> to vector<8x8xf32>
    %120 = arith.mulf %115, %119 : vector<8x8xf32>
    %cst_52 = arith.constant dense<0.000000e+00> : vector<8x8xf32>
    %121 = tpu.matmul %120, %106, %cst_52 {dimension_numbers = #tpu.dot_dimension_numbers<[1], [0], [0], [1], [0, 0, 1, 1], [], []>} : vector<8x8xf32>, vector<8x8xf32>, vector<8x8xf32> -> vector<8x8xf32>
    %122 = tpu.concatenate %67, %85, %103, %121 in 1 : vector<8x8xf32>, vector<8x8xf32>, vector<8x8xf32>, vector<8x8xf32> -> vector<8x32xf32>
    %123 = vector.extract_strided_slice %47 {offsets = [8, 0], sizes = [8, 8], strides = [1, 1]} : vector<16x32xf32> to vector<8x8xf32>
    %124 = vector.extract_strided_slice %48 {offsets = [8, 0], sizes = [8, 8], strides = [1, 1]} : vector<16x32xf32> to vector<8x8xf32>
    %125 = vector.extract_strided_slice %49 {offsets = [8, 0], sizes = [8, 8], strides = [1, 1]} : vector<16x32xf32> to vector<8x8xf32>
    %126 = tpu.transpose %124, [1, 0] : vector<8x8xf32> -> vector<8x8xf32>
    %cst_53 = arith.constant dense<0.000000e+00> : vector<8x8xf32>
    %127 = tpu.matmul %123, %126, %cst_53 {dimension_numbers = #tpu.dot_dimension_numbers<[1], [0], [0], [1], [0, 0, 1, 1], [], []>} : vector<8x8xf32>, vector<8x8xf32>, vector<8x8xf32> -> vector<8x8xf32>
    %cst_54 = arith.constant 0.353553385 : f32
    %128 = vector.broadcast %cst_54 : f32 to vector<8x8xf32>
    %129 = arith.mulf %127, %128 : vector<8x8xf32>
    %cst_55 = arith.constant dense<0xFF800000> : vector<8xf32>
    %130 = vector.multi_reduction <maximumf>, %129, %cst_55 [1] : vector<8x8xf32> to vector<8xf32>
    %131 = vector.shape_cast %130 : vector<8xf32> to vector<8x1xf32>
    %132 = vector.broadcast %131 : vector<8x1xf32> to vector<8x8xf32>
    %133 = arith.subf %129, %132 : vector<8x8xf32>
    %134 = math.exp %133 : vector<8x8xf32>
    %cst_56 = arith.constant dense<0.000000e+00> : vector<8xf32>
    %135 = vector.multi_reduction <add>, %134, %cst_56 [1] : vector<8x8xf32> to vector<8xf32>
    %136 = vector.shape_cast %135 : vector<8xf32> to vector<8x1xf32>
    %137 = tpu.reciprocal %136 {approx = true} : vector<8x1xf32> -> vector<8x1xf32>
    %138 = vector.broadcast %137 : vector<8x1xf32> to vector<8x8xf32>
    %139 = arith.mulf %134, %138 : vector<8x8xf32>
    %cst_57 = arith.constant dense<0.000000e+00> : vector<8x8xf32>
    %140 = tpu.matmul %139, %125, %cst_57 {dimension_numbers = #tpu.dot_dimension_numbers<[1], [0], [0], [1], [0, 0, 1, 1], [], []>} : vector<8x8xf32>, vector<8x8xf32>, vector<8x8xf32> -> vector<8x8xf32>
    %141 = vector.extract_strided_slice %47 {offsets = [8, 8], sizes = [8, 8], strides = [1, 1]} : vector<16x32xf32> to vector<8x8xf32>
    %142 = vector.extract_strided_slice %48 {offsets = [8, 8], sizes = [8, 8], strides = [1, 1]} : vector<16x32xf32> to vector<8x8xf32>
    %143 = vector.extract_strided_slice %49 {offsets = [8, 8], sizes = [8, 8], strides = [1, 1]} : vector<16x32xf32> to vector<8x8xf32>
    %144 = tpu.transpose %142, [1, 0] : vector<8x8xf32> -> vector<8x8xf32>
    %cst_58 = arith.constant dense<0.000000e+00> : vector<8x8xf32>
    %145 = tpu.matmul %141, %144, %cst_58 {dimension_numbers = #tpu.dot_dimension_numbers<[1], [0], [0], [1], [0, 0, 1, 1], [], []>} : vector<8x8xf32>, vector<8x8xf32>, vector<8x8xf32> -> vector<8x8xf32>
    %cst_59 = arith.constant 0.353553385 : f32
    %146 = vector.broadcast %cst_59 : f32 to vector<8x8xf32>
    %147 = arith.mulf %145, %146 : vector<8x8xf32>
    %cst_60 = arith.constant dense<0xFF800000> : vector<8xf32>
    %148 = vector.multi_reduction <maximumf>, %147, %cst_60 [1] : vector<8x8xf32> to vector<8xf32>
    %149 = vector.shape_cast %148 : vector<8xf32> to vector<8x1xf32>
    %150 = vector.broadcast %149 : vector<8x1xf32> to vector<8x8xf32>
    %151 = arith.subf %147, %150 : vector<8x8xf32>
    %152 = math.exp %151 : vector<8x8xf32>
    %cst_61 = arith.constant dense<0.000000e+00> : vector<8xf32>
    %153 = vector.multi_reduction <add>, %152, %cst_61 [1] : vector<8x8xf32> to vector<8xf32>
    %154 = vector.shape_cast %153 : vector<8xf32> to vector<8x1xf32>
    %155 = tpu.reciprocal %154 {approx = true} : vector<8x1xf32> -> vector<8x1xf32>
    %156 = vector.broadcast %155 : vector<8x1xf32> to vector<8x8xf32>
    %157 = arith.mulf %152, %156 : vector<8x8xf32>
    %cst_62 = arith.constant dense<0.000000e+00> : vector<8x8xf32>
    %158 = tpu.matmul %157, %143, %cst_62 {dimension_numbers = #tpu.dot_dimension_numbers<[1], [0], [0], [1], [0, 0, 1, 1], [], []>} : vector<8x8xf32>, vector<8x8xf32>, vector<8x8xf32> -> vector<8x8xf32>
    %159 = vector.extract_strided_slice %47 {offsets = [8, 16], sizes = [8, 8], strides = [1, 1]} : vector<16x32xf32> to vector<8x8xf32>
    %160 = vector.extract_strided_slice %48 {offsets = [8, 16], sizes = [8, 8], strides = [1, 1]} : vector<16x32xf32> to vector<8x8xf32>
    %161 = vector.extract_strided_slice %49 {offsets = [8, 16], sizes = [8, 8], strides = [1, 1]} : vector<16x32xf32> to vector<8x8xf32>
    %162 = tpu.transpose %160, [1, 0] : vector<8x8xf32> -> vector<8x8xf32>
    %cst_63 = arith.constant dense<0.000000e+00> : vector<8x8xf32>
    %163 = tpu.matmul %159, %162, %cst_63 {dimension_numbers = #tpu.dot_dimension_numbers<[1], [0], [0], [1], [0, 0, 1, 1], [], []>} : vector<8x8xf32>, vector<8x8xf32>, vector<8x8xf32> -> vector<8x8xf32>
    %cst_64 = arith.constant 0.353553385 : f32
    %164 = vector.broadcast %cst_64 : f32 to vector<8x8xf32>
    %165 = arith.mulf %163, %164 : vector<8x8xf32>
    %cst_65 = arith.constant dense<0xFF800000> : vector<8xf32>
    %166 = vector.multi_reduction <maximumf>, %165, %cst_65 [1] : vector<8x8xf32> to vector<8xf32>
    %167 = vector.shape_cast %166 : vector<8xf32> to vector<8x1xf32>
    %168 = vector.broadcast %167 : vector<8x1xf32> to vector<8x8xf32>
    %169 = arith.subf %165, %168 : vector<8x8xf32>
    %170 = math.exp %169 : vector<8x8xf32>
    %cst_66 = arith.constant dense<0.000000e+00> : vector<8xf32>
    %171 = vector.multi_reduction <add>, %170, %cst_66 [1] : vector<8x8xf32> to vector<8xf32>
    %172 = vector.shape_cast %171 : vector<8xf32> to vector<8x1xf32>
    %173 = tpu.reciprocal %172 {approx = true} : vector<8x1xf32> -> vector<8x1xf32>
    %174 = vector.broadcast %173 : vector<8x1xf32> to vector<8x8xf32>
    %175 = arith.mulf %170, %174 : vector<8x8xf32>
    %cst_67 = arith.constant dense<0.000000e+00> : vector<8x8xf32>
    %176 = tpu.matmul %175, %161, %cst_67 {dimension_numbers = #tpu.dot_dimension_numbers<[1], [0], [0], [1], [0, 0, 1, 1], [], []>} : vector<8x8xf32>, vector<8x8xf32>, vector<8x8xf32> -> vector<8x8xf32>
    %177 = vector.extract_strided_slice %47 {offsets = [8, 24], sizes = [8, 8], strides = [1, 1]} : vector<16x32xf32> to vector<8x8xf32>
    %178 = vector.extract_strided_slice %48 {offsets = [8, 24], sizes = [8, 8], strides = [1, 1]} : vector<16x32xf32> to vector<8x8xf32>
    %179 = vector.extract_strided_slice %49 {offsets = [8, 24], sizes = [8, 8], strides = [1, 1]} : vector<16x32xf32> to vector<8x8xf32>
    %180 = tpu.transpose %178, [1, 0] : vector<8x8xf32> -> vector<8x8xf32>
    %cst_68 = arith.constant dense<0.000000e+00> : vector<8x8xf32>
    %181 = tpu.matmul %177, %180, %cst_68 {dimension_numbers = #tpu.dot_dimension_numbers<[1], [0], [0], [1], [0, 0, 1, 1], [], []>} : vector<8x8xf32>, vector<8x8xf32>, vector<8x8xf32> -> vector<8x8xf32>
    %cst_69 = arith.constant 0.353553385 : f32
    %182 = vector.broadcast %cst_69 : f32 to vector<8x8xf32>
    %183 = arith.mulf %181, %182 : vector<8x8xf32>
    %cst_70 = arith.constant dense<0xFF800000> : vector<8xf32>
    %184 = vector.multi_reduction <maximumf>, %183, %cst_70 [1] : vector<8x8xf32> to vector<8xf32>
    %185 = vector.shape_cast %184 : vector<8xf32> to vector<8x1xf32>
    %186 = vector.broadcast %185 : vector<8x1xf32> to vector<8x8xf32>
    %187 = arith.subf %183, %186 : vector<8x8xf32>
    %188 = math.exp %187 : vector<8x8xf32>
    %cst_71 = arith.constant dense<0.000000e+00> : vector<8xf32>
    %189 = vector.multi_reduction <add>, %188, %cst_71 [1] : vector<8x8xf32> to vector<8xf32>
    %190 = vector.shape_cast %189 : vector<8xf32> to vector<8x1xf32>
    %191 = tpu.reciprocal %190 {approx = true} : vector<8x1xf32> -> vector<8x1xf32>
    %192 = vector.broadcast %191 : vector<8x1xf32> to vector<8x8xf32>
    %193 = arith.mulf %188, %192 : vector<8x8xf32>
    %cst_72 = arith.constant dense<0.000000e+00> : vector<8x8xf32>
    %194 = tpu.matmul %193, %179, %cst_72 {dimension_numbers = #tpu.dot_dimension_numbers<[1], [0], [0], [1], [0, 0, 1, 1], [], []>} : vector<8x8xf32>, vector<8x8xf32>, vector<8x8xf32> -> vector<8x8xf32>
    %195 = tpu.concatenate %140, %158, %176, %194 in 1 : vector<8x8xf32>, vector<8x8xf32>, vector<8x8xf32>, vector<8x8xf32> -> vector<8x32xf32>
    %196 = tpu.concatenate %122, %195 in 0 : vector<8x32xf32>, vector<8x32xf32> -> vector<16x32xf32>
    %cst_73 = arith.constant dense<0.000000e+00> : vector<16x32xf32>
    %197 = tpu.matmul %196, %41, %cst_73 {dimension_numbers = #tpu.dot_dimension_numbers<[1], [0], [0], [1], [0, 0, 1, 1], [], []>} : vector<16x32xf32>, vector<32x32xf32>, vector<16x32xf32> -> vector<16x32xf32>
    %198 = vector.broadcast %43 : vector<1x32xf32> to vector<16x32xf32>
    %199 = arith.addf %197, %198 : vector<16x32xf32>
    %200 = arith.addf %9, %199 : vector<16x32xf32>
    %c0_74 = arith.constant 0 : index
    %c0_75 = arith.constant 0 : index
    %c0_76 = arith.constant 0 : index
    %201 = vector.load %arg11[%c0_74, %c0_75, %c0_76] : memref<4x1x32xf32, #tpu.memory_space<vmem>>, vector<1x1x32xf32>
    %202 = vector.shape_cast %201 : vector<1x1x32xf32> to vector<1x32xf32>
    %c0_77 = arith.constant 0 : index
    %c0_78 = arith.constant 0 : index
    %c0_79 = arith.constant 0 : index
    %203 = vector.load %arg12[%c0_77, %c0_78, %c0_79] : memref<4x1x32xf32, #tpu.memory_space<vmem>>, vector<1x1x32xf32>
    %204 = vector.shape_cast %203 : vector<1x1x32xf32> to vector<1x32xf32>
    %cst_80 = arith.constant dense<0.000000e+00> : vector<16xf32>
    %205 = vector.multi_reduction <add>, %200, %cst_80 [1] : vector<16x32xf32> to vector<16xf32>
    %206 = vector.shape_cast %205 : vector<16xf32> to vector<16x1xf32>
    %cst_81 = arith.constant 3.200000e+01 : f32
    %207 = vector.broadcast %cst_81 : f32 to vector<16x1xf32>
    %208 = arith.divf %206, %207 : vector<16x1xf32>
    %209 = vector.broadcast %208 : vector<16x1xf32> to vector<16x32xf32>
    %210 = arith.subf %200, %209 : vector<16x32xf32>
    %211 = arith.mulf %210, %210 : vector<16x32xf32>
    %cst_82 = arith.constant dense<0.000000e+00> : vector<16xf32>
    %212 = vector.multi_reduction <add>, %211, %cst_82 [1] : vector<16x32xf32> to vector<16xf32>
    %213 = vector.shape_cast %212 : vector<16xf32> to vector<16x1xf32>
    %cst_83 = arith.constant 3.200000e+01 : f32
    %214 = vector.broadcast %cst_83 : f32 to vector<16x1xf32>
    %215 = arith.divf %213, %214 : vector<16x1xf32>
    %216 = vector.broadcast %208 : vector<16x1xf32> to vector<16x32xf32>
    %217 = arith.subf %200, %216 : vector<16x32xf32>
    %cst_84 = arith.constant 9.99999974E-6 : f32
    %218 = vector.broadcast %cst_84 : f32 to vector<16x1xf32>
    %219 = arith.addf %215, %218 : vector<16x1xf32>
    %220 = math.rsqrt %219 : vector<16x1xf32>
    %221 = vector.broadcast %220 : vector<16x1xf32> to vector<16x32xf32>
    %222 = arith.mulf %217, %221 : vector<16x32xf32>
    %223 = vector.broadcast %202 : vector<1x32xf32> to vector<16x32xf32>
    %224 = arith.mulf %222, %223 : vector<16x32xf32>
    %225 = vector.broadcast %204 : vector<1x32xf32> to vector<16x32xf32>
    %226 = arith.addf %224, %225 : vector<16x32xf32>
    %c0_85 = arith.constant 0 : index
    %c0_86 = arith.constant 0 : index
    %c0_87 = arith.constant 0 : index
    %227 = vector.load %arg13[%c0_85, %c0_86, %c0_87] : memref<4x32x128xf32, #tpu.memory_space<vmem>>, vector<1x32x128xf32>
    %228 = vector.shape_cast %227 : vector<1x32x128xf32> to vector<32x128xf32>
    %cst_88 = arith.constant dense<0.000000e+00> : vector<16x128xf32>
    %229 = tpu.matmul %226, %228, %cst_88 {dimension_numbers = #tpu.dot_dimension_numbers<[1], [0], [0], [1], [0, 0, 1, 1], [], []>} : vector<16x32xf32>, vector<32x128xf32>, vector<16x128xf32> -> vector<16x128xf32>
    %c0_89 = arith.constant 0 : index
    %c0_90 = arith.constant 0 : index
    %c0_91 = arith.constant 0 : index
    %230 = vector.load %arg14[%c0_89, %c0_90, %c0_91] : memref<4x1x128xf32, #tpu.memory_space<vmem>>, vector<1x1x128xf32>
    %231 = vector.shape_cast %230 : vector<1x1x128xf32> to vector<1x128xf32>
    %232 = vector.broadcast %231 : vector<1x128xf32> to vector<16x128xf32>
    %233 = arith.addf %229, %232 : vector<16x128xf32>
    %cst_92 = arith.constant 0.000000e+00 : f32
    %234 = vector.broadcast %cst_92 : f32 to vector<16x128xf32>
    %235 = arith.maximumf %233, %234 : vector<16x128xf32>
    %c0_93 = arith.constant 0 : index
    %c0_94 = arith.constant 0 : index
    %c0_95 = arith.constant 0 : index
    %236 = vector.load %arg15[%c0_93, %c0_94, %c0_95] : memref<4x128x32xf32, #tpu.memory_space<vmem>>, vector<1x128x32xf32>
    %237 = vector.shape_cast %236 : vector<1x128x32xf32> to vector<128x32xf32>
    %cst_96 = arith.constant dense<0.000000e+00> : vector<16x32xf32>
    %238 = tpu.matmul %235, %237, %cst_96 {dimension_numbers = #tpu.dot_dimension_numbers<[1], [0], [0], [1], [0, 0, 1, 1], [], []>} : vector<16x128xf32>, vector<128x32xf32>, vector<16x32xf32> -> vector<16x32xf32>
    %c0_97 = arith.constant 0 : index
    %c0_98 = arith.constant 0 : index
    %c0_99 = arith.constant 0 : index
    %239 = vector.load %arg16[%c0_97, %c0_98, %c0_99] : memref<4x1x32xf32, #tpu.memory_space<vmem>>, vector<1x1x32xf32>
    %240 = vector.shape_cast %239 : vector<1x1x32xf32> to vector<1x32xf32>
    %241 = vector.broadcast %240 : vector<1x32xf32> to vector<16x32xf32>
    %242 = arith.addf %238, %241 : vector<16x32xf32>
    %243 = arith.addf %200, %242 : vector<16x32xf32>
    %c1 = arith.constant 1 : index
    %c0_100 = arith.constant 0 : index
    %c0_101 = arith.constant 0 : index
    %244 = vector.load %arg5[%c1, %c0_100, %c0_101] : memref<4x1x32xf32, #tpu.memory_space<vmem>>, vector<1x1x32xf32>
    %245 = vector.shape_cast %244 : vector<1x1x32xf32> to vector<1x32xf32>
    %c1_102 = arith.constant 1 : index
    %c0_103 = arith.constant 0 : index
    %c0_104 = arith.constant 0 : index
    %246 = vector.load %arg6[%c1_102, %c0_103, %c0_104] : memref<4x1x32xf32, #tpu.memory_space<vmem>>, vector<1x1x32xf32>
    %247 = vector.shape_cast %246 : vector<1x1x32xf32> to vector<1x32xf32>
    %cst_105 = arith.constant dense<0.000000e+00> : vector<16xf32>
    %248 = vector.multi_reduction <add>, %243, %cst_105 [1] : vector<16x32xf32> to vector<16xf32>
    %249 = vector.shape_cast %248 : vector<16xf32> to vector<16x1xf32>
    %cst_106 = arith.constant 3.200000e+01 : f32
    %250 = vector.broadcast %cst_106 : f32 to vector<16x1xf32>
    %251 = arith.divf %249, %250 : vector<16x1xf32>
    %252 = vector.broadcast %251 : vector<16x1xf32> to vector<16x32xf32>
    %253 = arith.subf %243, %252 : vector<16x32xf32>
    %254 = arith.mulf %253, %253 : vector<16x32xf32>
    %cst_107 = arith.constant dense<0.000000e+00> : vector<16xf32>
    %255 = vector.multi_reduction <add>, %254, %cst_107 [1] : vector<16x32xf32> to vector<16xf32>
    %256 = vector.shape_cast %255 : vector<16xf32> to vector<16x1xf32>
    %cst_108 = arith.constant 3.200000e+01 : f32
    %257 = vector.broadcast %cst_108 : f32 to vector<16x1xf32>
    %258 = arith.divf %256, %257 : vector<16x1xf32>
    %259 = vector.broadcast %251 : vector<16x1xf32> to vector<16x32xf32>
    %260 = arith.subf %243, %259 : vector<16x32xf32>
    %cst_109 = arith.constant 9.99999974E-6 : f32
    %261 = vector.broadcast %cst_109 : f32 to vector<16x1xf32>
    %262 = arith.addf %258, %261 : vector<16x1xf32>
    %263 = math.rsqrt %262 : vector<16x1xf32>
    %264 = vector.broadcast %263 : vector<16x1xf32> to vector<16x32xf32>
    %265 = arith.mulf %260, %264 : vector<16x32xf32>
    %266 = vector.broadcast %245 : vector<1x32xf32> to vector<16x32xf32>
    %267 = arith.mulf %265, %266 : vector<16x32xf32>
    %268 = vector.broadcast %247 : vector<1x32xf32> to vector<16x32xf32>
    %269 = arith.addf %267, %268 : vector<16x32xf32>
    %c1_110 = arith.constant 1 : index
    %c0_111 = arith.constant 0 : index
    %c0_112 = arith.constant 0 : index
    %270 = vector.load %arg7[%c1_110, %c0_111, %c0_112] : memref<4x32x96xf32, #tpu.memory_space<vmem>>, vector<1x32x96xf32>
    %271 = vector.shape_cast %270 : vector<1x32x96xf32> to vector<32x96xf32>
    %c1_113 = arith.constant 1 : index
    %c0_114 = arith.constant 0 : index
    %c0_115 = arith.constant 0 : index
    %272 = vector.load %arg8[%c1_113, %c0_114, %c0_115] : memref<4x1x96xf32, #tpu.memory_space<vmem>>, vector<1x1x96xf32>
    %273 = vector.shape_cast %272 : vector<1x1x96xf32> to vector<1x96xf32>
    %c1_116 = arith.constant 1 : index
    %c0_117 = arith.constant 0 : index
    %c0_118 = arith.constant 0 : index
    %274 = vector.load %arg9[%c1_116, %c0_117, %c0_118] : memref<4x32x32xf32, #tpu.memory_space<vmem>>, vector<1x32x32xf32>
    %275 = vector.shape_cast %274 : vector<1x32x32xf32> to vector<32x32xf32>
    %c1_119 = arith.constant 1 : index
    %c0_120 = arith.constant 0 : index
    %c0_121 = arith.constant 0 : index
    %276 = vector.load %arg10[%c1_119, %c0_120, %c0_121] : memref<4x1x32xf32, #tpu.memory_space<vmem>>, vector<1x1x32xf32>
    %277 = vector.shape_cast %276 : vector<1x1x32xf32> to vector<1x32xf32>
    %cst_122 = arith.constant dense<0.000000e+00> : vector<16x96xf32>
    %278 = tpu.matmul %269, %271, %cst_122 {dimension_numbers = #tpu.dot_dimension_numbers<[1], [0], [0], [1], [0, 0, 1, 1], [], []>} : vector<16x32xf32>, vector<32x96xf32>, vector<16x96xf32> -> vector<16x96xf32>
    %279 = vector.broadcast %273 : vector<1x96xf32> to vector<16x96xf32>
    %280 = arith.addf %278, %279 : vector<16x96xf32>
    %281 = vector.extract_strided_slice %280 {offsets = [0, 0], sizes = [16, 32], strides = [1, 1]} : vector<16x96xf32> to vector<16x32xf32>
    %282 = vector.extract_strided_slice %280 {offsets = [0, 32], sizes = [16, 32], strides = [1, 1]} : vector<16x96xf32> to vector<16x32xf32>
    %283 = vector.extract_strided_slice %280 {offsets = [0, 64], sizes = [16, 32], strides = [1, 1]} : vector<16x96xf32> to vector<16x32xf32>
    %284 = vector.extract_strided_slice %281 {offsets = [0, 0], sizes = [8, 8], strides = [1, 1]} : vector<16x32xf32> to vector<8x8xf32>
    %285 = vector.extract_strided_slice %281 {offsets = [8, 0], sizes = [8, 8], strides = [1, 1]} : vector<16x32xf32> to vector<8x8xf32>
    %286 = vector.extract_strided_slice %282 {offsets = [0, 0], sizes = [8, 8], strides = [1, 1]} : vector<16x32xf32> to vector<8x8xf32>
    %287 = vector.extract_strided_slice %282 {offsets = [8, 0], sizes = [8, 8], strides = [1, 1]} : vector<16x32xf32> to vector<8x8xf32>
    %288 = vector.extract_strided_slice %283 {offsets = [0, 0], sizes = [8, 8], strides = [1, 1]} : vector<16x32xf32> to vector<8x8xf32>
    %289 = vector.extract_strided_slice %283 {offsets = [8, 0], sizes = [8, 8], strides = [1, 1]} : vector<16x32xf32> to vector<8x8xf32>
    %290 = arith.mulf %284, %286 : vector<8x8xf32>
    %cst_123 = arith.constant dense<0.000000e+00> : vector<8xf32>
    %291 = vector.multi_reduction <add>, %290, %cst_123 [1] : vector<8x8xf32> to vector<8xf32>
    %292 = vector.shape_cast %291 : vector<8xf32> to vector<8x1xf32>
    %cst_124 = arith.constant 0.353553385 : f32
    %293 = vector.broadcast %cst_124 : f32 to vector<8x1xf32>
    %294 = arith.mulf %292, %293 : vector<8x1xf32>
    %295 = arith.mulf %284, %287 : vector<8x8xf32>
    %cst_125 = arith.constant dense<0.000000e+00> : vector<8xf32>
    %296 = vector.multi_reduction <add>, %295, %cst_125 [1] : vector<8x8xf32> to vector<8xf32>
    %297 = vector.shape_cast %296 : vector<8xf32> to vector<8x1xf32>
    %cst_126 = arith.constant 0.353553385 : f32
    %298 = vector.broadcast %cst_126 : f32 to vector<8x1xf32>
    %299 = arith.mulf %297, %298 : vector<8x1xf32>
    %300 = tpu.concatenate %294, %299 in 1 : vector<8x1xf32>, vector<8x1xf32> -> vector<8x2xf32>
    %301 = vector.extract_strided_slice %1 {offsets = [0, 0], sizes = [1, 2], strides = [1, 1]} : vector<2x2xf32> to vector<1x2xf32>
    %302 = vector.broadcast %301 : vector<1x2xf32> to vector<8x2xf32>
    %303 = arith.addf %300, %302 : vector<8x2xf32>
    %cst_127 = arith.constant dense<0xFF800000> : vector<8xf32>
    %304 = vector.multi_reduction <maximumf>, %303, %cst_127 [1] : vector<8x2xf32> to vector<8xf32>
    %305 = vector.shape_cast %304 : vector<8xf32> to vector<8x1xf32>
    %306 = vector.broadcast %305 : vector<8x1xf32> to vector<8x2xf32>
    %307 = arith.subf %303, %306 : vector<8x2xf32>
    %308 = math.exp %307 : vector<8x2xf32>
    %cst_128 = arith.constant dense<0.000000e+00> : vector<8xf32>
    %309 = vector.multi_reduction <add>, %308, %cst_128 [1] : vector<8x2xf32> to vector<8xf32>
    %310 = vector.shape_cast %309 : vector<8xf32> to vector<8x1xf32>
    %311 = tpu.reciprocal %310 {approx = true} : vector<8x1xf32> -> vector<8x1xf32>
    %312 = vector.broadcast %311 : vector<8x1xf32> to vector<8x2xf32>
    %313 = arith.mulf %308, %312 : vector<8x2xf32>
    %314 = vector.extract_strided_slice %313 {offsets = [0, 0], sizes = [8, 1], strides = [1, 1]} : vector<8x2xf32> to vector<8x1xf32>
    %315 = vector.broadcast %314 : vector<8x1xf32> to vector<8x8xf32>
    %316 = arith.mulf %315, %288 : vector<8x8xf32>
    %317 = vector.extract_strided_slice %313 {offsets = [0, 1], sizes = [8, 1], strides = [1, 1]} : vector<8x2xf32> to vector<8x1xf32>
    %318 = vector.broadcast %317 : vector<8x1xf32> to vector<8x8xf32>
    %319 = arith.mulf %318, %289 : vector<8x8xf32>
    %320 = arith.addf %316, %319 : vector<8x8xf32>
    %321 = arith.mulf %285, %286 : vector<8x8xf32>
    %cst_129 = arith.constant dense<0.000000e+00> : vector<8xf32>
    %322 = vector.multi_reduction <add>, %321, %cst_129 [1] : vector<8x8xf32> to vector<8xf32>
    %323 = vector.shape_cast %322 : vector<8xf32> to vector<8x1xf32>
    %cst_130 = arith.constant 0.353553385 : f32
    %324 = vector.broadcast %cst_130 : f32 to vector<8x1xf32>
    %325 = arith.mulf %323, %324 : vector<8x1xf32>
    %326 = arith.mulf %285, %287 : vector<8x8xf32>
    %cst_131 = arith.constant dense<0.000000e+00> : vector<8xf32>
    %327 = vector.multi_reduction <add>, %326, %cst_131 [1] : vector<8x8xf32> to vector<8xf32>
    %328 = vector.shape_cast %327 : vector<8xf32> to vector<8x1xf32>
    %cst_132 = arith.constant 0.353553385 : f32
    %329 = vector.broadcast %cst_132 : f32 to vector<8x1xf32>
    %330 = arith.mulf %328, %329 : vector<8x1xf32>
    %331 = tpu.concatenate %325, %330 in 1 : vector<8x1xf32>, vector<8x1xf32> -> vector<8x2xf32>
    %332 = vector.extract_strided_slice %1 {offsets = [1, 0], sizes = [1, 2], strides = [1, 1]} : vector<2x2xf32> to vector<1x2xf32>
    %333 = vector.broadcast %332 : vector<1x2xf32> to vector<8x2xf32>
    %334 = arith.addf %331, %333 : vector<8x2xf32>
    %cst_133 = arith.constant dense<0xFF800000> : vector<8xf32>
    %335 = vector.multi_reduction <maximumf>, %334, %cst_133 [1] : vector<8x2xf32> to vector<8xf32>
    %336 = vector.shape_cast %335 : vector<8xf32> to vector<8x1xf32>
    %337 = vector.broadcast %336 : vector<8x1xf32> to vector<8x2xf32>
    %338 = arith.subf %334, %337 : vector<8x2xf32>
    %339 = math.exp %338 : vector<8x2xf32>
    %cst_134 = arith.constant dense<0.000000e+00> : vector<8xf32>
    %340 = vector.multi_reduction <add>, %339, %cst_134 [1] : vector<8x2xf32> to vector<8xf32>
    %341 = vector.shape_cast %340 : vector<8xf32> to vector<8x1xf32>
    %342 = tpu.reciprocal %341 {approx = true} : vector<8x1xf32> -> vector<8x1xf32>
    %343 = vector.broadcast %342 : vector<8x1xf32> to vector<8x2xf32>
    %344 = arith.mulf %339, %343 : vector<8x2xf32>
    %345 = vector.extract_strided_slice %344 {offsets = [0, 0], sizes = [8, 1], strides = [1, 1]} : vector<8x2xf32> to vector<8x1xf32>
    %346 = vector.broadcast %345 : vector<8x1xf32> to vector<8x8xf32>
    %347 = arith.mulf %346, %288 : vector<8x8xf32>
    %348 = vector.extract_strided_slice %344 {offsets = [0, 1], sizes = [8, 1], strides = [1, 1]} : vector<8x2xf32> to vector<8x1xf32>
    %349 = vector.broadcast %348 : vector<8x1xf32> to vector<8x8xf32>
    %350 = arith.mulf %349, %289 : vector<8x8xf32>
    %351 = arith.addf %347, %350 : vector<8x8xf32>
    %352 = vector.extract_strided_slice %281 {offsets = [0, 8], sizes = [8, 8], strides = [1, 1]} : vector<16x32xf32> to vector<8x8xf32>
    %353 = vector.extract_strided_slice %281 {offsets = [8, 8], sizes = [8, 8], strides = [1, 1]} : vector<16x32xf32> to vector<8x8xf32>
    %354 = vector.extract_strided_slice %282 {offsets = [0, 8], sizes = [8, 8], strides = [1, 1]} : vector<16x32xf32> to vector<8x8xf32>
    %355 = vector.extract_strided_slice %282 {offsets = [8, 8], sizes = [8, 8], strides = [1, 1]} : vector<16x32xf32> to vector<8x8xf32>
    %356 = vector.extract_strided_slice %283 {offsets = [0, 8], sizes = [8, 8], strides = [1, 1]} : vector<16x32xf32> to vector<8x8xf32>
    %357 = vector.extract_strided_slice %283 {offsets = [8, 8], sizes = [8, 8], strides = [1, 1]} : vector<16x32xf32> to vector<8x8xf32>
    %358 = arith.mulf %352, %354 : vector<8x8xf32>
    %cst_135 = arith.constant dense<0.000000e+00> : vector<8xf32>
    %359 = vector.multi_reduction <add>, %358, %cst_135 [1] : vector<8x8xf32> to vector<8xf32>
    %360 = vector.shape_cast %359 : vector<8xf32> to vector<8x1xf32>
    %cst_136 = arith.constant 0.353553385 : f32
    %361 = vector.broadcast %cst_136 : f32 to vector<8x1xf32>
    %362 = arith.mulf %360, %361 : vector<8x1xf32>
    %363 = arith.mulf %352, %355 : vector<8x8xf32>
    %cst_137 = arith.constant dense<0.000000e+00> : vector<8xf32>
    %364 = vector.multi_reduction <add>, %363, %cst_137 [1] : vector<8x8xf32> to vector<8xf32>
    %365 = vector.shape_cast %364 : vector<8xf32> to vector<8x1xf32>
    %cst_138 = arith.constant 0.353553385 : f32
    %366 = vector.broadcast %cst_138 : f32 to vector<8x1xf32>
    %367 = arith.mulf %365, %366 : vector<8x1xf32>
    %368 = tpu.concatenate %362, %367 in 1 : vector<8x1xf32>, vector<8x1xf32> -> vector<8x2xf32>
    %369 = vector.extract_strided_slice %1 {offsets = [0, 0], sizes = [1, 2], strides = [1, 1]} : vector<2x2xf32> to vector<1x2xf32>
    %370 = vector.broadcast %369 : vector<1x2xf32> to vector<8x2xf32>
    %371 = arith.addf %368, %370 : vector<8x2xf32>
    %cst_139 = arith.constant dense<0xFF800000> : vector<8xf32>
    %372 = vector.multi_reduction <maximumf>, %371, %cst_139 [1] : vector<8x2xf32> to vector<8xf32>
    %373 = vector.shape_cast %372 : vector<8xf32> to vector<8x1xf32>
    %374 = vector.broadcast %373 : vector<8x1xf32> to vector<8x2xf32>
    %375 = arith.subf %371, %374 : vector<8x2xf32>
    %376 = math.exp %375 : vector<8x2xf32>
    %cst_140 = arith.constant dense<0.000000e+00> : vector<8xf32>
    %377 = vector.multi_reduction <add>, %376, %cst_140 [1] : vector<8x2xf32> to vector<8xf32>
    %378 = vector.shape_cast %377 : vector<8xf32> to vector<8x1xf32>
    %379 = tpu.reciprocal %378 {approx = true} : vector<8x1xf32> -> vector<8x1xf32>
    %380 = vector.broadcast %379 : vector<8x1xf32> to vector<8x2xf32>
    %381 = arith.mulf %376, %380 : vector<8x2xf32>
    %382 = vector.extract_strided_slice %381 {offsets = [0, 0], sizes = [8, 1], strides = [1, 1]} : vector<8x2xf32> to vector<8x1xf32>
    %383 = vector.broadcast %382 : vector<8x1xf32> to vector<8x8xf32>
    %384 = arith.mulf %383, %356 : vector<8x8xf32>
    %385 = vector.extract_strided_slice %381 {offsets = [0, 1], sizes = [8, 1], strides = [1, 1]} : vector<8x2xf32> to vector<8x1xf32>
    %386 = vector.broadcast %385 : vector<8x1xf32> to vector<8x8xf32>
    %387 = arith.mulf %386, %357 : vector<8x8xf32>
    %388 = arith.addf %384, %387 : vector<8x8xf32>
    %389 = arith.mulf %353, %354 : vector<8x8xf32>
    %cst_141 = arith.constant dense<0.000000e+00> : vector<8xf32>
    %390 = vector.multi_reduction <add>, %389, %cst_141 [1] : vector<8x8xf32> to vector<8xf32>
    %391 = vector.shape_cast %390 : vector<8xf32> to vector<8x1xf32>
    %cst_142 = arith.constant 0.353553385 : f32
    %392 = vector.broadcast %cst_142 : f32 to vector<8x1xf32>
    %393 = arith.mulf %391, %392 : vector<8x1xf32>
    %394 = arith.mulf %353, %355 : vector<8x8xf32>
    %cst_143 = arith.constant dense<0.000000e+00> : vector<8xf32>
    %395 = vector.multi_reduction <add>, %394, %cst_143 [1] : vector<8x8xf32> to vector<8xf32>
    %396 = vector.shape_cast %395 : vector<8xf32> to vector<8x1xf32>
    %cst_144 = arith.constant 0.353553385 : f32
    %397 = vector.broadcast %cst_144 : f32 to vector<8x1xf32>
    %398 = arith.mulf %396, %397 : vector<8x1xf32>
    %399 = tpu.concatenate %393, %398 in 1 : vector<8x1xf32>, vector<8x1xf32> -> vector<8x2xf32>
    %400 = vector.extract_strided_slice %1 {offsets = [1, 0], sizes = [1, 2], strides = [1, 1]} : vector<2x2xf32> to vector<1x2xf32>
    %401 = vector.broadcast %400 : vector<1x2xf32> to vector<8x2xf32>
    %402 = arith.addf %399, %401 : vector<8x2xf32>
    %cst_145 = arith.constant dense<0xFF800000> : vector<8xf32>
    %403 = vector.multi_reduction <maximumf>, %402, %cst_145 [1] : vector<8x2xf32> to vector<8xf32>
    %404 = vector.shape_cast %403 : vector<8xf32> to vector<8x1xf32>
    %405 = vector.broadcast %404 : vector<8x1xf32> to vector<8x2xf32>
    %406 = arith.subf %402, %405 : vector<8x2xf32>
    %407 = math.exp %406 : vector<8x2xf32>
    %cst_146 = arith.constant dense<0.000000e+00> : vector<8xf32>
    %408 = vector.multi_reduction <add>, %407, %cst_146 [1] : vector<8x2xf32> to vector<8xf32>
    %409 = vector.shape_cast %408 : vector<8xf32> to vector<8x1xf32>
    %410 = tpu.reciprocal %409 {approx = true} : vector<8x1xf32> -> vector<8x1xf32>
    %411 = vector.broadcast %410 : vector<8x1xf32> to vector<8x2xf32>
    %412 = arith.mulf %407, %411 : vector<8x2xf32>
    %413 = vector.extract_strided_slice %412 {offsets = [0, 0], sizes = [8, 1], strides = [1, 1]} : vector<8x2xf32> to vector<8x1xf32>
    %414 = vector.broadcast %413 : vector<8x1xf32> to vector<8x8xf32>
    %415 = arith.mulf %414, %356 : vector<8x8xf32>
    %416 = vector.extract_strided_slice %412 {offsets = [0, 1], sizes = [8, 1], strides = [1, 1]} : vector<8x2xf32> to vector<8x1xf32>
    %417 = vector.broadcast %416 : vector<8x1xf32> to vector<8x8xf32>
    %418 = arith.mulf %417, %357 : vector<8x8xf32>
    %419 = arith.addf %415, %418 : vector<8x8xf32>
    %420 = vector.extract_strided_slice %281 {offsets = [0, 16], sizes = [8, 8], strides = [1, 1]} : vector<16x32xf32> to vector<8x8xf32>
    %421 = vector.extract_strided_slice %281 {offsets = [8, 16], sizes = [8, 8], strides = [1, 1]} : vector<16x32xf32> to vector<8x8xf32>
    %422 = vector.extract_strided_slice %282 {offsets = [0, 16], sizes = [8, 8], strides = [1, 1]} : vector<16x32xf32> to vector<8x8xf32>
    %423 = vector.extract_strided_slice %282 {offsets = [8, 16], sizes = [8, 8], strides = [1, 1]} : vector<16x32xf32> to vector<8x8xf32>
    %424 = vector.extract_strided_slice %283 {offsets = [0, 16], sizes = [8, 8], strides = [1, 1]} : vector<16x32xf32> to vector<8x8xf32>
    %425 = vector.extract_strided_slice %283 {offsets = [8, 16], sizes = [8, 8], strides = [1, 1]} : vector<16x32xf32> to vector<8x8xf32>
    %426 = arith.mulf %420, %422 : vector<8x8xf32>
    %cst_147 = arith.constant dense<0.000000e+00> : vector<8xf32>
    %427 = vector.multi_reduction <add>, %426, %cst_147 [1] : vector<8x8xf32> to vector<8xf32>
    %428 = vector.shape_cast %427 : vector<8xf32> to vector<8x1xf32>
    %cst_148 = arith.constant 0.353553385 : f32
    %429 = vector.broadcast %cst_148 : f32 to vector<8x1xf32>
    %430 = arith.mulf %428, %429 : vector<8x1xf32>
    %431 = arith.mulf %420, %423 : vector<8x8xf32>
    %cst_149 = arith.constant dense<0.000000e+00> : vector<8xf32>
    %432 = vector.multi_reduction <add>, %431, %cst_149 [1] : vector<8x8xf32> to vector<8xf32>
    %433 = vector.shape_cast %432 : vector<8xf32> to vector<8x1xf32>
    %cst_150 = arith.constant 0.353553385 : f32
    %434 = vector.broadcast %cst_150 : f32 to vector<8x1xf32>
    %435 = arith.mulf %433, %434 : vector<8x1xf32>
    %436 = tpu.concatenate %430, %435 in 1 : vector<8x1xf32>, vector<8x1xf32> -> vector<8x2xf32>
    %437 = vector.extract_strided_slice %1 {offsets = [0, 0], sizes = [1, 2], strides = [1, 1]} : vector<2x2xf32> to vector<1x2xf32>
    %438 = vector.broadcast %437 : vector<1x2xf32> to vector<8x2xf32>
    %439 = arith.addf %436, %438 : vector<8x2xf32>
    %cst_151 = arith.constant dense<0xFF800000> : vector<8xf32>
    %440 = vector.multi_reduction <maximumf>, %439, %cst_151 [1] : vector<8x2xf32> to vector<8xf32>
    %441 = vector.shape_cast %440 : vector<8xf32> to vector<8x1xf32>
    %442 = vector.broadcast %441 : vector<8x1xf32> to vector<8x2xf32>
    %443 = arith.subf %439, %442 : vector<8x2xf32>
    %444 = math.exp %443 : vector<8x2xf32>
    %cst_152 = arith.constant dense<0.000000e+00> : vector<8xf32>
    %445 = vector.multi_reduction <add>, %444, %cst_152 [1] : vector<8x2xf32> to vector<8xf32>
    %446 = vector.shape_cast %445 : vector<8xf32> to vector<8x1xf32>
    %447 = tpu.reciprocal %446 {approx = true} : vector<8x1xf32> -> vector<8x1xf32>
    %448 = vector.broadcast %447 : vector<8x1xf32> to vector<8x2xf32>
    %449 = arith.mulf %444, %448 : vector<8x2xf32>
    %450 = vector.extract_strided_slice %449 {offsets = [0, 0], sizes = [8, 1], strides = [1, 1]} : vector<8x2xf32> to vector<8x1xf32>
    %451 = vector.broadcast %450 : vector<8x1xf32> to vector<8x8xf32>
    %452 = arith.mulf %451, %424 : vector<8x8xf32>
    %453 = vector.extract_strided_slice %449 {offsets = [0, 1], sizes = [8, 1], strides = [1, 1]} : vector<8x2xf32> to vector<8x1xf32>
    %454 = vector.broadcast %453 : vector<8x1xf32> to vector<8x8xf32>
    %455 = arith.mulf %454, %425 : vector<8x8xf32>
    %456 = arith.addf %452, %455 : vector<8x8xf32>
    %457 = arith.mulf %421, %422 : vector<8x8xf32>
    %cst_153 = arith.constant dense<0.000000e+00> : vector<8xf32>
    %458 = vector.multi_reduction <add>, %457, %cst_153 [1] : vector<8x8xf32> to vector<8xf32>
    %459 = vector.shape_cast %458 : vector<8xf32> to vector<8x1xf32>
    %cst_154 = arith.constant 0.353553385 : f32
    %460 = vector.broadcast %cst_154 : f32 to vector<8x1xf32>
    %461 = arith.mulf %459, %460 : vector<8x1xf32>
    %462 = arith.mulf %421, %423 : vector<8x8xf32>
    %cst_155 = arith.constant dense<0.000000e+00> : vector<8xf32>
    %463 = vector.multi_reduction <add>, %462, %cst_155 [1] : vector<8x8xf32> to vector<8xf32>
    %464 = vector.shape_cast %463 : vector<8xf32> to vector<8x1xf32>
    %cst_156 = arith.constant 0.353553385 : f32
    %465 = vector.broadcast %cst_156 : f32 to vector<8x1xf32>
    %466 = arith.mulf %464, %465 : vector<8x1xf32>
    %467 = tpu.concatenate %461, %466 in 1 : vector<8x1xf32>, vector<8x1xf32> -> vector<8x2xf32>
    %468 = vector.extract_strided_slice %1 {offsets = [1, 0], sizes = [1, 2], strides = [1, 1]} : vector<2x2xf32> to vector<1x2xf32>
    %469 = vector.broadcast %468 : vector<1x2xf32> to vector<8x2xf32>
    %470 = arith.addf %467, %469 : vector<8x2xf32>
    %cst_157 = arith.constant dense<0xFF800000> : vector<8xf32>
    %471 = vector.multi_reduction <maximumf>, %470, %cst_157 [1] : vector<8x2xf32> to vector<8xf32>
    %472 = vector.shape_cast %471 : vector<8xf32> to vector<8x1xf32>
    %473 = vector.broadcast %472 : vector<8x1xf32> to vector<8x2xf32>
    %474 = arith.subf %470, %473 : vector<8x2xf32>
    %475 = math.exp %474 : vector<8x2xf32>
    %cst_158 = arith.constant dense<0.000000e+00> : vector<8xf32>
    %476 = vector.multi_reduction <add>, %475, %cst_158 [1] : vector<8x2xf32> to vector<8xf32>
    %477 = vector.shape_cast %476 : vector<8xf32> to vector<8x1xf32>
    %478 = tpu.reciprocal %477 {approx = true} : vector<8x1xf32> -> vector<8x1xf32>
    %479 = vector.broadcast %478 : vector<8x1xf32> to vector<8x2xf32>
    %480 = arith.mulf %475, %479 : vector<8x2xf32>
    %481 = vector.extract_strided_slice %480 {offsets = [0, 0], sizes = [8, 1], strides = [1, 1]} : vector<8x2xf32> to vector<8x1xf32>
    %482 = vector.broadcast %481 : vector<8x1xf32> to vector<8x8xf32>
    %483 = arith.mulf %482, %424 : vector<8x8xf32>
    %484 = vector.extract_strided_slice %480 {offsets = [0, 1], sizes = [8, 1], strides = [1, 1]} : vector<8x2xf32> to vector<8x1xf32>
    %485 = vector.broadcast %484 : vector<8x1xf32> to vector<8x8xf32>
    %486 = arith.mulf %485, %425 : vector<8x8xf32>
    %487 = arith.addf %483, %486 : vector<8x8xf32>
    %488 = vector.extract_strided_slice %281 {offsets = [0, 24], sizes = [8, 8], strides = [1, 1]} : vector<16x32xf32> to vector<8x8xf32>
    %489 = vector.extract_strided_slice %281 {offsets = [8, 24], sizes = [8, 8], strides = [1, 1]} : vector<16x32xf32> to vector<8x8xf32>
    %490 = vector.extract_strided_slice %282 {offsets = [0, 24], sizes = [8, 8], strides = [1, 1]} : vector<16x32xf32> to vector<8x8xf32>
    %491 = vector.extract_strided_slice %282 {offsets = [8, 24], sizes = [8, 8], strides = [1, 1]} : vector<16x32xf32> to vector<8x8xf32>
    %492 = vector.extract_strided_slice %283 {offsets = [0, 24], sizes = [8, 8], strides = [1, 1]} : vector<16x32xf32> to vector<8x8xf32>
    %493 = vector.extract_strided_slice %283 {offsets = [8, 24], sizes = [8, 8], strides = [1, 1]} : vector<16x32xf32> to vector<8x8xf32>
    %494 = arith.mulf %488, %490 : vector<8x8xf32>
    %cst_159 = arith.constant dense<0.000000e+00> : vector<8xf32>
    %495 = vector.multi_reduction <add>, %494, %cst_159 [1] : vector<8x8xf32> to vector<8xf32>
    %496 = vector.shape_cast %495 : vector<8xf32> to vector<8x1xf32>
    %cst_160 = arith.constant 0.353553385 : f32
    %497 = vector.broadcast %cst_160 : f32 to vector<8x1xf32>
    %498 = arith.mulf %496, %497 : vector<8x1xf32>
    %499 = arith.mulf %488, %491 : vector<8x8xf32>
    %cst_161 = arith.constant dense<0.000000e+00> : vector<8xf32>
    %500 = vector.multi_reduction <add>, %499, %cst_161 [1] : vector<8x8xf32> to vector<8xf32>
    %501 = vector.shape_cast %500 : vector<8xf32> to vector<8x1xf32>
    %cst_162 = arith.constant 0.353553385 : f32
    %502 = vector.broadcast %cst_162 : f32 to vector<8x1xf32>
    %503 = arith.mulf %501, %502 : vector<8x1xf32>
    %504 = tpu.concatenate %498, %503 in 1 : vector<8x1xf32>, vector<8x1xf32> -> vector<8x2xf32>
    %505 = vector.extract_strided_slice %1 {offsets = [0, 0], sizes = [1, 2], strides = [1, 1]} : vector<2x2xf32> to vector<1x2xf32>
    %506 = vector.broadcast %505 : vector<1x2xf32> to vector<8x2xf32>
    %507 = arith.addf %504, %506 : vector<8x2xf32>
    %cst_163 = arith.constant dense<0xFF800000> : vector<8xf32>
    %508 = vector.multi_reduction <maximumf>, %507, %cst_163 [1] : vector<8x2xf32> to vector<8xf32>
    %509 = vector.shape_cast %508 : vector<8xf32> to vector<8x1xf32>
    %510 = vector.broadcast %509 : vector<8x1xf32> to vector<8x2xf32>
    %511 = arith.subf %507, %510 : vector<8x2xf32>
    %512 = math.exp %511 : vector<8x2xf32>
    %cst_164 = arith.constant dense<0.000000e+00> : vector<8xf32>
    %513 = vector.multi_reduction <add>, %512, %cst_164 [1] : vector<8x2xf32> to vector<8xf32>
    %514 = vector.shape_cast %513 : vector<8xf32> to vector<8x1xf32>
    %515 = tpu.reciprocal %514 {approx = true} : vector<8x1xf32> -> vector<8x1xf32>
    %516 = vector.broadcast %515 : vector<8x1xf32> to vector<8x2xf32>
    %517 = arith.mulf %512, %516 : vector<8x2xf32>
    %518 = vector.extract_strided_slice %517 {offsets = [0, 0], sizes = [8, 1], strides = [1, 1]} : vector<8x2xf32> to vector<8x1xf32>
    %519 = vector.broadcast %518 : vector<8x1xf32> to vector<8x8xf32>
    %520 = arith.mulf %519, %492 : vector<8x8xf32>
    %521 = vector.extract_strided_slice %517 {offsets = [0, 1], sizes = [8, 1], strides = [1, 1]} : vector<8x2xf32> to vector<8x1xf32>
    %522 = vector.broadcast %521 : vector<8x1xf32> to vector<8x8xf32>
    %523 = arith.mulf %522, %493 : vector<8x8xf32>
    %524 = arith.addf %520, %523 : vector<8x8xf32>
    %525 = arith.mulf %489, %490 : vector<8x8xf32>
    %cst_165 = arith.constant dense<0.000000e+00> : vector<8xf32>
    %526 = vector.multi_reduction <add>, %525, %cst_165 [1] : vector<8x8xf32> to vector<8xf32>
    %527 = vector.shape_cast %526 : vector<8xf32> to vector<8x1xf32>
    %cst_166 = arith.constant 0.353553385 : f32
    %528 = vector.broadcast %cst_166 : f32 to vector<8x1xf32>
    %529 = arith.mulf %527, %528 : vector<8x1xf32>
    %530 = arith.mulf %489, %491 : vector<8x8xf32>
    %cst_167 = arith.constant dense<0.000000e+00> : vector<8xf32>
    %531 = vector.multi_reduction <add>, %530, %cst_167 [1] : vector<8x8xf32> to vector<8xf32>
    %532 = vector.shape_cast %531 : vector<8xf32> to vector<8x1xf32>
    %cst_168 = arith.constant 0.353553385 : f32
    %533 = vector.broadcast %cst_168 : f32 to vector<8x1xf32>
    %534 = arith.mulf %532, %533 : vector<8x1xf32>
    %535 = tpu.concatenate %529, %534 in 1 : vector<8x1xf32>, vector<8x1xf32> -> vector<8x2xf32>
    %536 = vector.extract_strided_slice %1 {offsets = [1, 0], sizes = [1, 2], strides = [1, 1]} : vector<2x2xf32> to vector<1x2xf32>
    %537 = vector.broadcast %536 : vector<1x2xf32> to vector<8x2xf32>
    %538 = arith.addf %535, %537 : vector<8x2xf32>
    %cst_169 = arith.constant dense<0xFF800000> : vector<8xf32>
    %539 = vector.multi_reduction <maximumf>, %538, %cst_169 [1] : vector<8x2xf32> to vector<8xf32>
    %540 = vector.shape_cast %539 : vector<8xf32> to vector<8x1xf32>
    %541 = vector.broadcast %540 : vector<8x1xf32> to vector<8x2xf32>
    %542 = arith.subf %538, %541 : vector<8x2xf32>
    %543 = math.exp %542 : vector<8x2xf32>
    %cst_170 = arith.constant dense<0.000000e+00> : vector<8xf32>
    %544 = vector.multi_reduction <add>, %543, %cst_170 [1] : vector<8x2xf32> to vector<8xf32>
    %545 = vector.shape_cast %544 : vector<8xf32> to vector<8x1xf32>
    %546 = tpu.reciprocal %545 {approx = true} : vector<8x1xf32> -> vector<8x1xf32>
    %547 = vector.broadcast %546 : vector<8x1xf32> to vector<8x2xf32>
    %548 = arith.mulf %543, %547 : vector<8x2xf32>
    %549 = vector.extract_strided_slice %548 {offsets = [0, 0], sizes = [8, 1], strides = [1, 1]} : vector<8x2xf32> to vector<8x1xf32>
    %550 = vector.broadcast %549 : vector<8x1xf32> to vector<8x8xf32>
    %551 = arith.mulf %550, %492 : vector<8x8xf32>
    %552 = vector.extract_strided_slice %548 {offsets = [0, 1], sizes = [8, 1], strides = [1, 1]} : vector<8x2xf32> to vector<8x1xf32>
    %553 = vector.broadcast %552 : vector<8x1xf32> to vector<8x8xf32>
    %554 = arith.mulf %553, %493 : vector<8x8xf32>
    %555 = arith.addf %551, %554 : vector<8x8xf32>
    %556 = tpu.concatenate %320, %388, %456, %524 in 1 : vector<8x8xf32>, vector<8x8xf32>, vector<8x8xf32>, vector<8x8xf32> -> vector<8x32xf32>
    %557 = tpu.concatenate %351, %419, %487, %555 in 1 : vector<8x8xf32>, vector<8x8xf32>, vector<8x8xf32>, vector<8x8xf32> -> vector<8x32xf32>
    %558 = tpu.concatenate %556, %557 in 0 : vector<8x32xf32>, vector<8x32xf32> -> vector<16x32xf32>
    %cst_171 = arith.constant dense<0.000000e+00> : vector<16x32xf32>
    %559 = tpu.matmul %558, %275, %cst_171 {dimension_numbers = #tpu.dot_dimension_numbers<[1], [0], [0], [1], [0, 0, 1, 1], [], []>} : vector<16x32xf32>, vector<32x32xf32>, vector<16x32xf32> -> vector<16x32xf32>
    %560 = vector.broadcast %277 : vector<1x32xf32> to vector<16x32xf32>
    %561 = arith.addf %559, %560 : vector<16x32xf32>
    %562 = arith.addf %243, %561 : vector<16x32xf32>
    %c1_172 = arith.constant 1 : index
    %c0_173 = arith.constant 0 : index
    %c0_174 = arith.constant 0 : index
    %563 = vector.load %arg11[%c1_172, %c0_173, %c0_174] : memref<4x1x32xf32, #tpu.memory_space<vmem>>, vector<1x1x32xf32>
    %564 = vector.shape_cast %563 : vector<1x1x32xf32> to vector<1x32xf32>
    %c1_175 = arith.constant 1 : index
    %c0_176 = arith.constant 0 : index
    %c0_177 = arith.constant 0 : index
    %565 = vector.load %arg12[%c1_175, %c0_176, %c0_177] : memref<4x1x32xf32, #tpu.memory_space<vmem>>, vector<1x1x32xf32>
    %566 = vector.shape_cast %565 : vector<1x1x32xf32> to vector<1x32xf32>
    %cst_178 = arith.constant dense<0.000000e+00> : vector<16xf32>
    %567 = vector.multi_reduction <add>, %562, %cst_178 [1] : vector<16x32xf32> to vector<16xf32>
    %568 = vector.shape_cast %567 : vector<16xf32> to vector<16x1xf32>
    %cst_179 = arith.constant 3.200000e+01 : f32
    %569 = vector.broadcast %cst_179 : f32 to vector<16x1xf32>
    %570 = arith.divf %568, %569 : vector<16x1xf32>
    %571 = vector.broadcast %570 : vector<16x1xf32> to vector<16x32xf32>
    %572 = arith.subf %562, %571 : vector<16x32xf32>
    %573 = arith.mulf %572, %572 : vector<16x32xf32>
    %cst_180 = arith.constant dense<0.000000e+00> : vector<16xf32>
    %574 = vector.multi_reduction <add>, %573, %cst_180 [1] : vector<16x32xf32> to vector<16xf32>
    %575 = vector.shape_cast %574 : vector<16xf32> to vector<16x1xf32>
    %cst_181 = arith.constant 3.200000e+01 : f32
    %576 = vector.broadcast %cst_181 : f32 to vector<16x1xf32>
    %577 = arith.divf %575, %576 : vector<16x1xf32>
    %578 = vector.broadcast %570 : vector<16x1xf32> to vector<16x32xf32>
    %579 = arith.subf %562, %578 : vector<16x32xf32>
    %cst_182 = arith.constant 9.99999974E-6 : f32
    %580 = vector.broadcast %cst_182 : f32 to vector<16x1xf32>
    %581 = arith.addf %577, %580 : vector<16x1xf32>
    %582 = math.rsqrt %581 : vector<16x1xf32>
    %583 = vector.broadcast %582 : vector<16x1xf32> to vector<16x32xf32>
    %584 = arith.mulf %579, %583 : vector<16x32xf32>
    %585 = vector.broadcast %564 : vector<1x32xf32> to vector<16x32xf32>
    %586 = arith.mulf %584, %585 : vector<16x32xf32>
    %587 = vector.broadcast %566 : vector<1x32xf32> to vector<16x32xf32>
    %588 = arith.addf %586, %587 : vector<16x32xf32>
    %c1_183 = arith.constant 1 : index
    %c0_184 = arith.constant 0 : index
    %c0_185 = arith.constant 0 : index
    %589 = vector.load %arg13[%c1_183, %c0_184, %c0_185] : memref<4x32x128xf32, #tpu.memory_space<vmem>>, vector<1x32x128xf32>
    %590 = vector.shape_cast %589 : vector<1x32x128xf32> to vector<32x128xf32>
    %cst_186 = arith.constant dense<0.000000e+00> : vector<16x128xf32>
    %591 = tpu.matmul %588, %590, %cst_186 {dimension_numbers = #tpu.dot_dimension_numbers<[1], [0], [0], [1], [0, 0, 1, 1], [], []>} : vector<16x32xf32>, vector<32x128xf32>, vector<16x128xf32> -> vector<16x128xf32>
    %c1_187 = arith.constant 1 : index
    %c0_188 = arith.constant 0 : index
    %c0_189 = arith.constant 0 : index
    %592 = vector.load %arg14[%c1_187, %c0_188, %c0_189] : memref<4x1x128xf32, #tpu.memory_space<vmem>>, vector<1x1x128xf32>
    %593 = vector.shape_cast %592 : vector<1x1x128xf32> to vector<1x128xf32>
    %594 = vector.broadcast %593 : vector<1x128xf32> to vector<16x128xf32>
    %595 = arith.addf %591, %594 : vector<16x128xf32>
    %cst_190 = arith.constant 0.000000e+00 : f32
    %596 = vector.broadcast %cst_190 : f32 to vector<16x128xf32>
    %597 = arith.maximumf %595, %596 : vector<16x128xf32>
    %c1_191 = arith.constant 1 : index
    %c0_192 = arith.constant 0 : index
    %c0_193 = arith.constant 0 : index
    %598 = vector.load %arg15[%c1_191, %c0_192, %c0_193] : memref<4x128x32xf32, #tpu.memory_space<vmem>>, vector<1x128x32xf32>
    %599 = vector.shape_cast %598 : vector<1x128x32xf32> to vector<128x32xf32>
    %cst_194 = arith.constant dense<0.000000e+00> : vector<16x32xf32>
    %600 = tpu.matmul %597, %599, %cst_194 {dimension_numbers = #tpu.dot_dimension_numbers<[1], [0], [0], [1], [0, 0, 1, 1], [], []>} : vector<16x128xf32>, vector<128x32xf32>, vector<16x32xf32> -> vector<16x32xf32>
    %c1_195 = arith.constant 1 : index
    %c0_196 = arith.constant 0 : index
    %c0_197 = arith.constant 0 : index
    %601 = vector.load %arg16[%c1_195, %c0_196, %c0_197] : memref<4x1x32xf32, #tpu.memory_space<vmem>>, vector<1x1x32xf32>
    %602 = vector.shape_cast %601 : vector<1x1x32xf32> to vector<1x32xf32>
    %603 = vector.broadcast %602 : vector<1x32xf32> to vector<16x32xf32>
    %604 = arith.addf %600, %603 : vector<16x32xf32>
    %605 = arith.addf %562, %604 : vector<16x32xf32>
    %c2 = arith.constant 2 : index
    %c0_198 = arith.constant 0 : index
    %c0_199 = arith.constant 0 : index
    %606 = vector.load %arg5[%c2, %c0_198, %c0_199] : memref<4x1x32xf32, #tpu.memory_space<vmem>>, vector<1x1x32xf32>
    %607 = vector.shape_cast %606 : vector<1x1x32xf32> to vector<1x32xf32>
    %c2_200 = arith.constant 2 : index
    %c0_201 = arith.constant 0 : index
    %c0_202 = arith.constant 0 : index
    %608 = vector.load %arg6[%c2_200, %c0_201, %c0_202] : memref<4x1x32xf32, #tpu.memory_space<vmem>>, vector<1x1x32xf32>
    %609 = vector.shape_cast %608 : vector<1x1x32xf32> to vector<1x32xf32>
    %cst_203 = arith.constant dense<0.000000e+00> : vector<16xf32>
    %610 = vector.multi_reduction <add>, %605, %cst_203 [1] : vector<16x32xf32> to vector<16xf32>
    %611 = vector.shape_cast %610 : vector<16xf32> to vector<16x1xf32>
    %cst_204 = arith.constant 3.200000e+01 : f32
    %612 = vector.broadcast %cst_204 : f32 to vector<16x1xf32>
    %613 = arith.divf %611, %612 : vector<16x1xf32>
    %614 = vector.broadcast %613 : vector<16x1xf32> to vector<16x32xf32>
    %615 = arith.subf %605, %614 : vector<16x32xf32>
    %616 = arith.mulf %615, %615 : vector<16x32xf32>
    %cst_205 = arith.constant dense<0.000000e+00> : vector<16xf32>
    %617 = vector.multi_reduction <add>, %616, %cst_205 [1] : vector<16x32xf32> to vector<16xf32>
    %618 = vector.shape_cast %617 : vector<16xf32> to vector<16x1xf32>
    %cst_206 = arith.constant 3.200000e+01 : f32
    %619 = vector.broadcast %cst_206 : f32 to vector<16x1xf32>
    %620 = arith.divf %618, %619 : vector<16x1xf32>
    %621 = vector.broadcast %613 : vector<16x1xf32> to vector<16x32xf32>
    %622 = arith.subf %605, %621 : vector<16x32xf32>
    %cst_207 = arith.constant 9.99999974E-6 : f32
    %623 = vector.broadcast %cst_207 : f32 to vector<16x1xf32>
    %624 = arith.addf %620, %623 : vector<16x1xf32>
    %625 = math.rsqrt %624 : vector<16x1xf32>
    %626 = vector.broadcast %625 : vector<16x1xf32> to vector<16x32xf32>
    %627 = arith.mulf %622, %626 : vector<16x32xf32>
    %628 = vector.broadcast %607 : vector<1x32xf32> to vector<16x32xf32>
    %629 = arith.mulf %627, %628 : vector<16x32xf32>
    %630 = vector.broadcast %609 : vector<1x32xf32> to vector<16x32xf32>
    %631 = arith.addf %629, %630 : vector<16x32xf32>
    %c2_208 = arith.constant 2 : index
    %c0_209 = arith.constant 0 : index
    %c0_210 = arith.constant 0 : index
    %632 = vector.load %arg7[%c2_208, %c0_209, %c0_210] : memref<4x32x96xf32, #tpu.memory_space<vmem>>, vector<1x32x96xf32>
    %633 = vector.shape_cast %632 : vector<1x32x96xf32> to vector<32x96xf32>
    %c2_211 = arith.constant 2 : index
    %c0_212 = arith.constant 0 : index
    %c0_213 = arith.constant 0 : index
    %634 = vector.load %arg8[%c2_211, %c0_212, %c0_213] : memref<4x1x96xf32, #tpu.memory_space<vmem>>, vector<1x1x96xf32>
    %635 = vector.shape_cast %634 : vector<1x1x96xf32> to vector<1x96xf32>
    %c2_214 = arith.constant 2 : index
    %c0_215 = arith.constant 0 : index
    %c0_216 = arith.constant 0 : index
    %636 = vector.load %arg9[%c2_214, %c0_215, %c0_216] : memref<4x32x32xf32, #tpu.memory_space<vmem>>, vector<1x32x32xf32>
    %637 = vector.shape_cast %636 : vector<1x32x32xf32> to vector<32x32xf32>
    %c2_217 = arith.constant 2 : index
    %c0_218 = arith.constant 0 : index
    %c0_219 = arith.constant 0 : index
    %638 = vector.load %arg10[%c2_217, %c0_218, %c0_219] : memref<4x1x32xf32, #tpu.memory_space<vmem>>, vector<1x1x32xf32>
    %639 = vector.shape_cast %638 : vector<1x1x32xf32> to vector<1x32xf32>
    %cst_220 = arith.constant dense<0.000000e+00> : vector<16x96xf32>
    %640 = tpu.matmul %631, %633, %cst_220 {dimension_numbers = #tpu.dot_dimension_numbers<[1], [0], [0], [1], [0, 0, 1, 1], [], []>} : vector<16x32xf32>, vector<32x96xf32>, vector<16x96xf32> -> vector<16x96xf32>
    %641 = vector.broadcast %635 : vector<1x96xf32> to vector<16x96xf32>
    %642 = arith.addf %640, %641 : vector<16x96xf32>
    %643 = vector.extract_strided_slice %642 {offsets = [0, 0], sizes = [16, 32], strides = [1, 1]} : vector<16x96xf32> to vector<16x32xf32>
    %644 = vector.extract_strided_slice %642 {offsets = [0, 32], sizes = [16, 32], strides = [1, 1]} : vector<16x96xf32> to vector<16x32xf32>
    %645 = vector.extract_strided_slice %642 {offsets = [0, 64], sizes = [16, 32], strides = [1, 1]} : vector<16x96xf32> to vector<16x32xf32>
    %646 = vector.extract_strided_slice %643 {offsets = [0, 0], sizes = [8, 8], strides = [1, 1]} : vector<16x32xf32> to vector<8x8xf32>
    %647 = vector.extract_strided_slice %644 {offsets = [0, 0], sizes = [8, 8], strides = [1, 1]} : vector<16x32xf32> to vector<8x8xf32>
    %648 = vector.extract_strided_slice %645 {offsets = [0, 0], sizes = [8, 8], strides = [1, 1]} : vector<16x32xf32> to vector<8x8xf32>
    %649 = tpu.transpose %647, [1, 0] : vector<8x8xf32> -> vector<8x8xf32>
    %cst_221 = arith.constant dense<0.000000e+00> : vector<8x8xf32>
    %650 = tpu.matmul %646, %649, %cst_221 {dimension_numbers = #tpu.dot_dimension_numbers<[1], [0], [0], [1], [0, 0, 1, 1], [], []>} : vector<8x8xf32>, vector<8x8xf32>, vector<8x8xf32> -> vector<8x8xf32>
    %cst_222 = arith.constant 0.353553385 : f32
    %651 = vector.broadcast %cst_222 : f32 to vector<8x8xf32>
    %652 = arith.mulf %650, %651 : vector<8x8xf32>
    %cst_223 = arith.constant dense<0xFF800000> : vector<8xf32>
    %653 = vector.multi_reduction <maximumf>, %652, %cst_223 [1] : vector<8x8xf32> to vector<8xf32>
    %654 = vector.shape_cast %653 : vector<8xf32> to vector<8x1xf32>
    %655 = vector.broadcast %654 : vector<8x1xf32> to vector<8x8xf32>
    %656 = arith.subf %652, %655 : vector<8x8xf32>
    %657 = math.exp %656 : vector<8x8xf32>
    %cst_224 = arith.constant dense<0.000000e+00> : vector<8xf32>
    %658 = vector.multi_reduction <add>, %657, %cst_224 [1] : vector<8x8xf32> to vector<8xf32>
    %659 = vector.shape_cast %658 : vector<8xf32> to vector<8x1xf32>
    %660 = tpu.reciprocal %659 {approx = true} : vector<8x1xf32> -> vector<8x1xf32>
    %661 = vector.broadcast %660 : vector<8x1xf32> to vector<8x8xf32>
    %662 = arith.mulf %657, %661 : vector<8x8xf32>
    %cst_225 = arith.constant dense<0.000000e+00> : vector<8x8xf32>
    %663 = tpu.matmul %662, %648, %cst_225 {dimension_numbers = #tpu.dot_dimension_numbers<[1], [0], [0], [1], [0, 0, 1, 1], [], []>} : vector<8x8xf32>, vector<8x8xf32>, vector<8x8xf32> -> vector<8x8xf32>
    %664 = vector.extract_strided_slice %643 {offsets = [0, 8], sizes = [8, 8], strides = [1, 1]} : vector<16x32xf32> to vector<8x8xf32>
    %665 = vector.extract_strided_slice %644 {offsets = [0, 8], sizes = [8, 8], strides = [1, 1]} : vector<16x32xf32> to vector<8x8xf32>
    %666 = vector.extract_strided_slice %645 {offsets = [0, 8], sizes = [8, 8], strides = [1, 1]} : vector<16x32xf32> to vector<8x8xf32>
    %667 = tpu.transpose %665, [1, 0] : vector<8x8xf32> -> vector<8x8xf32>
    %cst_226 = arith.constant dense<0.000000e+00> : vector<8x8xf32>
    %668 = tpu.matmul %664, %667, %cst_226 {dimension_numbers = #tpu.dot_dimension_numbers<[1], [0], [0], [1], [0, 0, 1, 1], [], []>} : vector<8x8xf32>, vector<8x8xf32>, vector<8x8xf32> -> vector<8x8xf32>
    %cst_227 = arith.constant 0.353553385 : f32
    %669 = vector.broadcast %cst_227 : f32 to vector<8x8xf32>
    %670 = arith.mulf %668, %669 : vector<8x8xf32>
    %cst_228 = arith.constant dense<0xFF800000> : vector<8xf32>
    %671 = vector.multi_reduction <maximumf>, %670, %cst_228 [1] : vector<8x8xf32> to vector<8xf32>
    %672 = vector.shape_cast %671 : vector<8xf32> to vector<8x1xf32>
    %673 = vector.broadcast %672 : vector<8x1xf32> to vector<8x8xf32>
    %674 = arith.subf %670, %673 : vector<8x8xf32>
    %675 = math.exp %674 : vector<8x8xf32>
    %cst_229 = arith.constant dense<0.000000e+00> : vector<8xf32>
    %676 = vector.multi_reduction <add>, %675, %cst_229 [1] : vector<8x8xf32> to vector<8xf32>
    %677 = vector.shape_cast %676 : vector<8xf32> to vector<8x1xf32>
    %678 = tpu.reciprocal %677 {approx = true} : vector<8x1xf32> -> vector<8x1xf32>
    %679 = vector.broadcast %678 : vector<8x1xf32> to vector<8x8xf32>
    %680 = arith.mulf %675, %679 : vector<8x8xf32>
    %cst_230 = arith.constant dense<0.000000e+00> : vector<8x8xf32>
    %681 = tpu.matmul %680, %666, %cst_230 {dimension_numbers = #tpu.dot_dimension_numbers<[1], [0], [0], [1], [0, 0, 1, 1], [], []>} : vector<8x8xf32>, vector<8x8xf32>, vector<8x8xf32> -> vector<8x8xf32>
    %682 = vector.extract_strided_slice %643 {offsets = [0, 16], sizes = [8, 8], strides = [1, 1]} : vector<16x32xf32> to vector<8x8xf32>
    %683 = vector.extract_strided_slice %644 {offsets = [0, 16], sizes = [8, 8], strides = [1, 1]} : vector<16x32xf32> to vector<8x8xf32>
    %684 = vector.extract_strided_slice %645 {offsets = [0, 16], sizes = [8, 8], strides = [1, 1]} : vector<16x32xf32> to vector<8x8xf32>
    %685 = tpu.transpose %683, [1, 0] : vector<8x8xf32> -> vector<8x8xf32>
    %cst_231 = arith.constant dense<0.000000e+00> : vector<8x8xf32>
    %686 = tpu.matmul %682, %685, %cst_231 {dimension_numbers = #tpu.dot_dimension_numbers<[1], [0], [0], [1], [0, 0, 1, 1], [], []>} : vector<8x8xf32>, vector<8x8xf32>, vector<8x8xf32> -> vector<8x8xf32>
    %cst_232 = arith.constant 0.353553385 : f32
    %687 = vector.broadcast %cst_232 : f32 to vector<8x8xf32>
    %688 = arith.mulf %686, %687 : vector<8x8xf32>
    %cst_233 = arith.constant dense<0xFF800000> : vector<8xf32>
    %689 = vector.multi_reduction <maximumf>, %688, %cst_233 [1] : vector<8x8xf32> to vector<8xf32>
    %690 = vector.shape_cast %689 : vector<8xf32> to vector<8x1xf32>
    %691 = vector.broadcast %690 : vector<8x1xf32> to vector<8x8xf32>
    %692 = arith.subf %688, %691 : vector<8x8xf32>
    %693 = math.exp %692 : vector<8x8xf32>
    %cst_234 = arith.constant dense<0.000000e+00> : vector<8xf32>
    %694 = vector.multi_reduction <add>, %693, %cst_234 [1] : vector<8x8xf32> to vector<8xf32>
    %695 = vector.shape_cast %694 : vector<8xf32> to vector<8x1xf32>
    %696 = tpu.reciprocal %695 {approx = true} : vector<8x1xf32> -> vector<8x1xf32>
    %697 = vector.broadcast %696 : vector<8x1xf32> to vector<8x8xf32>
    %698 = arith.mulf %693, %697 : vector<8x8xf32>
    %cst_235 = arith.constant dense<0.000000e+00> : vector<8x8xf32>
    %699 = tpu.matmul %698, %684, %cst_235 {dimension_numbers = #tpu.dot_dimension_numbers<[1], [0], [0], [1], [0, 0, 1, 1], [], []>} : vector<8x8xf32>, vector<8x8xf32>, vector<8x8xf32> -> vector<8x8xf32>
    %700 = vector.extract_strided_slice %643 {offsets = [0, 24], sizes = [8, 8], strides = [1, 1]} : vector<16x32xf32> to vector<8x8xf32>
    %701 = vector.extract_strided_slice %644 {offsets = [0, 24], sizes = [8, 8], strides = [1, 1]} : vector<16x32xf32> to vector<8x8xf32>
    %702 = vector.extract_strided_slice %645 {offsets = [0, 24], sizes = [8, 8], strides = [1, 1]} : vector<16x32xf32> to vector<8x8xf32>
    %703 = tpu.transpose %701, [1, 0] : vector<8x8xf32> -> vector<8x8xf32>
    %cst_236 = arith.constant dense<0.000000e+00> : vector<8x8xf32>
    %704 = tpu.matmul %700, %703, %cst_236 {dimension_numbers = #tpu.dot_dimension_numbers<[1], [0], [0], [1], [0, 0, 1, 1], [], []>} : vector<8x8xf32>, vector<8x8xf32>, vector<8x8xf32> -> vector<8x8xf32>
    %cst_237 = arith.constant 0.353553385 : f32
    %705 = vector.broadcast %cst_237 : f32 to vector<8x8xf32>
    %706 = arith.mulf %704, %705 : vector<8x8xf32>
    %cst_238 = arith.constant dense<0xFF800000> : vector<8xf32>
    %707 = vector.multi_reduction <maximumf>, %706, %cst_238 [1] : vector<8x8xf32> to vector<8xf32>
    %708 = vector.shape_cast %707 : vector<8xf32> to vector<8x1xf32>
    %709 = vector.broadcast %708 : vector<8x1xf32> to vector<8x8xf32>
    %710 = arith.subf %706, %709 : vector<8x8xf32>
    %711 = math.exp %710 : vector<8x8xf32>
    %cst_239 = arith.constant dense<0.000000e+00> : vector<8xf32>
    %712 = vector.multi_reduction <add>, %711, %cst_239 [1] : vector<8x8xf32> to vector<8xf32>
    %713 = vector.shape_cast %712 : vector<8xf32> to vector<8x1xf32>
    %714 = tpu.reciprocal %713 {approx = true} : vector<8x1xf32> -> vector<8x1xf32>
    %715 = vector.broadcast %714 : vector<8x1xf32> to vector<8x8xf32>
    %716 = arith.mulf %711, %715 : vector<8x8xf32>
    %cst_240 = arith.constant dense<0.000000e+00> : vector<8x8xf32>
    %717 = tpu.matmul %716, %702, %cst_240 {dimension_numbers = #tpu.dot_dimension_numbers<[1], [0], [0], [1], [0, 0, 1, 1], [], []>} : vector<8x8xf32>, vector<8x8xf32>, vector<8x8xf32> -> vector<8x8xf32>
    %718 = tpu.concatenate %663, %681, %699, %717 in 1 : vector<8x8xf32>, vector<8x8xf32>, vector<8x8xf32>, vector<8x8xf32> -> vector<8x32xf32>
    %719 = vector.extract_strided_slice %643 {offsets = [8, 0], sizes = [8, 8], strides = [1, 1]} : vector<16x32xf32> to vector<8x8xf32>
    %720 = vector.extract_strided_slice %644 {offsets = [8, 0], sizes = [8, 8], strides = [1, 1]} : vector<16x32xf32> to vector<8x8xf32>
    %721 = vector.extract_strided_slice %645 {offsets = [8, 0], sizes = [8, 8], strides = [1, 1]} : vector<16x32xf32> to vector<8x8xf32>
    %722 = tpu.transpose %720, [1, 0] : vector<8x8xf32> -> vector<8x8xf32>
    %cst_241 = arith.constant dense<0.000000e+00> : vector<8x8xf32>
    %723 = tpu.matmul %719, %722, %cst_241 {dimension_numbers = #tpu.dot_dimension_numbers<[1], [0], [0], [1], [0, 0, 1, 1], [], []>} : vector<8x8xf32>, vector<8x8xf32>, vector<8x8xf32> -> vector<8x8xf32>
    %cst_242 = arith.constant 0.353553385 : f32
    %724 = vector.broadcast %cst_242 : f32 to vector<8x8xf32>
    %725 = arith.mulf %723, %724 : vector<8x8xf32>
    %cst_243 = arith.constant dense<0xFF800000> : vector<8xf32>
    %726 = vector.multi_reduction <maximumf>, %725, %cst_243 [1] : vector<8x8xf32> to vector<8xf32>
    %727 = vector.shape_cast %726 : vector<8xf32> to vector<8x1xf32>
    %728 = vector.broadcast %727 : vector<8x1xf32> to vector<8x8xf32>
    %729 = arith.subf %725, %728 : vector<8x8xf32>
    %730 = math.exp %729 : vector<8x8xf32>
    %cst_244 = arith.constant dense<0.000000e+00> : vector<8xf32>
    %731 = vector.multi_reduction <add>, %730, %cst_244 [1] : vector<8x8xf32> to vector<8xf32>
    %732 = vector.shape_cast %731 : vector<8xf32> to vector<8x1xf32>
    %733 = tpu.reciprocal %732 {approx = true} : vector<8x1xf32> -> vector<8x1xf32>
    %734 = vector.broadcast %733 : vector<8x1xf32> to vector<8x8xf32>
    %735 = arith.mulf %730, %734 : vector<8x8xf32>
    %cst_245 = arith.constant dense<0.000000e+00> : vector<8x8xf32>
    %736 = tpu.matmul %735, %721, %cst_245 {dimension_numbers = #tpu.dot_dimension_numbers<[1], [0], [0], [1], [0, 0, 1, 1], [], []>} : vector<8x8xf32>, vector<8x8xf32>, vector<8x8xf32> -> vector<8x8xf32>
    %737 = vector.extract_strided_slice %643 {offsets = [8, 8], sizes = [8, 8], strides = [1, 1]} : vector<16x32xf32> to vector<8x8xf32>
    %738 = vector.extract_strided_slice %644 {offsets = [8, 8], sizes = [8, 8], strides = [1, 1]} : vector<16x32xf32> to vector<8x8xf32>
    %739 = vector.extract_strided_slice %645 {offsets = [8, 8], sizes = [8, 8], strides = [1, 1]} : vector<16x32xf32> to vector<8x8xf32>
    %740 = tpu.transpose %738, [1, 0] : vector<8x8xf32> -> vector<8x8xf32>
    %cst_246 = arith.constant dense<0.000000e+00> : vector<8x8xf32>
    %741 = tpu.matmul %737, %740, %cst_246 {dimension_numbers = #tpu.dot_dimension_numbers<[1], [0], [0], [1], [0, 0, 1, 1], [], []>} : vector<8x8xf32>, vector<8x8xf32>, vector<8x8xf32> -> vector<8x8xf32>
    %cst_247 = arith.constant 0.353553385 : f32
    %742 = vector.broadcast %cst_247 : f32 to vector<8x8xf32>
    %743 = arith.mulf %741, %742 : vector<8x8xf32>
    %cst_248 = arith.constant dense<0xFF800000> : vector<8xf32>
    %744 = vector.multi_reduction <maximumf>, %743, %cst_248 [1] : vector<8x8xf32> to vector<8xf32>
    %745 = vector.shape_cast %744 : vector<8xf32> to vector<8x1xf32>
    %746 = vector.broadcast %745 : vector<8x1xf32> to vector<8x8xf32>
    %747 = arith.subf %743, %746 : vector<8x8xf32>
    %748 = math.exp %747 : vector<8x8xf32>
    %cst_249 = arith.constant dense<0.000000e+00> : vector<8xf32>
    %749 = vector.multi_reduction <add>, %748, %cst_249 [1] : vector<8x8xf32> to vector<8xf32>
    %750 = vector.shape_cast %749 : vector<8xf32> to vector<8x1xf32>
    %751 = tpu.reciprocal %750 {approx = true} : vector<8x1xf32> -> vector<8x1xf32>
    %752 = vector.broadcast %751 : vector<8x1xf32> to vector<8x8xf32>
    %753 = arith.mulf %748, %752 : vector<8x8xf32>
    %cst_250 = arith.constant dense<0.000000e+00> : vector<8x8xf32>
    %754 = tpu.matmul %753, %739, %cst_250 {dimension_numbers = #tpu.dot_dimension_numbers<[1], [0], [0], [1], [0, 0, 1, 1], [], []>} : vector<8x8xf32>, vector<8x8xf32>, vector<8x8xf32> -> vector<8x8xf32>
    %755 = vector.extract_strided_slice %643 {offsets = [8, 16], sizes = [8, 8], strides = [1, 1]} : vector<16x32xf32> to vector<8x8xf32>
    %756 = vector.extract_strided_slice %644 {offsets = [8, 16], sizes = [8, 8], strides = [1, 1]} : vector<16x32xf32> to vector<8x8xf32>
    %757 = vector.extract_strided_slice %645 {offsets = [8, 16], sizes = [8, 8], strides = [1, 1]} : vector<16x32xf32> to vector<8x8xf32>
    %758 = tpu.transpose %756, [1, 0] : vector<8x8xf32> -> vector<8x8xf32>
    %cst_251 = arith.constant dense<0.000000e+00> : vector<8x8xf32>
    %759 = tpu.matmul %755, %758, %cst_251 {dimension_numbers = #tpu.dot_dimension_numbers<[1], [0], [0], [1], [0, 0, 1, 1], [], []>} : vector<8x8xf32>, vector<8x8xf32>, vector<8x8xf32> -> vector<8x8xf32>
    %cst_252 = arith.constant 0.353553385 : f32
    %760 = vector.broadcast %cst_252 : f32 to vector<8x8xf32>
    %761 = arith.mulf %759, %760 : vector<8x8xf32>
    %cst_253 = arith.constant dense<0xFF800000> : vector<8xf32>
    %762 = vector.multi_reduction <maximumf>, %761, %cst_253 [1] : vector<8x8xf32> to vector<8xf32>
    %763 = vector.shape_cast %762 : vector<8xf32> to vector<8x1xf32>
    %764 = vector.broadcast %763 : vector<8x1xf32> to vector<8x8xf32>
    %765 = arith.subf %761, %764 : vector<8x8xf32>
    %766 = math.exp %765 : vector<8x8xf32>
    %cst_254 = arith.constant dense<0.000000e+00> : vector<8xf32>
    %767 = vector.multi_reduction <add>, %766, %cst_254 [1] : vector<8x8xf32> to vector<8xf32>
    %768 = vector.shape_cast %767 : vector<8xf32> to vector<8x1xf32>
    %769 = tpu.reciprocal %768 {approx = true} : vector<8x1xf32> -> vector<8x1xf32>
    %770 = vector.broadcast %769 : vector<8x1xf32> to vector<8x8xf32>
    %771 = arith.mulf %766, %770 : vector<8x8xf32>
    %cst_255 = arith.constant dense<0.000000e+00> : vector<8x8xf32>
    %772 = tpu.matmul %771, %757, %cst_255 {dimension_numbers = #tpu.dot_dimension_numbers<[1], [0], [0], [1], [0, 0, 1, 1], [], []>} : vector<8x8xf32>, vector<8x8xf32>, vector<8x8xf32> -> vector<8x8xf32>
    %773 = vector.extract_strided_slice %643 {offsets = [8, 24], sizes = [8, 8], strides = [1, 1]} : vector<16x32xf32> to vector<8x8xf32>
    %774 = vector.extract_strided_slice %644 {offsets = [8, 24], sizes = [8, 8], strides = [1, 1]} : vector<16x32xf32> to vector<8x8xf32>
    %775 = vector.extract_strided_slice %645 {offsets = [8, 24], sizes = [8, 8], strides = [1, 1]} : vector<16x32xf32> to vector<8x8xf32>
    %776 = tpu.transpose %774, [1, 0] : vector<8x8xf32> -> vector<8x8xf32>
    %cst_256 = arith.constant dense<0.000000e+00> : vector<8x8xf32>
    %777 = tpu.matmul %773, %776, %cst_256 {dimension_numbers = #tpu.dot_dimension_numbers<[1], [0], [0], [1], [0, 0, 1, 1], [], []>} : vector<8x8xf32>, vector<8x8xf32>, vector<8x8xf32> -> vector<8x8xf32>
    %cst_257 = arith.constant 0.353553385 : f32
    %778 = vector.broadcast %cst_257 : f32 to vector<8x8xf32>
    %779 = arith.mulf %777, %778 : vector<8x8xf32>
    %cst_258 = arith.constant dense<0xFF800000> : vector<8xf32>
    %780 = vector.multi_reduction <maximumf>, %779, %cst_258 [1] : vector<8x8xf32> to vector<8xf32>
    %781 = vector.shape_cast %780 : vector<8xf32> to vector<8x1xf32>
    %782 = vector.broadcast %781 : vector<8x1xf32> to vector<8x8xf32>
    %783 = arith.subf %779, %782 : vector<8x8xf32>
    %784 = math.exp %783 : vector<8x8xf32>
    %cst_259 = arith.constant dense<0.000000e+00> : vector<8xf32>
    %785 = vector.multi_reduction <add>, %784, %cst_259 [1] : vector<8x8xf32> to vector<8xf32>
    %786 = vector.shape_cast %785 : vector<8xf32> to vector<8x1xf32>
    %787 = tpu.reciprocal %786 {approx = true} : vector<8x1xf32> -> vector<8x1xf32>
    %788 = vector.broadcast %787 : vector<8x1xf32> to vector<8x8xf32>
    %789 = arith.mulf %784, %788 : vector<8x8xf32>
    %cst_260 = arith.constant dense<0.000000e+00> : vector<8x8xf32>
    %790 = tpu.matmul %789, %775, %cst_260 {dimension_numbers = #tpu.dot_dimension_numbers<[1], [0], [0], [1], [0, 0, 1, 1], [], []>} : vector<8x8xf32>, vector<8x8xf32>, vector<8x8xf32> -> vector<8x8xf32>
    %791 = tpu.concatenate %736, %754, %772, %790 in 1 : vector<8x8xf32>, vector<8x8xf32>, vector<8x8xf32>, vector<8x8xf32> -> vector<8x32xf32>
    %792 = tpu.concatenate %718, %791 in 0 : vector<8x32xf32>, vector<8x32xf32> -> vector<16x32xf32>
    %cst_261 = arith.constant dense<0.000000e+00> : vector<16x32xf32>
    %793 = tpu.matmul %792, %637, %cst_261 {dimension_numbers = #tpu.dot_dimension_numbers<[1], [0], [0], [1], [0, 0, 1, 1], [], []>} : vector<16x32xf32>, vector<32x32xf32>, vector<16x32xf32> -> vector<16x32xf32>
    %794 = vector.broadcast %639 : vector<1x32xf32> to vector<16x32xf32>
    %795 = arith.addf %793, %794 : vector<16x32xf32>
    %796 = arith.addf %605, %795 : vector<16x32xf32>
    %c2_262 = arith.constant 2 : index
    %c0_263 = arith.constant 0 : index
    %c0_264 = arith.constant 0 : index
    %797 = vector.load %arg11[%c2_262, %c0_263, %c0_264] : memref<4x1x32xf32, #tpu.memory_space<vmem>>, vector<1x1x32xf32>
    %798 = vector.shape_cast %797 : vector<1x1x32xf32> to vector<1x32xf32>
    %c2_265 = arith.constant 2 : index
    %c0_266 = arith.constant 0 : index
    %c0_267 = arith.constant 0 : index
    %799 = vector.load %arg12[%c2_265, %c0_266, %c0_267] : memref<4x1x32xf32, #tpu.memory_space<vmem>>, vector<1x1x32xf32>
    %800 = vector.shape_cast %799 : vector<1x1x32xf32> to vector<1x32xf32>
    %cst_268 = arith.constant dense<0.000000e+00> : vector<16xf32>
    %801 = vector.multi_reduction <add>, %796, %cst_268 [1] : vector<16x32xf32> to vector<16xf32>
    %802 = vector.shape_cast %801 : vector<16xf32> to vector<16x1xf32>
    %cst_269 = arith.constant 3.200000e+01 : f32
    %803 = vector.broadcast %cst_269 : f32 to vector<16x1xf32>
    %804 = arith.divf %802, %803 : vector<16x1xf32>
    %805 = vector.broadcast %804 : vector<16x1xf32> to vector<16x32xf32>
    %806 = arith.subf %796, %805 : vector<16x32xf32>
    %807 = arith.mulf %806, %806 : vector<16x32xf32>
    %cst_270 = arith.constant dense<0.000000e+00> : vector<16xf32>
    %808 = vector.multi_reduction <add>, %807, %cst_270 [1] : vector<16x32xf32> to vector<16xf32>
    %809 = vector.shape_cast %808 : vector<16xf32> to vector<16x1xf32>
    %cst_271 = arith.constant 3.200000e+01 : f32
    %810 = vector.broadcast %cst_271 : f32 to vector<16x1xf32>
    %811 = arith.divf %809, %810 : vector<16x1xf32>
    %812 = vector.broadcast %804 : vector<16x1xf32> to vector<16x32xf32>
    %813 = arith.subf %796, %812 : vector<16x32xf32>
    %cst_272 = arith.constant 9.99999974E-6 : f32
    %814 = vector.broadcast %cst_272 : f32 to vector<16x1xf32>
    %815 = arith.addf %811, %814 : vector<16x1xf32>
    %816 = math.rsqrt %815 : vector<16x1xf32>
    %817 = vector.broadcast %816 : vector<16x1xf32> to vector<16x32xf32>
    %818 = arith.mulf %813, %817 : vector<16x32xf32>
    %819 = vector.broadcast %798 : vector<1x32xf32> to vector<16x32xf32>
    %820 = arith.mulf %818, %819 : vector<16x32xf32>
    %821 = vector.broadcast %800 : vector<1x32xf32> to vector<16x32xf32>
    %822 = arith.addf %820, %821 : vector<16x32xf32>
    %c2_273 = arith.constant 2 : index
    %c0_274 = arith.constant 0 : index
    %c0_275 = arith.constant 0 : index
    %823 = vector.load %arg13[%c2_273, %c0_274, %c0_275] : memref<4x32x128xf32, #tpu.memory_space<vmem>>, vector<1x32x128xf32>
    %824 = vector.shape_cast %823 : vector<1x32x128xf32> to vector<32x128xf32>
    %cst_276 = arith.constant dense<0.000000e+00> : vector<16x128xf32>
    %825 = tpu.matmul %822, %824, %cst_276 {dimension_numbers = #tpu.dot_dimension_numbers<[1], [0], [0], [1], [0, 0, 1, 1], [], []>} : vector<16x32xf32>, vector<32x128xf32>, vector<16x128xf32> -> vector<16x128xf32>
    %c2_277 = arith.constant 2 : index
    %c0_278 = arith.constant 0 : index
    %c0_279 = arith.constant 0 : index
    %826 = vector.load %arg14[%c2_277, %c0_278, %c0_279] : memref<4x1x128xf32, #tpu.memory_space<vmem>>, vector<1x1x128xf32>
    %827 = vector.shape_cast %826 : vector<1x1x128xf32> to vector<1x128xf32>
    %828 = vector.broadcast %827 : vector<1x128xf32> to vector<16x128xf32>
    %829 = arith.addf %825, %828 : vector<16x128xf32>
    %cst_280 = arith.constant 0.000000e+00 : f32
    %830 = vector.broadcast %cst_280 : f32 to vector<16x128xf32>
    %831 = arith.maximumf %829, %830 : vector<16x128xf32>
    %c2_281 = arith.constant 2 : index
    %c0_282 = arith.constant 0 : index
    %c0_283 = arith.constant 0 : index
    %832 = vector.load %arg15[%c2_281, %c0_282, %c0_283] : memref<4x128x32xf32, #tpu.memory_space<vmem>>, vector<1x128x32xf32>
    %833 = vector.shape_cast %832 : vector<1x128x32xf32> to vector<128x32xf32>
    %cst_284 = arith.constant dense<0.000000e+00> : vector<16x32xf32>
    %834 = tpu.matmul %831, %833, %cst_284 {dimension_numbers = #tpu.dot_dimension_numbers<[1], [0], [0], [1], [0, 0, 1, 1], [], []>} : vector<16x128xf32>, vector<128x32xf32>, vector<16x32xf32> -> vector<16x32xf32>
    %c2_285 = arith.constant 2 : index
    %c0_286 = arith.constant 0 : index
    %c0_287 = arith.constant 0 : index
    %835 = vector.load %arg16[%c2_285, %c0_286, %c0_287] : memref<4x1x32xf32, #tpu.memory_space<vmem>>, vector<1x1x32xf32>
    %836 = vector.shape_cast %835 : vector<1x1x32xf32> to vector<1x32xf32>
    %837 = vector.broadcast %836 : vector<1x32xf32> to vector<16x32xf32>
    %838 = arith.addf %834, %837 : vector<16x32xf32>
    %839 = arith.addf %796, %838 : vector<16x32xf32>
    %c3 = arith.constant 3 : index
    %c0_288 = arith.constant 0 : index
    %c0_289 = arith.constant 0 : index
    %840 = vector.load %arg5[%c3, %c0_288, %c0_289] : memref<4x1x32xf32, #tpu.memory_space<vmem>>, vector<1x1x32xf32>
    %841 = vector.shape_cast %840 : vector<1x1x32xf32> to vector<1x32xf32>
    %c3_290 = arith.constant 3 : index
    %c0_291 = arith.constant 0 : index
    %c0_292 = arith.constant 0 : index
    %842 = vector.load %arg6[%c3_290, %c0_291, %c0_292] : memref<4x1x32xf32, #tpu.memory_space<vmem>>, vector<1x1x32xf32>
    %843 = vector.shape_cast %842 : vector<1x1x32xf32> to vector<1x32xf32>
    %cst_293 = arith.constant dense<0.000000e+00> : vector<16xf32>
    %844 = vector.multi_reduction <add>, %839, %cst_293 [1] : vector<16x32xf32> to vector<16xf32>
    %845 = vector.shape_cast %844 : vector<16xf32> to vector<16x1xf32>
    %cst_294 = arith.constant 3.200000e+01 : f32
    %846 = vector.broadcast %cst_294 : f32 to vector<16x1xf32>
    %847 = arith.divf %845, %846 : vector<16x1xf32>
    %848 = vector.broadcast %847 : vector<16x1xf32> to vector<16x32xf32>
    %849 = arith.subf %839, %848 : vector<16x32xf32>
    %850 = arith.mulf %849, %849 : vector<16x32xf32>
    %cst_295 = arith.constant dense<0.000000e+00> : vector<16xf32>
    %851 = vector.multi_reduction <add>, %850, %cst_295 [1] : vector<16x32xf32> to vector<16xf32>
    %852 = vector.shape_cast %851 : vector<16xf32> to vector<16x1xf32>
    %cst_296 = arith.constant 3.200000e+01 : f32
    %853 = vector.broadcast %cst_296 : f32 to vector<16x1xf32>
    %854 = arith.divf %852, %853 : vector<16x1xf32>
    %855 = vector.broadcast %847 : vector<16x1xf32> to vector<16x32xf32>
    %856 = arith.subf %839, %855 : vector<16x32xf32>
    %cst_297 = arith.constant 9.99999974E-6 : f32
    %857 = vector.broadcast %cst_297 : f32 to vector<16x1xf32>
    %858 = arith.addf %854, %857 : vector<16x1xf32>
    %859 = math.rsqrt %858 : vector<16x1xf32>
    %860 = vector.broadcast %859 : vector<16x1xf32> to vector<16x32xf32>
    %861 = arith.mulf %856, %860 : vector<16x32xf32>
    %862 = vector.broadcast %841 : vector<1x32xf32> to vector<16x32xf32>
    %863 = arith.mulf %861, %862 : vector<16x32xf32>
    %864 = vector.broadcast %843 : vector<1x32xf32> to vector<16x32xf32>
    %865 = arith.addf %863, %864 : vector<16x32xf32>
    %c3_298 = arith.constant 3 : index
    %c0_299 = arith.constant 0 : index
    %c0_300 = arith.constant 0 : index
    %866 = vector.load %arg7[%c3_298, %c0_299, %c0_300] : memref<4x32x96xf32, #tpu.memory_space<vmem>>, vector<1x32x96xf32>
    %867 = vector.shape_cast %866 : vector<1x32x96xf32> to vector<32x96xf32>
    %c3_301 = arith.constant 3 : index
    %c0_302 = arith.constant 0 : index
    %c0_303 = arith.constant 0 : index
    %868 = vector.load %arg8[%c3_301, %c0_302, %c0_303] : memref<4x1x96xf32, #tpu.memory_space<vmem>>, vector<1x1x96xf32>
    %869 = vector.shape_cast %868 : vector<1x1x96xf32> to vector<1x96xf32>
    %c3_304 = arith.constant 3 : index
    %c0_305 = arith.constant 0 : index
    %c0_306 = arith.constant 0 : index
    %870 = vector.load %arg9[%c3_304, %c0_305, %c0_306] : memref<4x32x32xf32, #tpu.memory_space<vmem>>, vector<1x32x32xf32>
    %871 = vector.shape_cast %870 : vector<1x32x32xf32> to vector<32x32xf32>
    %c3_307 = arith.constant 3 : index
    %c0_308 = arith.constant 0 : index
    %c0_309 = arith.constant 0 : index
    %872 = vector.load %arg10[%c3_307, %c0_308, %c0_309] : memref<4x1x32xf32, #tpu.memory_space<vmem>>, vector<1x1x32xf32>
    %873 = vector.shape_cast %872 : vector<1x1x32xf32> to vector<1x32xf32>
    %cst_310 = arith.constant dense<0.000000e+00> : vector<16x96xf32>
    %874 = tpu.matmul %865, %867, %cst_310 {dimension_numbers = #tpu.dot_dimension_numbers<[1], [0], [0], [1], [0, 0, 1, 1], [], []>} : vector<16x32xf32>, vector<32x96xf32>, vector<16x96xf32> -> vector<16x96xf32>
    %875 = vector.broadcast %869 : vector<1x96xf32> to vector<16x96xf32>
    %876 = arith.addf %874, %875 : vector<16x96xf32>
    %877 = vector.extract_strided_slice %876 {offsets = [0, 0], sizes = [16, 32], strides = [1, 1]} : vector<16x96xf32> to vector<16x32xf32>
    %878 = vector.extract_strided_slice %876 {offsets = [0, 32], sizes = [16, 32], strides = [1, 1]} : vector<16x96xf32> to vector<16x32xf32>
    %879 = vector.extract_strided_slice %876 {offsets = [0, 64], sizes = [16, 32], strides = [1, 1]} : vector<16x96xf32> to vector<16x32xf32>
    %880 = vector.extract_strided_slice %877 {offsets = [0, 0], sizes = [8, 8], strides = [1, 1]} : vector<16x32xf32> to vector<8x8xf32>
    %881 = vector.extract_strided_slice %877 {offsets = [8, 0], sizes = [8, 8], strides = [1, 1]} : vector<16x32xf32> to vector<8x8xf32>
    %882 = vector.extract_strided_slice %878 {offsets = [0, 0], sizes = [8, 8], strides = [1, 1]} : vector<16x32xf32> to vector<8x8xf32>
    %883 = vector.extract_strided_slice %878 {offsets = [8, 0], sizes = [8, 8], strides = [1, 1]} : vector<16x32xf32> to vector<8x8xf32>
    %884 = vector.extract_strided_slice %879 {offsets = [0, 0], sizes = [8, 8], strides = [1, 1]} : vector<16x32xf32> to vector<8x8xf32>
    %885 = vector.extract_strided_slice %879 {offsets = [8, 0], sizes = [8, 8], strides = [1, 1]} : vector<16x32xf32> to vector<8x8xf32>
    %886 = arith.mulf %880, %882 : vector<8x8xf32>
    %cst_311 = arith.constant dense<0.000000e+00> : vector<8xf32>
    %887 = vector.multi_reduction <add>, %886, %cst_311 [1] : vector<8x8xf32> to vector<8xf32>
    %888 = vector.shape_cast %887 : vector<8xf32> to vector<8x1xf32>
    %cst_312 = arith.constant 0.353553385 : f32
    %889 = vector.broadcast %cst_312 : f32 to vector<8x1xf32>
    %890 = arith.mulf %888, %889 : vector<8x1xf32>
    %891 = arith.mulf %880, %883 : vector<8x8xf32>
    %cst_313 = arith.constant dense<0.000000e+00> : vector<8xf32>
    %892 = vector.multi_reduction <add>, %891, %cst_313 [1] : vector<8x8xf32> to vector<8xf32>
    %893 = vector.shape_cast %892 : vector<8xf32> to vector<8x1xf32>
    %cst_314 = arith.constant 0.353553385 : f32
    %894 = vector.broadcast %cst_314 : f32 to vector<8x1xf32>
    %895 = arith.mulf %893, %894 : vector<8x1xf32>
    %896 = tpu.concatenate %890, %895 in 1 : vector<8x1xf32>, vector<8x1xf32> -> vector<8x2xf32>
    %897 = vector.extract_strided_slice %1 {offsets = [0, 0], sizes = [1, 2], strides = [1, 1]} : vector<2x2xf32> to vector<1x2xf32>
    %898 = vector.broadcast %897 : vector<1x2xf32> to vector<8x2xf32>
    %899 = arith.addf %896, %898 : vector<8x2xf32>
    %cst_315 = arith.constant dense<0xFF800000> : vector<8xf32>
    %900 = vector.multi_reduction <maximumf>, %899, %cst_315 [1] : vector<8x2xf32> to vector<8xf32>
    %901 = vector.shape_cast %900 : vector<8xf32> to vector<8x1xf32>
    %902 = vector.broadcast %901 : vector<8x1xf32> to vector<8x2xf32>
    %903 = arith.subf %899, %902 : vector<8x2xf32>
    %904 = math.exp %903 : vector<8x2xf32>
    %cst_316 = arith.constant dense<0.000000e+00> : vector<8xf32>
    %905 = vector.multi_reduction <add>, %904, %cst_316 [1] : vector<8x2xf32> to vector<8xf32>
    %906 = vector.shape_cast %905 : vector<8xf32> to vector<8x1xf32>
    %907 = tpu.reciprocal %906 {approx = true} : vector<8x1xf32> -> vector<8x1xf32>
    %908 = vector.broadcast %907 : vector<8x1xf32> to vector<8x2xf32>
    %909 = arith.mulf %904, %908 : vector<8x2xf32>
    %910 = vector.extract_strided_slice %909 {offsets = [0, 0], sizes = [8, 1], strides = [1, 1]} : vector<8x2xf32> to vector<8x1xf32>
    %911 = vector.broadcast %910 : vector<8x1xf32> to vector<8x8xf32>
    %912 = arith.mulf %911, %884 : vector<8x8xf32>
    %913 = vector.extract_strided_slice %909 {offsets = [0, 1], sizes = [8, 1], strides = [1, 1]} : vector<8x2xf32> to vector<8x1xf32>
    %914 = vector.broadcast %913 : vector<8x1xf32> to vector<8x8xf32>
    %915 = arith.mulf %914, %885 : vector<8x8xf32>
    %916 = arith.addf %912, %915 : vector<8x8xf32>
    %917 = arith.mulf %881, %882 : vector<8x8xf32>
    %cst_317 = arith.constant dense<0.000000e+00> : vector<8xf32>
    %918 = vector.multi_reduction <add>, %917, %cst_317 [1] : vector<8x8xf32> to vector<8xf32>
    %919 = vector.shape_cast %918 : vector<8xf32> to vector<8x1xf32>
    %cst_318 = arith.constant 0.353553385 : f32
    %920 = vector.broadcast %cst_318 : f32 to vector<8x1xf32>
    %921 = arith.mulf %919, %920 : vector<8x1xf32>
    %922 = arith.mulf %881, %883 : vector<8x8xf32>
    %cst_319 = arith.constant dense<0.000000e+00> : vector<8xf32>
    %923 = vector.multi_reduction <add>, %922, %cst_319 [1] : vector<8x8xf32> to vector<8xf32>
    %924 = vector.shape_cast %923 : vector<8xf32> to vector<8x1xf32>
    %cst_320 = arith.constant 0.353553385 : f32
    %925 = vector.broadcast %cst_320 : f32 to vector<8x1xf32>
    %926 = arith.mulf %924, %925 : vector<8x1xf32>
    %927 = tpu.concatenate %921, %926 in 1 : vector<8x1xf32>, vector<8x1xf32> -> vector<8x2xf32>
    %928 = vector.extract_strided_slice %1 {offsets = [1, 0], sizes = [1, 2], strides = [1, 1]} : vector<2x2xf32> to vector<1x2xf32>
    %929 = vector.broadcast %928 : vector<1x2xf32> to vector<8x2xf32>
    %930 = arith.addf %927, %929 : vector<8x2xf32>
    %cst_321 = arith.constant dense<0xFF800000> : vector<8xf32>
    %931 = vector.multi_reduction <maximumf>, %930, %cst_321 [1] : vector<8x2xf32> to vector<8xf32>
    %932 = vector.shape_cast %931 : vector<8xf32> to vector<8x1xf32>
    %933 = vector.broadcast %932 : vector<8x1xf32> to vector<8x2xf32>
    %934 = arith.subf %930, %933 : vector<8x2xf32>
    %935 = math.exp %934 : vector<8x2xf32>
    %cst_322 = arith.constant dense<0.000000e+00> : vector<8xf32>
    %936 = vector.multi_reduction <add>, %935, %cst_322 [1] : vector<8x2xf32> to vector<8xf32>
    %937 = vector.shape_cast %936 : vector<8xf32> to vector<8x1xf32>
    %938 = tpu.reciprocal %937 {approx = true} : vector<8x1xf32> -> vector<8x1xf32>
    %939 = vector.broadcast %938 : vector<8x1xf32> to vector<8x2xf32>
    %940 = arith.mulf %935, %939 : vector<8x2xf32>
    %941 = vector.extract_strided_slice %940 {offsets = [0, 0], sizes = [8, 1], strides = [1, 1]} : vector<8x2xf32> to vector<8x1xf32>
    %942 = vector.broadcast %941 : vector<8x1xf32> to vector<8x8xf32>
    %943 = arith.mulf %942, %884 : vector<8x8xf32>
    %944 = vector.extract_strided_slice %940 {offsets = [0, 1], sizes = [8, 1], strides = [1, 1]} : vector<8x2xf32> to vector<8x1xf32>
    %945 = vector.broadcast %944 : vector<8x1xf32> to vector<8x8xf32>
    %946 = arith.mulf %945, %885 : vector<8x8xf32>
    %947 = arith.addf %943, %946 : vector<8x8xf32>
    %948 = vector.extract_strided_slice %877 {offsets = [0, 8], sizes = [8, 8], strides = [1, 1]} : vector<16x32xf32> to vector<8x8xf32>
    %949 = vector.extract_strided_slice %877 {offsets = [8, 8], sizes = [8, 8], strides = [1, 1]} : vector<16x32xf32> to vector<8x8xf32>
    %950 = vector.extract_strided_slice %878 {offsets = [0, 8], sizes = [8, 8], strides = [1, 1]} : vector<16x32xf32> to vector<8x8xf32>
    %951 = vector.extract_strided_slice %878 {offsets = [8, 8], sizes = [8, 8], strides = [1, 1]} : vector<16x32xf32> to vector<8x8xf32>
    %952 = vector.extract_strided_slice %879 {offsets = [0, 8], sizes = [8, 8], strides = [1, 1]} : vector<16x32xf32> to vector<8x8xf32>
    %953 = vector.extract_strided_slice %879 {offsets = [8, 8], sizes = [8, 8], strides = [1, 1]} : vector<16x32xf32> to vector<8x8xf32>
    %954 = arith.mulf %948, %950 : vector<8x8xf32>
    %cst_323 = arith.constant dense<0.000000e+00> : vector<8xf32>
    %955 = vector.multi_reduction <add>, %954, %cst_323 [1] : vector<8x8xf32> to vector<8xf32>
    %956 = vector.shape_cast %955 : vector<8xf32> to vector<8x1xf32>
    %cst_324 = arith.constant 0.353553385 : f32
    %957 = vector.broadcast %cst_324 : f32 to vector<8x1xf32>
    %958 = arith.mulf %956, %957 : vector<8x1xf32>
    %959 = arith.mulf %948, %951 : vector<8x8xf32>
    %cst_325 = arith.constant dense<0.000000e+00> : vector<8xf32>
    %960 = vector.multi_reduction <add>, %959, %cst_325 [1] : vector<8x8xf32> to vector<8xf32>
    %961 = vector.shape_cast %960 : vector<8xf32> to vector<8x1xf32>
    %cst_326 = arith.constant 0.353553385 : f32
    %962 = vector.broadcast %cst_326 : f32 to vector<8x1xf32>
    %963 = arith.mulf %961, %962 : vector<8x1xf32>
    %964 = tpu.concatenate %958, %963 in 1 : vector<8x1xf32>, vector<8x1xf32> -> vector<8x2xf32>
    %965 = vector.extract_strided_slice %1 {offsets = [0, 0], sizes = [1, 2], strides = [1, 1]} : vector<2x2xf32> to vector<1x2xf32>
    %966 = vector.broadcast %965 : vector<1x2xf32> to vector<8x2xf32>
    %967 = arith.addf %964, %966 : vector<8x2xf32>
    %cst_327 = arith.constant dense<0xFF800000> : vector<8xf32>
    %968 = vector.multi_reduction <maximumf>, %967, %cst_327 [1] : vector<8x2xf32> to vector<8xf32>
    %969 = vector.shape_cast %968 : vector<8xf32> to vector<8x1xf32>
    %970 = vector.broadcast %969 : vector<8x1xf32> to vector<8x2xf32>
    %971 = arith.subf %967, %970 : vector<8x2xf32>
    %972 = math.exp %971 : vector<8x2xf32>
    %cst_328 = arith.constant dense<0.000000e+00> : vector<8xf32>
    %973 = vector.multi_reduction <add>, %972, %cst_328 [1] : vector<8x2xf32> to vector<8xf32>
    %974 = vector.shape_cast %973 : vector<8xf32> to vector<8x1xf32>
    %975 = tpu.reciprocal %974 {approx = true} : vector<8x1xf32> -> vector<8x1xf32>
    %976 = vector.broadcast %975 : vector<8x1xf32> to vector<8x2xf32>
    %977 = arith.mulf %972, %976 : vector<8x2xf32>
    %978 = vector.extract_strided_slice %977 {offsets = [0, 0], sizes = [8, 1], strides = [1, 1]} : vector<8x2xf32> to vector<8x1xf32>
    %979 = vector.broadcast %978 : vector<8x1xf32> to vector<8x8xf32>
    %980 = arith.mulf %979, %952 : vector<8x8xf32>
    %981 = vector.extract_strided_slice %977 {offsets = [0, 1], sizes = [8, 1], strides = [1, 1]} : vector<8x2xf32> to vector<8x1xf32>
    %982 = vector.broadcast %981 : vector<8x1xf32> to vector<8x8xf32>
    %983 = arith.mulf %982, %953 : vector<8x8xf32>
    %984 = arith.addf %980, %983 : vector<8x8xf32>
    %985 = arith.mulf %949, %950 : vector<8x8xf32>
    %cst_329 = arith.constant dense<0.000000e+00> : vector<8xf32>
    %986 = vector.multi_reduction <add>, %985, %cst_329 [1] : vector<8x8xf32> to vector<8xf32>
    %987 = vector.shape_cast %986 : vector<8xf32> to vector<8x1xf32>
    %cst_330 = arith.constant 0.353553385 : f32
    %988 = vector.broadcast %cst_330 : f32 to vector<8x1xf32>
    %989 = arith.mulf %987, %988 : vector<8x1xf32>
    %990 = arith.mulf %949, %951 : vector<8x8xf32>
    %cst_331 = arith.constant dense<0.000000e+00> : vector<8xf32>
    %991 = vector.multi_reduction <add>, %990, %cst_331 [1] : vector<8x8xf32> to vector<8xf32>
    %992 = vector.shape_cast %991 : vector<8xf32> to vector<8x1xf32>
    %cst_332 = arith.constant 0.353553385 : f32
    %993 = vector.broadcast %cst_332 : f32 to vector<8x1xf32>
    %994 = arith.mulf %992, %993 : vector<8x1xf32>
    %995 = tpu.concatenate %989, %994 in 1 : vector<8x1xf32>, vector<8x1xf32> -> vector<8x2xf32>
    %996 = vector.extract_strided_slice %1 {offsets = [1, 0], sizes = [1, 2], strides = [1, 1]} : vector<2x2xf32> to vector<1x2xf32>
    %997 = vector.broadcast %996 : vector<1x2xf32> to vector<8x2xf32>
    %998 = arith.addf %995, %997 : vector<8x2xf32>
    %cst_333 = arith.constant dense<0xFF800000> : vector<8xf32>
    %999 = vector.multi_reduction <maximumf>, %998, %cst_333 [1] : vector<8x2xf32> to vector<8xf32>
    %1000 = vector.shape_cast %999 : vector<8xf32> to vector<8x1xf32>
    %1001 = vector.broadcast %1000 : vector<8x1xf32> to vector<8x2xf32>
    %1002 = arith.subf %998, %1001 : vector<8x2xf32>
    %1003 = math.exp %1002 : vector<8x2xf32>
    %cst_334 = arith.constant dense<0.000000e+00> : vector<8xf32>
    %1004 = vector.multi_reduction <add>, %1003, %cst_334 [1] : vector<8x2xf32> to vector<8xf32>
    %1005 = vector.shape_cast %1004 : vector<8xf32> to vector<8x1xf32>
    %1006 = tpu.reciprocal %1005 {approx = true} : vector<8x1xf32> -> vector<8x1xf32>
    %1007 = vector.broadcast %1006 : vector<8x1xf32> to vector<8x2xf32>
    %1008 = arith.mulf %1003, %1007 : vector<8x2xf32>
    %1009 = vector.extract_strided_slice %1008 {offsets = [0, 0], sizes = [8, 1], strides = [1, 1]} : vector<8x2xf32> to vector<8x1xf32>
    %1010 = vector.broadcast %1009 : vector<8x1xf32> to vector<8x8xf32>
    %1011 = arith.mulf %1010, %952 : vector<8x8xf32>
    %1012 = vector.extract_strided_slice %1008 {offsets = [0, 1], sizes = [8, 1], strides = [1, 1]} : vector<8x2xf32> to vector<8x1xf32>
    %1013 = vector.broadcast %1012 : vector<8x1xf32> to vector<8x8xf32>
    %1014 = arith.mulf %1013, %953 : vector<8x8xf32>
    %1015 = arith.addf %1011, %1014 : vector<8x8xf32>
    %1016 = vector.extract_strided_slice %877 {offsets = [0, 16], sizes = [8, 8], strides = [1, 1]} : vector<16x32xf32> to vector<8x8xf32>
    %1017 = vector.extract_strided_slice %877 {offsets = [8, 16], sizes = [8, 8], strides = [1, 1]} : vector<16x32xf32> to vector<8x8xf32>
    %1018 = vector.extract_strided_slice %878 {offsets = [0, 16], sizes = [8, 8], strides = [1, 1]} : vector<16x32xf32> to vector<8x8xf32>
    %1019 = vector.extract_strided_slice %878 {offsets = [8, 16], sizes = [8, 8], strides = [1, 1]} : vector<16x32xf32> to vector<8x8xf32>
    %1020 = vector.extract_strided_slice %879 {offsets = [0, 16], sizes = [8, 8], strides = [1, 1]} : vector<16x32xf32> to vector<8x8xf32>
    %1021 = vector.extract_strided_slice %879 {offsets = [8, 16], sizes = [8, 8], strides = [1, 1]} : vector<16x32xf32> to vector<8x8xf32>
    %1022 = arith.mulf %1016, %1018 : vector<8x8xf32>
    %cst_335 = arith.constant dense<0.000000e+00> : vector<8xf32>
    %1023 = vector.multi_reduction <add>, %1022, %cst_335 [1] : vector<8x8xf32> to vector<8xf32>
    %1024 = vector.shape_cast %1023 : vector<8xf32> to vector<8x1xf32>
    %cst_336 = arith.constant 0.353553385 : f32
    %1025 = vector.broadcast %cst_336 : f32 to vector<8x1xf32>
    %1026 = arith.mulf %1024, %1025 : vector<8x1xf32>
    %1027 = arith.mulf %1016, %1019 : vector<8x8xf32>
    %cst_337 = arith.constant dense<0.000000e+00> : vector<8xf32>
    %1028 = vector.multi_reduction <add>, %1027, %cst_337 [1] : vector<8x8xf32> to vector<8xf32>
    %1029 = vector.shape_cast %1028 : vector<8xf32> to vector<8x1xf32>
    %cst_338 = arith.constant 0.353553385 : f32
    %1030 = vector.broadcast %cst_338 : f32 to vector<8x1xf32>
    %1031 = arith.mulf %1029, %1030 : vector<8x1xf32>
    %1032 = tpu.concatenate %1026, %1031 in 1 : vector<8x1xf32>, vector<8x1xf32> -> vector<8x2xf32>
    %1033 = vector.extract_strided_slice %1 {offsets = [0, 0], sizes = [1, 2], strides = [1, 1]} : vector<2x2xf32> to vector<1x2xf32>
    %1034 = vector.broadcast %1033 : vector<1x2xf32> to vector<8x2xf32>
    %1035 = arith.addf %1032, %1034 : vector<8x2xf32>
    %cst_339 = arith.constant dense<0xFF800000> : vector<8xf32>
    %1036 = vector.multi_reduction <maximumf>, %1035, %cst_339 [1] : vector<8x2xf32> to vector<8xf32>
    %1037 = vector.shape_cast %1036 : vector<8xf32> to vector<8x1xf32>
    %1038 = vector.broadcast %1037 : vector<8x1xf32> to vector<8x2xf32>
    %1039 = arith.subf %1035, %1038 : vector<8x2xf32>
    %1040 = math.exp %1039 : vector<8x2xf32>
    %cst_340 = arith.constant dense<0.000000e+00> : vector<8xf32>
    %1041 = vector.multi_reduction <add>, %1040, %cst_340 [1] : vector<8x2xf32> to vector<8xf32>
    %1042 = vector.shape_cast %1041 : vector<8xf32> to vector<8x1xf32>
    %1043 = tpu.reciprocal %1042 {approx = true} : vector<8x1xf32> -> vector<8x1xf32>
    %1044 = vector.broadcast %1043 : vector<8x1xf32> to vector<8x2xf32>
    %1045 = arith.mulf %1040, %1044 : vector<8x2xf32>
    %1046 = vector.extract_strided_slice %1045 {offsets = [0, 0], sizes = [8, 1], strides = [1, 1]} : vector<8x2xf32> to vector<8x1xf32>
    %1047 = vector.broadcast %1046 : vector<8x1xf32> to vector<8x8xf32>
    %1048 = arith.mulf %1047, %1020 : vector<8x8xf32>
    %1049 = vector.extract_strided_slice %1045 {offsets = [0, 1], sizes = [8, 1], strides = [1, 1]} : vector<8x2xf32> to vector<8x1xf32>
    %1050 = vector.broadcast %1049 : vector<8x1xf32> to vector<8x8xf32>
    %1051 = arith.mulf %1050, %1021 : vector<8x8xf32>
    %1052 = arith.addf %1048, %1051 : vector<8x8xf32>
    %1053 = arith.mulf %1017, %1018 : vector<8x8xf32>
    %cst_341 = arith.constant dense<0.000000e+00> : vector<8xf32>
    %1054 = vector.multi_reduction <add>, %1053, %cst_341 [1] : vector<8x8xf32> to vector<8xf32>
    %1055 = vector.shape_cast %1054 : vector<8xf32> to vector<8x1xf32>
    %cst_342 = arith.constant 0.353553385 : f32
    %1056 = vector.broadcast %cst_342 : f32 to vector<8x1xf32>
    %1057 = arith.mulf %1055, %1056 : vector<8x1xf32>
    %1058 = arith.mulf %1017, %1019 : vector<8x8xf32>
    %cst_343 = arith.constant dense<0.000000e+00> : vector<8xf32>
    %1059 = vector.multi_reduction <add>, %1058, %cst_343 [1] : vector<8x8xf32> to vector<8xf32>
    %1060 = vector.shape_cast %1059 : vector<8xf32> to vector<8x1xf32>
    %cst_344 = arith.constant 0.353553385 : f32
    %1061 = vector.broadcast %cst_344 : f32 to vector<8x1xf32>
    %1062 = arith.mulf %1060, %1061 : vector<8x1xf32>
    %1063 = tpu.concatenate %1057, %1062 in 1 : vector<8x1xf32>, vector<8x1xf32> -> vector<8x2xf32>
    %1064 = vector.extract_strided_slice %1 {offsets = [1, 0], sizes = [1, 2], strides = [1, 1]} : vector<2x2xf32> to vector<1x2xf32>
    %1065 = vector.broadcast %1064 : vector<1x2xf32> to vector<8x2xf32>
    %1066 = arith.addf %1063, %1065 : vector<8x2xf32>
    %cst_345 = arith.constant dense<0xFF800000> : vector<8xf32>
    %1067 = vector.multi_reduction <maximumf>, %1066, %cst_345 [1] : vector<8x2xf32> to vector<8xf32>
    %1068 = vector.shape_cast %1067 : vector<8xf32> to vector<8x1xf32>
    %1069 = vector.broadcast %1068 : vector<8x1xf32> to vector<8x2xf32>
    %1070 = arith.subf %1066, %1069 : vector<8x2xf32>
    %1071 = math.exp %1070 : vector<8x2xf32>
    %cst_346 = arith.constant dense<0.000000e+00> : vector<8xf32>
    %1072 = vector.multi_reduction <add>, %1071, %cst_346 [1] : vector<8x2xf32> to vector<8xf32>
    %1073 = vector.shape_cast %1072 : vector<8xf32> to vector<8x1xf32>
    %1074 = tpu.reciprocal %1073 {approx = true} : vector<8x1xf32> -> vector<8x1xf32>
    %1075 = vector.broadcast %1074 : vector<8x1xf32> to vector<8x2xf32>
    %1076 = arith.mulf %1071, %1075 : vector<8x2xf32>
    %1077 = vector.extract_strided_slice %1076 {offsets = [0, 0], sizes = [8, 1], strides = [1, 1]} : vector<8x2xf32> to vector<8x1xf32>
    %1078 = vector.broadcast %1077 : vector<8x1xf32> to vector<8x8xf32>
    %1079 = arith.mulf %1078, %1020 : vector<8x8xf32>
    %1080 = vector.extract_strided_slice %1076 {offsets = [0, 1], sizes = [8, 1], strides = [1, 1]} : vector<8x2xf32> to vector<8x1xf32>
    %1081 = vector.broadcast %1080 : vector<8x1xf32> to vector<8x8xf32>
    %1082 = arith.mulf %1081, %1021 : vector<8x8xf32>
    %1083 = arith.addf %1079, %1082 : vector<8x8xf32>
    %1084 = vector.extract_strided_slice %877 {offsets = [0, 24], sizes = [8, 8], strides = [1, 1]} : vector<16x32xf32> to vector<8x8xf32>
    %1085 = vector.extract_strided_slice %877 {offsets = [8, 24], sizes = [8, 8], strides = [1, 1]} : vector<16x32xf32> to vector<8x8xf32>
    %1086 = vector.extract_strided_slice %878 {offsets = [0, 24], sizes = [8, 8], strides = [1, 1]} : vector<16x32xf32> to vector<8x8xf32>
    %1087 = vector.extract_strided_slice %878 {offsets = [8, 24], sizes = [8, 8], strides = [1, 1]} : vector<16x32xf32> to vector<8x8xf32>
    %1088 = vector.extract_strided_slice %879 {offsets = [0, 24], sizes = [8, 8], strides = [1, 1]} : vector<16x32xf32> to vector<8x8xf32>
    %1089 = vector.extract_strided_slice %879 {offsets = [8, 24], sizes = [8, 8], strides = [1, 1]} : vector<16x32xf32> to vector<8x8xf32>
    %1090 = arith.mulf %1084, %1086 : vector<8x8xf32>
    %cst_347 = arith.constant dense<0.000000e+00> : vector<8xf32>
    %1091 = vector.multi_reduction <add>, %1090, %cst_347 [1] : vector<8x8xf32> to vector<8xf32>
    %1092 = vector.shape_cast %1091 : vector<8xf32> to vector<8x1xf32>
    %cst_348 = arith.constant 0.353553385 : f32
    %1093 = vector.broadcast %cst_348 : f32 to vector<8x1xf32>
    %1094 = arith.mulf %1092, %1093 : vector<8x1xf32>
    %1095 = arith.mulf %1084, %1087 : vector<8x8xf32>
    %cst_349 = arith.constant dense<0.000000e+00> : vector<8xf32>
    %1096 = vector.multi_reduction <add>, %1095, %cst_349 [1] : vector<8x8xf32> to vector<8xf32>
    %1097 = vector.shape_cast %1096 : vector<8xf32> to vector<8x1xf32>
    %cst_350 = arith.constant 0.353553385 : f32
    %1098 = vector.broadcast %cst_350 : f32 to vector<8x1xf32>
    %1099 = arith.mulf %1097, %1098 : vector<8x1xf32>
    %1100 = tpu.concatenate %1094, %1099 in 1 : vector<8x1xf32>, vector<8x1xf32> -> vector<8x2xf32>
    %1101 = vector.extract_strided_slice %1 {offsets = [0, 0], sizes = [1, 2], strides = [1, 1]} : vector<2x2xf32> to vector<1x2xf32>
    %1102 = vector.broadcast %1101 : vector<1x2xf32> to vector<8x2xf32>
    %1103 = arith.addf %1100, %1102 : vector<8x2xf32>
    %cst_351 = arith.constant dense<0xFF800000> : vector<8xf32>
    %1104 = vector.multi_reduction <maximumf>, %1103, %cst_351 [1] : vector<8x2xf32> to vector<8xf32>
    %1105 = vector.shape_cast %1104 : vector<8xf32> to vector<8x1xf32>
    %1106 = vector.broadcast %1105 : vector<8x1xf32> to vector<8x2xf32>
    %1107 = arith.subf %1103, %1106 : vector<8x2xf32>
    %1108 = math.exp %1107 : vector<8x2xf32>
    %cst_352 = arith.constant dense<0.000000e+00> : vector<8xf32>
    %1109 = vector.multi_reduction <add>, %1108, %cst_352 [1] : vector<8x2xf32> to vector<8xf32>
    %1110 = vector.shape_cast %1109 : vector<8xf32> to vector<8x1xf32>
    %1111 = tpu.reciprocal %1110 {approx = true} : vector<8x1xf32> -> vector<8x1xf32>
    %1112 = vector.broadcast %1111 : vector<8x1xf32> to vector<8x2xf32>
    %1113 = arith.mulf %1108, %1112 : vector<8x2xf32>
    %1114 = vector.extract_strided_slice %1113 {offsets = [0, 0], sizes = [8, 1], strides = [1, 1]} : vector<8x2xf32> to vector<8x1xf32>
    %1115 = vector.broadcast %1114 : vector<8x1xf32> to vector<8x8xf32>
    %1116 = arith.mulf %1115, %1088 : vector<8x8xf32>
    %1117 = vector.extract_strided_slice %1113 {offsets = [0, 1], sizes = [8, 1], strides = [1, 1]} : vector<8x2xf32> to vector<8x1xf32>
    %1118 = vector.broadcast %1117 : vector<8x1xf32> to vector<8x8xf32>
    %1119 = arith.mulf %1118, %1089 : vector<8x8xf32>
    %1120 = arith.addf %1116, %1119 : vector<8x8xf32>
    %1121 = arith.mulf %1085, %1086 : vector<8x8xf32>
    %cst_353 = arith.constant dense<0.000000e+00> : vector<8xf32>
    %1122 = vector.multi_reduction <add>, %1121, %cst_353 [1] : vector<8x8xf32> to vector<8xf32>
    %1123 = vector.shape_cast %1122 : vector<8xf32> to vector<8x1xf32>
    %cst_354 = arith.constant 0.353553385 : f32
    %1124 = vector.broadcast %cst_354 : f32 to vector<8x1xf32>
    %1125 = arith.mulf %1123, %1124 : vector<8x1xf32>
    %1126 = arith.mulf %1085, %1087 : vector<8x8xf32>
    %cst_355 = arith.constant dense<0.000000e+00> : vector<8xf32>
    %1127 = vector.multi_reduction <add>, %1126, %cst_355 [1] : vector<8x8xf32> to vector<8xf32>
    %1128 = vector.shape_cast %1127 : vector<8xf32> to vector<8x1xf32>
    %cst_356 = arith.constant 0.353553385 : f32
    %1129 = vector.broadcast %cst_356 : f32 to vector<8x1xf32>
    %1130 = arith.mulf %1128, %1129 : vector<8x1xf32>
    %1131 = tpu.concatenate %1125, %1130 in 1 : vector<8x1xf32>, vector<8x1xf32> -> vector<8x2xf32>
    %1132 = vector.extract_strided_slice %1 {offsets = [1, 0], sizes = [1, 2], strides = [1, 1]} : vector<2x2xf32> to vector<1x2xf32>
    %1133 = vector.broadcast %1132 : vector<1x2xf32> to vector<8x2xf32>
    %1134 = arith.addf %1131, %1133 : vector<8x2xf32>
    %cst_357 = arith.constant dense<0xFF800000> : vector<8xf32>
    %1135 = vector.multi_reduction <maximumf>, %1134, %cst_357 [1] : vector<8x2xf32> to vector<8xf32>
    %1136 = vector.shape_cast %1135 : vector<8xf32> to vector<8x1xf32>
    %1137 = vector.broadcast %1136 : vector<8x1xf32> to vector<8x2xf32>
    %1138 = arith.subf %1134, %1137 : vector<8x2xf32>
    %1139 = math.exp %1138 : vector<8x2xf32>
    %cst_358 = arith.constant dense<0.000000e+00> : vector<8xf32>
    %1140 = vector.multi_reduction <add>, %1139, %cst_358 [1] : vector<8x2xf32> to vector<8xf32>
    %1141 = vector.shape_cast %1140 : vector<8xf32> to vector<8x1xf32>
    %1142 = tpu.reciprocal %1141 {approx = true} : vector<8x1xf32> -> vector<8x1xf32>
    %1143 = vector.broadcast %1142 : vector<8x1xf32> to vector<8x2xf32>
    %1144 = arith.mulf %1139, %1143 : vector<8x2xf32>
    %1145 = vector.extract_strided_slice %1144 {offsets = [0, 0], sizes = [8, 1], strides = [1, 1]} : vector<8x2xf32> to vector<8x1xf32>
    %1146 = vector.broadcast %1145 : vector<8x1xf32> to vector<8x8xf32>
    %1147 = arith.mulf %1146, %1088 : vector<8x8xf32>
    %1148 = vector.extract_strided_slice %1144 {offsets = [0, 1], sizes = [8, 1], strides = [1, 1]} : vector<8x2xf32> to vector<8x1xf32>
    %1149 = vector.broadcast %1148 : vector<8x1xf32> to vector<8x8xf32>
    %1150 = arith.mulf %1149, %1089 : vector<8x8xf32>
    %1151 = arith.addf %1147, %1150 : vector<8x8xf32>
    %1152 = tpu.concatenate %916, %984, %1052, %1120 in 1 : vector<8x8xf32>, vector<8x8xf32>, vector<8x8xf32>, vector<8x8xf32> -> vector<8x32xf32>
    %1153 = tpu.concatenate %947, %1015, %1083, %1151 in 1 : vector<8x8xf32>, vector<8x8xf32>, vector<8x8xf32>, vector<8x8xf32> -> vector<8x32xf32>
    %1154 = tpu.concatenate %1152, %1153 in 0 : vector<8x32xf32>, vector<8x32xf32> -> vector<16x32xf32>
    %cst_359 = arith.constant dense<0.000000e+00> : vector<16x32xf32>
    %1155 = tpu.matmul %1154, %871, %cst_359 {dimension_numbers = #tpu.dot_dimension_numbers<[1], [0], [0], [1], [0, 0, 1, 1], [], []>} : vector<16x32xf32>, vector<32x32xf32>, vector<16x32xf32> -> vector<16x32xf32>
    %1156 = vector.broadcast %873 : vector<1x32xf32> to vector<16x32xf32>
    %1157 = arith.addf %1155, %1156 : vector<16x32xf32>
    %1158 = arith.addf %839, %1157 : vector<16x32xf32>
    %c3_360 = arith.constant 3 : index
    %c0_361 = arith.constant 0 : index
    %c0_362 = arith.constant 0 : index
    %1159 = vector.load %arg11[%c3_360, %c0_361, %c0_362] : memref<4x1x32xf32, #tpu.memory_space<vmem>>, vector<1x1x32xf32>
    %1160 = vector.shape_cast %1159 : vector<1x1x32xf32> to vector<1x32xf32>
    %c3_363 = arith.constant 3 : index
    %c0_364 = arith.constant 0 : index
    %c0_365 = arith.constant 0 : index
    %1161 = vector.load %arg12[%c3_363, %c0_364, %c0_365] : memref<4x1x32xf32, #tpu.memory_space<vmem>>, vector<1x1x32xf32>
    %1162 = vector.shape_cast %1161 : vector<1x1x32xf32> to vector<1x32xf32>
    %cst_366 = arith.constant dense<0.000000e+00> : vector<16xf32>
    %1163 = vector.multi_reduction <add>, %1158, %cst_366 [1] : vector<16x32xf32> to vector<16xf32>
    %1164 = vector.shape_cast %1163 : vector<16xf32> to vector<16x1xf32>
    %cst_367 = arith.constant 3.200000e+01 : f32
    %1165 = vector.broadcast %cst_367 : f32 to vector<16x1xf32>
    %1166 = arith.divf %1164, %1165 : vector<16x1xf32>
    %1167 = vector.broadcast %1166 : vector<16x1xf32> to vector<16x32xf32>
    %1168 = arith.subf %1158, %1167 : vector<16x32xf32>
    %1169 = arith.mulf %1168, %1168 : vector<16x32xf32>
    %cst_368 = arith.constant dense<0.000000e+00> : vector<16xf32>
    %1170 = vector.multi_reduction <add>, %1169, %cst_368 [1] : vector<16x32xf32> to vector<16xf32>
    %1171 = vector.shape_cast %1170 : vector<16xf32> to vector<16x1xf32>
    %cst_369 = arith.constant 3.200000e+01 : f32
    %1172 = vector.broadcast %cst_369 : f32 to vector<16x1xf32>
    %1173 = arith.divf %1171, %1172 : vector<16x1xf32>
    %1174 = vector.broadcast %1166 : vector<16x1xf32> to vector<16x32xf32>
    %1175 = arith.subf %1158, %1174 : vector<16x32xf32>
    %cst_370 = arith.constant 9.99999974E-6 : f32
    %1176 = vector.broadcast %cst_370 : f32 to vector<16x1xf32>
    %1177 = arith.addf %1173, %1176 : vector<16x1xf32>
    %1178 = math.rsqrt %1177 : vector<16x1xf32>
    %1179 = vector.broadcast %1178 : vector<16x1xf32> to vector<16x32xf32>
    %1180 = arith.mulf %1175, %1179 : vector<16x32xf32>
    %1181 = vector.broadcast %1160 : vector<1x32xf32> to vector<16x32xf32>
    %1182 = arith.mulf %1180, %1181 : vector<16x32xf32>
    %1183 = vector.broadcast %1162 : vector<1x32xf32> to vector<16x32xf32>
    %1184 = arith.addf %1182, %1183 : vector<16x32xf32>
    %c3_371 = arith.constant 3 : index
    %c0_372 = arith.constant 0 : index
    %c0_373 = arith.constant 0 : index
    %1185 = vector.load %arg13[%c3_371, %c0_372, %c0_373] : memref<4x32x128xf32, #tpu.memory_space<vmem>>, vector<1x32x128xf32>
    %1186 = vector.shape_cast %1185 : vector<1x32x128xf32> to vector<32x128xf32>
    %cst_374 = arith.constant dense<0.000000e+00> : vector<16x128xf32>
    %1187 = tpu.matmul %1184, %1186, %cst_374 {dimension_numbers = #tpu.dot_dimension_numbers<[1], [0], [0], [1], [0, 0, 1, 1], [], []>} : vector<16x32xf32>, vector<32x128xf32>, vector<16x128xf32> -> vector<16x128xf32>
    %c3_375 = arith.constant 3 : index
    %c0_376 = arith.constant 0 : index
    %c0_377 = arith.constant 0 : index
    %1188 = vector.load %arg14[%c3_375, %c0_376, %c0_377] : memref<4x1x128xf32, #tpu.memory_space<vmem>>, vector<1x1x128xf32>
    %1189 = vector.shape_cast %1188 : vector<1x1x128xf32> to vector<1x128xf32>
    %1190 = vector.broadcast %1189 : vector<1x128xf32> to vector<16x128xf32>
    %1191 = arith.addf %1187, %1190 : vector<16x128xf32>
    %cst_378 = arith.constant 0.000000e+00 : f32
    %1192 = vector.broadcast %cst_378 : f32 to vector<16x128xf32>
    %1193 = arith.maximumf %1191, %1192 : vector<16x128xf32>
    %c3_379 = arith.constant 3 : index
    %c0_380 = arith.constant 0 : index
    %c0_381 = arith.constant 0 : index
    %1194 = vector.load %arg15[%c3_379, %c0_380, %c0_381] : memref<4x128x32xf32, #tpu.memory_space<vmem>>, vector<1x128x32xf32>
    %1195 = vector.shape_cast %1194 : vector<1x128x32xf32> to vector<128x32xf32>
    %cst_382 = arith.constant dense<0.000000e+00> : vector<16x32xf32>
    %1196 = tpu.matmul %1193, %1195, %cst_382 {dimension_numbers = #tpu.dot_dimension_numbers<[1], [0], [0], [1], [0, 0, 1, 1], [], []>} : vector<16x128xf32>, vector<128x32xf32>, vector<16x32xf32> -> vector<16x32xf32>
    %c3_383 = arith.constant 3 : index
    %c0_384 = arith.constant 0 : index
    %c0_385 = arith.constant 0 : index
    %1197 = vector.load %arg16[%c3_383, %c0_384, %c0_385] : memref<4x1x32xf32, #tpu.memory_space<vmem>>, vector<1x1x32xf32>
    %1198 = vector.shape_cast %1197 : vector<1x1x32xf32> to vector<1x32xf32>
    %1199 = vector.broadcast %1198 : vector<1x32xf32> to vector<16x32xf32>
    %1200 = arith.addf %1196, %1199 : vector<16x32xf32>
    %1201 = arith.addf %1158, %1200 : vector<16x32xf32>
    %c0_386 = arith.constant 0 : index
    %c0_387 = arith.constant 0 : index
    %1202 = vector.load %arg17[%c0_386, %c0_387] : memref<1x32xf32, #tpu.memory_space<vmem>>, vector<1x32xf32>
    %c0_388 = arith.constant 0 : index
    %c0_389 = arith.constant 0 : index
    %1203 = vector.load %arg18[%c0_388, %c0_389] : memref<1x32xf32, #tpu.memory_space<vmem>>, vector<1x32xf32>
    %cst_390 = arith.constant dense<0.000000e+00> : vector<16xf32>
    %1204 = vector.multi_reduction <add>, %1201, %cst_390 [1] : vector<16x32xf32> to vector<16xf32>
    %1205 = vector.shape_cast %1204 : vector<16xf32> to vector<16x1xf32>
    %cst_391 = arith.constant 3.200000e+01 : f32
    %1206 = vector.broadcast %cst_391 : f32 to vector<16x1xf32>
    %1207 = arith.divf %1205, %1206 : vector<16x1xf32>
    %1208 = vector.broadcast %1207 : vector<16x1xf32> to vector<16x32xf32>
    %1209 = arith.subf %1201, %1208 : vector<16x32xf32>
    %1210 = arith.mulf %1209, %1209 : vector<16x32xf32>
    %cst_392 = arith.constant dense<0.000000e+00> : vector<16xf32>
    %1211 = vector.multi_reduction <add>, %1210, %cst_392 [1] : vector<16x32xf32> to vector<16xf32>
    %1212 = vector.shape_cast %1211 : vector<16xf32> to vector<16x1xf32>
    %cst_393 = arith.constant 3.200000e+01 : f32
    %1213 = vector.broadcast %cst_393 : f32 to vector<16x1xf32>
    %1214 = arith.divf %1212, %1213 : vector<16x1xf32>
    %1215 = vector.broadcast %1207 : vector<16x1xf32> to vector<16x32xf32>
    %1216 = arith.subf %1201, %1215 : vector<16x32xf32>
    %cst_394 = arith.constant 9.99999974E-6 : f32
    %1217 = vector.broadcast %cst_394 : f32 to vector<16x1xf32>
    %1218 = arith.addf %1214, %1217 : vector<16x1xf32>
    %1219 = math.rsqrt %1218 : vector<16x1xf32>
    %1220 = vector.broadcast %1219 : vector<16x1xf32> to vector<16x32xf32>
    %1221 = arith.mulf %1216, %1220 : vector<16x32xf32>
    %1222 = vector.broadcast %1202 : vector<1x32xf32> to vector<16x32xf32>
    %1223 = arith.mulf %1221, %1222 : vector<16x32xf32>
    %1224 = vector.broadcast %1203 : vector<1x32xf32> to vector<16x32xf32>
    %1225 = arith.addf %1223, %1224 : vector<16x32xf32>
    %c0_395 = arith.constant 0 : index
    %c0_396 = arith.constant 0 : index
    %1226 = vector.load %arg19[%c0_395, %c0_396] : memref<32x6xf32, #tpu.memory_space<vmem>>, vector<32x6xf32>
    %cst_397 = arith.constant dense<0.000000e+00> : vector<16x6xf32>
    %1227 = tpu.matmul %1225, %1226, %cst_397 {dimension_numbers = #tpu.dot_dimension_numbers<[1], [0], [0], [1], [0, 0, 1, 1], [], []>} : vector<16x32xf32>, vector<32x6xf32>, vector<16x6xf32> -> vector<16x6xf32>
    %c0_398 = arith.constant 0 : index
    %c0_399 = arith.constant 0 : index
    %1228 = vector.load %arg20[%c0_398, %c0_399] : memref<1x6xf32, #tpu.memory_space<vmem>>, vector<1x6xf32>
    %1229 = vector.broadcast %1228 : vector<1x6xf32> to vector<16x6xf32>
    %1230 = arith.addf %1227, %1229 : vector<16x6xf32>
    %cst_400 = arith.constant 0.000000e+00 : f32
    %1231 = vector.broadcast %cst_400 : f32 to vector<16x6xf32>
    %1232 = arith.maximumf %1230, %1231 : vector<16x6xf32>
    %c0_401 = arith.constant 0 : index
    %c0_402 = arith.constant 0 : index
    %c0_403 = arith.constant 0 : index
    %1233 = vector.load %arg21[%c0_401, %c0_402, %c0_403] : memref<1x16x6xf32, #tpu.memory_space<vmem>>, vector<1x16x6xf32>
    %1234 = vector.shape_cast %1233 : vector<1x16x6xf32> to vector<16x6xf32>
    %1235 = vector.shape_cast %1232 : vector<16x6xf32> to vector<1x16x6xf32>
    tpu.vector_store %arg21[%c0_401, %c0_402, %c0_403], %1235 {strides = array<i32>} : memref<1x16x6xf32, #tpu.memory_space<vmem>>, vector<1x16x6xf32>,
    return
  }
  func.func @transform_0(%arg0: i32) -> (i32, i32) {
    %c0_i32 = arith.constant 0 : i32
    %c0_i32_0 = arith.constant 0 : i32
    %c0_i32_1 = arith.constant 0 : i32
    return %c0_i32, %c0_i32_0 : i32, i32
  }
  func.func @transform_1(%arg0: i32) -> (i32, i32) {
    %c0_i32 = arith.constant 0 : i32
    %c0_i32_0 = arith.constant 0 : i32
    %c0_i32_1 = arith.constant 0 : i32
    return %c0_i32, %c0_i32_0 : i32, i32
  }
  func.func @transform_2(%arg0: i32) -> (i32, i32) {
    %c0_i32 = arith.constant 0 : i32
    %c0_i32_0 = arith.constant 0 : i32
    %c0_i32_1 = arith.constant 0 : i32
    return %c0_i32, %c0_i32_0 : i32, i32
  }
  func.func @transform_3(%arg0: i32) -> (i32, i32, i32) {
    %c0_i32 = arith.constant 0 : i32
    %c0_i32_0 = arith.constant 0 : i32
    %c0_i32_1 = arith.constant 0 : i32
    return %arg0, %c0_i32, %c0_i32_0 : i32, i32, i32
  }
  func.func @transform_4(%arg0: i32) -> (i32, i32, i32) {
    %c0_i32 = arith.constant 0 : i32
    %c0_i32_0 = arith.constant 0 : i32
    %c0_i32_1 = arith.constant 0 : i32
    %c0_i32_2 = arith.constant 0 : i32
    return %c0_i32, %c0_i32_0, %c0_i32_1 : i32, i32, i32
  }
  func.func @transform_5(%arg0: i32) -> (i32, i32, i32) {
    %c0_i32 = arith.constant 0 : i32
    %c0_i32_0 = arith.constant 0 : i32
    %c0_i32_1 = arith.constant 0 : i32
    %c0_i32_2 = arith.constant 0 : i32
    return %c0_i32, %c0_i32_0, %c0_i32_1 : i32, i32, i32
  }
  func.func @transform_6(%arg0: i32) -> (i32, i32, i32) {
    %c0_i32 = arith.constant 0 : i32
    %c0_i32_0 = arith.constant 0 : i32
    %c0_i32_1 = arith.constant 0 : i32
    %c0_i32_2 = arith.constant 0 : i32
    return %c0_i32, %c0_i32_0, %c0_i32_1 : i32, i32, i32
  }
  func.func @transform_7(%arg0: i32) -> (i32, i32, i32) {
    %c0_i32 = arith.constant 0 : i32
    %c0_i32_0 = arith.constant 0 : i32
    %c0_i32_1 = arith.constant 0 : i32
    %c0_i32_2 = arith.constant 0 : i32
    return %c0_i32, %c0_i32_0, %c0_i32_1 : i32, i32, i32
  }
  func.func @transform_8(%arg0: i32) -> (i32, i32, i32) {
    %c0_i32 = arith.constant 0 : i32
    %c0_i32_0 = arith.constant 0 : i32
    %c0_i32_1 = arith.constant 0 : i32
    %c0_i32_2 = arith.constant 0 : i32
    return %c0_i32, %c0_i32_0, %c0_i32_1 : i32, i32, i32
  }
  func.func @transform_9(%arg0: i32) -> (i32, i32, i32) {
    %c0_i32 = arith.constant 0 : i32
    %c0_i32_0 = arith.constant 0 : i32
    %c0_i32_1 = arith.constant 0 : i32
    %c0_i32_2 = arith.constant 0 : i32
    return %c0_i32, %c0_i32_0, %c0_i32_1 : i32, i32, i32
  }
  func.func @transform_10(%arg0: i32) -> (i32, i32, i32) {
    %c0_i32 = arith.constant 0 : i32
    %c0_i32_0 = arith.constant 0 : i32
    %c0_i32_1 = arith.constant 0 : i32
    %c0_i32_2 = arith.constant 0 : i32
    return %c0_i32, %c0_i32_0, %c0_i32_1 : i32, i32, i32
  }
  func.func @transform_11(%arg0: i32) -> (i32, i32, i32) {
    %c0_i32 = arith.constant 0 : i32
    %c0_i32_0 = arith.constant 0 : i32
    %c0_i32_1 = arith.constant 0 : i32
    %c0_i32_2 = arith.constant 0 : i32
    return %c0_i32, %c0_i32_0, %c0_i32_1 : i32, i32, i32
  }
  func.func @transform_12(%arg0: i32) -> (i32, i32, i32) {
    %c0_i32 = arith.constant 0 : i32
    %c0_i32_0 = arith.constant 0 : i32
    %c0_i32_1 = arith.constant 0 : i32
    %c0_i32_2 = arith.constant 0 : i32
    return %c0_i32, %c0_i32_0, %c0_i32_1 : i32, i32, i32
  }
  func.func @transform_13(%arg0: i32) -> (i32, i32, i32) {
    %c0_i32 = arith.constant 0 : i32
    %c0_i32_0 = arith.constant 0 : i32
    %c0_i32_1 = arith.constant 0 : i32
    %c0_i32_2 = arith.constant 0 : i32
    return %c0_i32, %c0_i32_0, %c0_i32_1 : i32, i32, i32
  }
  func.func @transform_14(%arg0: i32) -> (i32, i32, i32) {
    %c0_i32 = arith.constant 0 : i32
    %c0_i32_0 = arith.constant 0 : i32
    %c0_i32_1 = arith.constant 0 : i32
    %c0_i32_2 = arith.constant 0 : i32
    return %c0_i32, %c0_i32_0, %c0_i32_1 : i32, i32, i32
  }
  func.func @transform_15(%arg0: i32) -> (i32, i32, i32) {
    %c0_i32 = arith.constant 0 : i32
    %c0_i32_0 = arith.constant 0 : i32
    %c0_i32_1 = arith.constant 0 : i32
    %c0_i32_2 = arith.constant 0 : i32
    return %c0_i32, %c0_i32_0, %c0_i32_1 : i32, i32, i32
  }
  func.func @transform_16(%arg0: i32) -> (i32, i32) {
    %c0_i32 = arith.constant 0 : i32
    %c0_i32_0 = arith.constant 0 : i32
    %c0_i32_1 = arith.constant 0 : i32
    return %c0_i32, %c0_i32_0 : i32, i32
  }
  func.func @transform_17(%arg0: i32) -> (i32, i32) {
    %c0_i32 = arith.constant 0 : i32
    %c0_i32_0 = arith.constant 0 : i32
    %c0_i32_1 = arith.constant 0 : i32
    return %c0_i32, %c0_i32_0 : i32, i32
  }
  func.func @transform_18(%arg0: i32) -> (i32, i32) {
    %c0_i32 = arith.constant 0 : i32
    %c0_i32_0 = arith.constant 0 : i32
    %c0_i32_1 = arith.constant 0 : i32
    return %c0_i32, %c0_i32_0 : i32, i32
  }
  func.func @transform_19(%arg0: i32) -> (i32, i32) {
    %c0_i32 = arith.constant 0 : i32
    %c0_i32_0 = arith.constant 0 : i32
    %c0_i32_1 = arith.constant 0 : i32
    return %c0_i32, %c0_i32_0 : i32, i32
  }
  func.func @transform_20(%arg0: i32) -> (i32, i32, i32) {
    %c0_i32 = arith.constant 0 : i32
    %c0_i32_0 = arith.constant 0 : i32
    %c0_i32_1 = arith.constant 0 : i32
    return %arg0, %c0_i32, %c0_i32_0 : i32, i32, i32
  }
}

</mosaic_0001>

<bundles_post_ra>
// kernel: decoder_forward.1
= control target key start
LH: loop header
LB: loop body
LE: loop exit
PB: predicated region body
PF: predicated region fallthrough
CT: control target
= control target key end

     0   :  { %s8975_s0 = inlined_call_operand.vmem [shape: f32[16,32], index: 0, kind: input, shape index: {}]   ;;  %s8976_s1 = inlined_call_operand.vmem [shape: f32[2,2], index: 1, kind: input, shape index: {}]   ;;  %s8977_s2 = inlined_call_operand.vmem [shape: f32[32,32], index: 2, kind: input, shape index: {}]   ;;  %s8978_s3 = inlined_call_operand.vmem [shape: f32[6,1,32], index: 3, kind: input, shape index: {}]   ;;  %s8979_s4 = inlined_call_operand.vmem [shape: f32[4,1,32], index: 4, kind: input, shape index: {}]   ;;  %s8980_s5 = inlined_call_operand.vmem [shape: f32[4,1,32], index: 5, kind: input, shape index: {}]   ;;  %s8981_s6 = inlined_call_operand.vmem [shape: f32[4,32,96], index: 6, kind: input, shape index: {}]   ;;  %s8982_s7 = inlined_call_operand.vmem [shape: f32[4,1,96], index: 7, kind: input, shape index: {}]   ;;  %s8983_s8 = inlined_call_operand.vmem [shape: f32[4,32,32], index: 8, kind: input, shape index: {}]   ;;  %s8984_s9 = inlined_call_operand.vmem [shape: f32[4,1,32], index: 9, kind: input, shape index: {}]   ;;  %s8985_s10 = inlined_call_operand.vmem [shape: f32[4,1,32], index: 10, kind: input, shape index: {}]   ;;  %s8986_s11 = inlined_call_operand.vmem [shape: f32[4,1,32], index: 11, kind: input, shape index: {}]   ;;  %s8987_s12 = inlined_call_operand.vmem [shape: f32[4,32,128], index: 12, kind: input, shape index: {}]   ;;  %s8988_s13 = inlined_call_operand.vmem [shape: f32[4,1,128], index: 13, kind: input, shape index: {}]   ;;  %s8989_s14 = inlined_call_operand.vmem [shape: f32[4,128,32], index: 14, kind: input, shape index: {}]   ;;  %s8990_s15 = inlined_call_operand.vmem [shape: f32[4,1,32], index: 15, kind: input, shape index: {}]   ;;  %s8991_s16 = inlined_call_operand.vmem [shape: f32[1,32], index: 16, kind: input, shape index: {}]   ;;  %s8992_s17 = inlined_call_operand.vmem [shape: f32[1,32], index: 17, kind: input, shape index: {}]   ;;  %s8993_s18 = inlined_call_operand.vmem [shape: f32[32,6], index: 18, kind: input, shape index: {}]   ;;  %s8994_s19 = inlined_call_operand.vmem [shape: f32[1,6], index: 19, kind: input, shape index: {}]   ;;  %s8995_s20 = inlined_call_operand.vmem [shape: f32[6,16,6], index: 20, kind: output, shape index: {}]  }
   0x1   :  { %9030 = sst [smem:[#allocation3_spill]] %s8975_s0 }
   0x2   :  { %9031 = sst [smem:[#allocation4_spill]] %s8976_s1  ;;  %s7747_s1 = smov 0  }
   0x3   :  { %9032 = sst [smem:[#allocation5_spill]] %s8977_s2 }
   0x4   :  { %9033 = sst [smem:[#allocation6_spill]] %s8978_s3 }
   0x5   :  { %9034 = sst [smem:[#allocation7_spill]] %s8979_s4 }
   0x6   :  { %9035 = sst [smem:[#allocation8_spill]] %s8992_s17 }
   0x7   :  { %9036 = sst [smem:[#allocation9_spill]] %s8994_s19 }
   0x8   :  { %9037 = sst [smem:[#allocation10_spill]] %s8995_s20 }
   0x9 LB: > { %9038 = sst [smem:[#allocation2_spill]] %s7622_s1  ;;  %s6257_s22 = sadd.s32 4294967295, %s7622_s1   ;;  %s7622_s1 = sphi %s7747_s1, %s30_s1  }
   0xa   : > { %p6261_p0 = scmp.ge.s32.totalorder %s7622_s1, 1  ;;  %p560_p1 = scmp.lt.s32.totalorder %s7622_s1, 7 }
   0xc   : > { %p561_p2 = pnand %p6261_p0, %p560_p1 }
   0xd   : > { %s9039_s2 = sld [smem:[#allocation5_spill]] (!%p561_p2)  ;;  %vm638_vm0 = vcmask (!%p561_p2), 261120   ;;  %s9040_s0 = sld [smem:[#allocation3_spill]] (!%p561_p2)  ;;  %v767_v27 = vld [vmem:[%s8981_s6] sm:$0xff] (!%p561_p2)  ;;  %v768_v28 = vld [vmem:[%s8981_s6 + $0x8] sm:$0xff] (!%p561_p2)  ;;  %v769_v29 = vld [vmem:[%s8981_s6 + $0x10] sm:$0xff] (!%p561_p2) }
   0xe   : > { %564 = sbr.rel (%p561_p2) target bundleno = 11921 (0x2e91), region = 100  ;;  %p616_p3 = scmp.lt.s32.totalorder (!%p561_p2), %s6257_s22, 5  ;;  %v7169_v30 = vpack.c.bf16 (!%p561_p2), %v768_v28, %v767_v27  ;;  %v770_v31 = vld [vmem:[%s8981_s6 + $0x18] sm:$0xff] (!%p561_p2)  ;;  %v6268_v42 = vld [vmem:[%s8980_s5] ss:$0 sm:$0xff] (!%p561_p2)  ;;  %v7624_v49 = vmov (!%p561_p2), 0.0  }
   0xf   : > { %s9041_s3 = sld [smem:[#allocation6_spill]] (!%p561_p2)  ;;  %v7173_v32 = vpack.c.bf16 (!%p561_p2), %v770_v31, %v769_v29  ;;  %6734 = vmatprep.subr.mxu1 (!%p561_p2), %v7624_v49  ;;  %vm7625_vm1 = vmmov (!%p561_p2), 0   ;;  %v6269_v50 = vld [vmem:[%s8982_s7] ss:$0 sm:$0xff] (!%p561_p2)  ;;  %s9009_s30 = smov (!%p561_p2), 88   ;;  %vm867_vm2 = vcmask (!%p561_p2), 64512  }
  0x10   : > { %6736 = vmatprep.mubr.msk.f32.mxu1 (!%p561_p2), %vm7625_vm1, %v7624_v49  ;;  %s9019_s21 = smov (!%p561_p2), 96   ;;  %s9017_s23 = smov (!%p561_p2), 120   ;;  %vm1541_vm3 = vcmask (!%p561_p2), 130048   ;;  %vm1543_vm4 = vcmask (!%p561_p2), 195584   ;;  %vm2715_vm5 = vcmask (!%p561_p2), 7168   ;;  %vm2722_vm6 = vcmask (!%p561_p2), 15360  }
  0x11   : > { %s9015_s24 = smov (!%p561_p2), 112   ;;  %s8999_s25 = smov (!%p561_p2), 80   ;;  %vm6202_vm7 = vcmask (!%p561_p2), 48128  }
  0x12   : > { %s9005_s27 = smov (!%p561_p2), 72   ;;  %s9011_s28 = smov (!%p561_p2), 64  }
  0x13   : > { %v627_v0 = vld [vmem:[%s9039_s2] sm:$0xff] (!%p561_p2)  ;;  %v628_v1 = vld [vmem:[%s9039_s2 + $0x8] sm:$0xff] (!%p561_p2)  ;;  %v629_v2 = vld [vmem:[%s9039_s2 + $0x10] sm:$0xff] (!%p561_p2)  ;;  %s9003_s4 = smov (!%p561_p2), 48   ;;  %s9001_s29 = smov (!%p561_p2), 40  }
  0x14   : > { %v7161_v3 = vpack.c.bf16 (!%p561_p2), %v628_v1, %v627_v0  ;;  %v630_v4 = vld [vmem:[%s9039_s2 + $0x18] sm:$0xff] (!%p561_p2)  ;;  %v624_v5 = vld [vmem:[%s9040_s0] sm:$0xff] (!%p561_p2)  ;;  %v625_v7 = vld [vmem:[%s9040_s0 + $0x8] sm:$0xff] (!%p561_p2)  ;;  %s9049_s0 = smov (!%p561_p2), 88   ;;  %s9055_s1 = smov (!%p561_p2), 8  }
  0x15   : > { %v7165_v6 = vpack.c.bf16 %v630_v4, %v629_v2  ;;  %6715 = vmatprep.mubr.msk.f32.mxu0 %vm638_vm0, %v624_v5  ;;  %s9063_s22 = smov (!%p616_p3, %s6257_s22), 5  ;;  %s9056_s2 = smov 16  }
  0x16   : > { %7162 = vmatprep.subr.bf16.mxu0 %v7161_v3  ;;  %s618_s26 = scalar_lea.vmem %s9041_s3, %s9063_s22  ;;  %s9013_s3 = smov 104  }
  0x17   : > { %7164 = vmatpush3.bf16.msra.mxu0 %v7161_v3  ;;  %v6264_v8 = vld [vmem:[%s618_s26] ss:$0 sm:$0xff]  ;;  %s9042_s26 = sld [smem:[#allocation7_spill]]  ;;  %s9058_s17 = sld [smem:[#allocation8_spill]] }
  0x18   : > { %7166 = vmatprep.subr.bf16.mxu0 %v7165_v6  ;;  %s9059_s20 = sld [smem:[#allocation9_spill]] }
  0x1b   : > { %7168 = vmatpush3.bf16.msra.mxu0 %v7165_v6 }
  0x1c   : > { %7170 = vmatprep.subr.bf16.mxu0 %v7169_v30 }
  0x1d   : > { %v6267_v40 = vld [vmem:[%s9042_s26] ss:$0 sm:$0xff] }
  0x1e   : > { %6716 = vmatmul.mubr.msk.f32.vlgmr.msra.gmra.mrb[0].mxu0 %vm638_vm0, %v625_v7 }
  0x1f   : > { %7172 = vmatpush3.bf16.msra.mxu0 %v7169_v30 }
  0x20   : > { %7174 = vmatprep.subr.bf16.mxu0 %v7173_v32 }
  0x23   : > { %7176 = vmatpush3.bf16.msra.mxu0 %v7173_v32 }
  0x24   : > { %6729 = vmatprep.subr.mxu0 %v7624_v49 }
  0xf1   : > { %v6717_v9 = vpop.f32.mrb[0].mxu0 }
  0xf2   : > { %v711_v10 = vpop.f32.mrb[1].mxu0  ;;  %v717_v11 = vadd.f32 %v6717_v9, %v6264_v8 }
  0xf3   : > { %v712_v12 = vadd.f32 %v6264_v8, %v711_v10 }
  0xf4   : > { %v7783_v14 = vmax.f32 %v717_v11, 0.0 }
  0xf5   : > { %v7781_v13 = vmax.f32 %v712_v12, 0.0 }
  0xf6   : > { %v727_v16 = vsel %vm638_vm0, %v7783_v14, 0.0 }
  0xf7   : > { %v724_v15 = vsel %vm638_vm0, %v7781_v13, 0.0 }
  0xf8   : > { %725 = vadd.xlane.f32.xlu0 %v724_v15 }
  0xfc   : > { %728 = vadd.xlane.f32.xlu0 %v727_v16 }
 0x185   : > { %v726_v17 = vpop.xlane.xlu0 %725 }
 0x186   : > { %v731_v18 = vmul.f32 0.03125, %v726_v17 }
 0x188   : > { %v733_v19 = vsub.f32 %v7781_v13, %v731_v18 }
 0x189   : > { %v729_v20 = vpop.xlane.xlu0 %728 }
 0x18a   : > { %v732_v21 = vmul.f32 0.03125, %v729_v20  ;;  %v735_v22 = vmul.f32 %v733_v19, %v733_v19 }
 0x18c   : > { %v734_v23 = vsub.f32 %v7783_v14, %v732_v21  ;;  %v737_v24 = vsel %vm638_vm0, %v735_v22, 0.0 }
 0x18d   : > { %738 = vadd.xlane.f32.xlu1 %v737_v24 }
 0x18e   : > { %v736_v25 = vmul.f32 %v734_v23, %v734_v23 }
 0x190   : > { %v740_v26 = vsel %vm638_vm0, %v736_v25, 0.0 }
 0x191   : > { %741 = vadd.xlane.f32.xlu1 %v740_v26 }
 0x21a   : > { %v739_v33 = vpop.xlane.xlu1 %738 }
 0x21b   : > { %v743_v34 = vmul.f32 0.03125, %v739_v33 }
 0x21d   : > { %v745_v35 = vadd.f32 1e-05, %v743_v34 }
 0x21e   : > { %v742_v36 = vpop.xlane.xlu1 %741 }
 0x21f   : > { %7452 = vrsqrt.f32 %v745_v35  ;;  %v744_v37 = vmul.f32 0.03125, %v742_v36 }
 0x221   : > { %v746_v38 = vadd.f32 1e-05, %v744_v37 }
 0x223   : > { %7454 = vrsqrt.f32 %v746_v38 }
 0x229   : > { %v7453_v39 = vpop.eup %7452 }
 0x22a   : > { %v749_v41 = vmul.f32 %v7453_v39, %v733_v19 }
 0x22c   : > { %v757_v43 = vmul.f32 %v6267_v40, %v749_v41 }
 0x22d   : > { %v7455_v44 = vpop.eup %7454 }
 0x22e   : > { %v750_v45 = vmul.f32 %v7455_v44, %v734_v23  ;;  %v765_v46 = vadd.f32 %v6268_v42, %v757_v43 }
 0x230   : > { %v758_v47 = vmul.f32 %v6267_v40, %v750_v45  ;;  %6726 = vmatprep.mubr.msk.f32.mxu0 %vm638_vm0, %v765_v46 }
 0x232   : > { %v766_v48 = vadd.f32 %v6268_v42, %v758_v47 }
 0x234   : > { %6727 = vmatmul.mubr.msk.f32.vlgmr.msra.gmra.mrb[2].mxu0 %vm638_vm0, %v766_v48 }
 0x235   : > { %6731 = vmatprep.mubr.msk.f32.mxu0 %vm7625_vm1, %v7624_v49 }
 0x307   : > { %v6728_v51 = vpop.f32.mrb[2].mxu0 }
 0x308   : > { %v855_v52 = vpop.f32.mrb[3].mxu0  ;;  %v7836_v54 = vadd.f32 %v6728_v51, %v6269_v50 }
 0x309   : > { %v7822_v53 = vadd.f32 %v6269_v50, %v855_v52 }
 0x30b   : > { %1032 = vrot.lane.b32.xlu1 %v7822_v53, %s9009_s30  ;;  %865 = vrot.lane.b32.xlu0 %v7822_v53, %s9019_s21 }
 0x30f   : > { %1030 = vrot.lane.b32.xlu1 %v7822_v53, %s9017_s23  ;;  %1196 = vrot.lane.b32.xlu0 %v7822_v53, %s9015_s24 }
 0x313   : > { %1198 = vrot.lane.b32.xlu1 %v7822_v53, %s8999_s25  ;;  %1362 = vrot.lane.b32.xlu0 %v7822_v53, %s9013_s3 }
 0x317   : > { %1364 = vrot.lane.b32.xlu1 %v7822_v53, %s9005_s27  ;;  %1712 = vrot.lane.b32.xlu0 %v7836_v54, %s9009_s30  ;;  %s9021_s30 = smov 24  }
 0x31b   : > { %1546 = vrot.lane.b32.xlu1 %v7836_v54, %s9019_s21  ;;  %1878 = vrot.lane.b32.xlu0 %v7836_v54, %s8999_s25  ;;  %s9007_s25 = smov 56   ;;  %s9044_s21 = smov 120  }
 0x31f   : > { %1710 = vrot.lane.b32.xlu1 %v7836_v54, %s9017_s23  ;;  %2044 = vrot.lane.b32.xlu0 %v7836_v54, %s9005_s27  ;;  %s9051_s23 = smov 72   ;;  %s9054_s27 = smov 40  }
 0x323   : > { %1876 = vrot.lane.b32.xlu1 %v7836_v54, %s9015_s24  ;;  %s9047_s24 = sld [smem:[#allocation4_spill]] }
 0x327   : > { %2042 = vrot.lane.b32.xlu1 %v7836_v54, %s9013_s3  ;;  %s9053_s3 = smov 48  }
 0x37d   : > { %v1033_v55 = vpop.permute.xlu1 %1032  ;;  %v866_v56 = vpop.permute.xlu0 %865 }
 0x37e   : > { %6730 = vmatpush3.xpose.msk.msra.mxu0 %vm867_vm2, %v866_v56 }
 0x37f   : > { %6739 = vmatprep.subr.mxu0 %v7624_v49 }
 0x381   : > { %v1031_v57 = vpop.permute.xlu1 %1030  ;;  %6732 = vmatmul.mubr.msk.f32.vlgmr.msra.gmra.mrb[4].mxu0 %vm867_vm2, %v7822_v53  ;;  %v1197_v58 = vpop.permute.xlu0 %1196 }
 0x382   : > { %6740 = vmatpush3.xpose.msk.msra.mxu0 %vm867_vm2, %v1033_v55  ;;  %6741 = vmatprep.mubr.msk.f32.mxu0 %vm7625_vm1, %v7624_v49 }
 0x383   : > { %6749 = vmatprep.subr.mxu0 %v7624_v49 }
 0x385   : > { %v1199_v59 = vpop.permute.xlu1 %1198  ;;  %6742 = vmatmul.mubr.msk.f32.vlgmr.msra.gmra.mrb[6].mxu0 %vm867_vm2, %v1031_v57  ;;  %v1363_v60 = vpop.permute.xlu0 %1362 }
 0x386   : > { %6750 = vmatpush3.xpose.msk.msra.mxu0 %vm867_vm2, %v1199_v59  ;;  %6751 = vmatprep.mubr.msk.f32.mxu0 %vm7625_vm1, %v7624_v49 }
 0x387   : > { %6759 = vmatprep.subr.mxu0 %v7624_v49 }
 0x389   : > { %v1365_v61 = vpop.permute.xlu1 %1364  ;;  %6752 = vmatmul.mubr.msk.f32.vlgmr.msra.gmra.mrb[8].mxu0 %vm867_vm2, %v1197_v58  ;;  %v1713_v62 = vpop.permute.xlu0 %1712 }
 0x38a   : > { %6760 = vmatpush3.xpose.msk.msra.mxu0 %vm867_vm2, %v1365_v61  ;;  %6761 = vmatprep.mubr.msk.f32.mxu0 %vm7625_vm1, %v7624_v49 }
 0x38b   : > { %6769 = vmatprep.subr.mxu0 %v7624_v49 }
 0x38d   : > { %v1547_v63 = vpop.permute.xlu1 %1546  ;;  %6762 = vmatmul.mubr.msk.f32.vlgmr.msra.gmra.mrb[10].mxu0 %vm867_vm2, %v1363_v60  ;;  %v1879_v1 = vpop.permute.xlu0 %1878 }
 0x38e   : > { %6770 = vmatpush3.xpose.msk.msra.mxu0 %vm867_vm2, %v1547_v63  ;;  %6771 = vmatprep.mubr.msk.f32.mxu0 %vm7625_vm1, %v7624_v49 }
 0x38f   : > { %6779 = vmatprep.subr.mxu0 %v7624_v49 }
 0x391   : > { %v1711_v0 = vpop.permute.xlu1 %1710  ;;  %6772 = vmatmul.mubr.msk.f32.vlgmr.msra.gmra.mrb[12].mxu0 %vm867_vm2, %v7836_v54  ;;  %v2045_v3 = vpop.permute.xlu0 %2044 }
 0x392   : > { %6780 = vmatpush3.xpose.msk.msra.mxu0 %vm867_vm2, %v1713_v62  ;;  %6781 = vmatprep.mubr.msk.f32.mxu0 %vm7625_vm1, %v7624_v49 }
 0x393   : > { %6789 = vmatprep.subr.mxu0 %v7624_v49 }
 0x395   : > { %6782 = vmatmul.mubr.msk.f32.vlgmr.msra.gmra.mrb[14].mxu0 %vm867_vm2, %v1711_v0  ;;  %v1877_v2 = vpop.permute.xlu1 %1876 }
 0x396   : > { %6790 = vmatpush3.xpose.msk.msra.mxu0 %vm867_vm2, %v1879_v1  ;;  %6791 = vmatprep.mubr.msk.f32.mxu0 %vm7625_vm1, %v7624_v49 }
 0x397   : > { %6799 = vmatprep.subr.mxu0 %v7624_v49 }
 0x399   : > { %6792 = vmatmul.mubr.msk.f32.vlgmr.msra.gmra.mrb[16].mxu0 %vm867_vm2, %v1877_v2  ;;  %v2043_v4 = vpop.permute.xlu1 %2042 }
 0x39a   : > { %6800 = vmatpush3.xpose.msk.msra.mxu0 %vm867_vm2, %v2045_v3  ;;  %6801 = vmatprep.mubr.msk.f32.mxu0 %vm7625_vm1, %v7624_v49 }
 0x39d   : > { %6802 = vmatmul.mubr.msk.f32.vlgmr.msra.gmra.mrb[18].mxu0 %vm867_vm2, %v2043_v4 }
 0x454   : > { %v938_v5 = vpop.f32.mrb[4].mxu0 }
 0x455   : > { %v942_v6 = vmul.f32 0.35355338, %v938_v5  ;;  %v6733_v7 = vpop.f32.mrb[5].mxu0 }
 0x457   : > { %v943_v8 = vsel %vm867_vm2, %v942_v6, -inf }
 0x458   : > { %944 = vmax.xlane.f32.xlu0 %v943_v8  ;;  %v1104_v9 = vpop.f32.mrb[6].mxu0 }
 0x459   : > { %v1108_v10 = vmul.f32 0.35355338, %v1104_v9  ;;  %v6743_v11 = vpop.f32.mrb[7].mxu0 }
 0x45b   : > { %v1109_v12 = vsel %vm867_vm2, %v1108_v10, -inf }
 0x45c   : > { %1110 = vmax.xlane.f32.xlu1 %v1109_v12  ;;  %v1270_v15 = vpop.f32.mrb[8].mxu0 }
 0x45d   : > { %v7895_v16 = vmul.f32 0.35355338, %v1270_v15  ;;  %v6753_v17 = vpop.f32.mrb[9].mxu0 }
 0x45f   : > { %v1275_v18 = vsel %vm867_vm2, %v7895_v16, -inf }
 0x460   : > { %1276 = vmax.xlane.f32.xlu0 %v1275_v18  ;;  %v1436_v19 = vpop.f32.mrb[10].mxu0 }
 0x461   : > { %v1440_v20 = vmul.f32 0.35355338, %v1436_v19  ;;  %v6763_v21 = vpop.f32.mrb[11].mxu0 }
 0x463   : > { %v1441_v22 = vsel %vm867_vm2, %v1440_v20, -inf }
 0x464   : > { %1442 = vmax.xlane.f32.xlu0 %v1441_v22  ;;  %v1618_v23 = vpop.f32.mrb[12].mxu0 }
 0x465   : > { %v1622_v24 = vmul.f32 0.35355338, %v1618_v23  ;;  %v6773_v25 = vpop.f32.mrb[13].mxu0 }
 0x467   : > { %v1623_v26 = vsel %vm867_vm2, %v1622_v24, -inf }
 0x468   : > { %1624 = vmax.xlane.f32.xlu0 %v1623_v26  ;;  %v1784_v27 = vpop.f32.mrb[14].mxu0 }
 0x469   : > { %v1788_v28 = vmul.f32 0.35355338, %v1784_v27  ;;  %v6783_v29 = vpop.f32.mrb[15].mxu0 }
 0x46b   : > { %v1789_v30 = vsel %vm867_vm2, %v1788_v28, -inf }
 0x46c   : > { %1790 = vmax.xlane.f32.xlu1 %v1789_v30  ;;  %v1950_v31 = vpop.f32.mrb[16].mxu0 }
 0x46d   : > { %v1954_v32 = vmul.f32 0.35355338, %v1950_v31  ;;  %v6793_v33 = vpop.f32.mrb[17].mxu0 }
 0x46f   : > { %v1955_v34 = vsel %vm867_vm2, %v1954_v32, -inf }
 0x470   : > { %1956 = vmax.xlane.f32.xlu0 %v1955_v34  ;;  %v2116_v35 = vpop.f32.mrb[18].mxu0 }
 0x471   : > { %v6803_v36 = vpop.f32.mrb[19].mxu0  ;;  %v2120_v37 = vmul.f32 0.35355338, %v2116_v35 }
 0x473   : > { %v2121_v38 = vsel %vm867_vm2, %v2120_v37, -inf }
 0x47d   : > { %954 = vrot.lane.b32.xlu1 %v7822_v53, %s9011_s28 }
 0x4a1   : > { %2122 = vmax.xlane.f32.xlu1 %v2121_v38 }
 0x4b2   : > { %1286 = vrot.lane.b32.xlu1 %v7822_v53, %s9003_s4 }
 0x4b6   : > { %1452 = vrot.lane.b32.xlu1 %v7822_v53, %s9001_s29 }
 0x4ba   : > { %1634 = vrot.lane.b32.xlu1 %v7836_v54, %s9011_s28  ;;  %s9023_s28 = smov 16  }
 0x4e5   : > { %v945_v39 = vpop.xlane.xlu0 %944 }
 0x4e6   : > { %v946_v40 = vsub.f32 %v942_v6, %v945_v39 }
 0x4e8   : > { %v947_v41 = vmul.f32 1.442695, %v946_v40 }
 0x4e9   : > { %v1111_v42 = vpop.xlane.xlu1 %1110 }
 0x4ea   : > { %7456 = vpow2.f32 %v947_v41  ;;  %v1112_v43 = vsub.f32 %v1108_v10, %v1111_v42 }
 0x4ec   : > { %v1113_v44 = vmul.f32 1.442695, %v1112_v43 }
 0x4ed   : > { %v1277_v45 = vpop.xlane.xlu0 %1276 }
 0x4ee   : > { %7458 = vpow2.f32 %v1113_v44  ;;  %v1278_v60 = vsub.f32 %v7895_v16, %v1277_v45 }
 0x4f0   : > { %v1279_v62 = vmul.f32 1.442695, %v1278_v60 }
 0x4f1   : > { %v1443_v46 = vpop.xlane.xlu0 %1442 }
 0x4f2   : > { %v1444_v47 = vsub.f32 %v1440_v20, %v1443_v46 }
 0x4f4   : > { %v7457_v48 = vpop.eup %7456  ;;  %v1445_v50 = vmul.f32 1.442695, %v1444_v47 }
 0x4f5   : > { %v949_v51 = vsel %vm867_vm2, %v7457_v48, 0.0  ;;  %v1625_v61 = vpop.xlane.xlu0 %1624 }
 0x4f6   : > { %7460 = vpow2.f32 %v1445_v50  ;;  %950 = vadd.xlane.f32.xlu0 %v949_v51  ;;  %v1626_v63 = vsub.f32 %v1622_v24, %v1625_v61 }
 0x4f7   : > { %7462 = vpow2.f32 %v1279_v62  ;;  %v774_v62 = vld [vmem:[%s8983_s8 + $0x10] sm:$0xff] }
 0x4f8   : > { %v7913_v52 = vpop.eup %7458  ;;  %v1627_v1 = vmul.f32 1.442695, %v1626_v63  ;;  %v775_v63 = vld [vmem:[%s8983_s8 + $0x18] sm:$0xff] }
 0x4f9   : > { %v1791_v55 = vpop.xlane.xlu1 %1790  ;;  %v1115_v56 = vsel %vm867_vm2, %v7913_v52, 0.0 }
 0x4fa   : > { %1116 = vadd.xlane.f32.xlu1 %v1115_v56  ;;  %7464 = vpow2.f32 %v1627_v1  ;;  %v1792_v3 = vsub.f32 %v1788_v28, %v1791_v55  ;;  %v7181_v1 = vpack.c.bf16 %v775_v63, %v774_v62  ;;  %v2459_v62 = vld [vmem:[%s8989_s14 + $0x48] sm:$0xff] }
 0x4fc   : > { %v1793_v5 = vmul.f32 1.442695, %v1792_v3 }
 0x4fd   : > { %v955_v57 = vpop.permute.xlu1 %954  ;;  %v1957_v0 = vpop.xlane.xlu0 %1956 }
 0x4fe   : > { %6735 = vmatpush3.msra.mxu1 %v955_v57  ;;  %v1958_v2 = vsub.f32 %v1954_v32, %v1957_v0  ;;  %v772_v57 = vld [vmem:[%s8983_s8] sm:$0xff] }
 0x4ff   : > { %6744 = vmatprep.subr.mxu1 %v7624_v49 }
 0x500   : > { %v7918_v58 = vpop.eup %7460  ;;  %v1959_v4 = vmul.f32 1.442695, %v1958_v2 }
 0x501   : > { %v1447_v59 = vsel %vm867_vm2, %v7918_v58, 0.0  ;;  %v7463_v6 = vpop.eup %7462 }
 0x502   : > { %1448 = vadd.xlane.f32.xlu1 %v1447_v59  ;;  %7466 = vpow2.f32 %v1959_v4 }
 0x503   : > { %7468 = vpow2.f32 %v1793_v5 }
 0x504   : > { %v7928_v7 = vpop.eup %7464 }
 0x505   : > { %v1629_v9 = vsel %vm867_vm2, %v7928_v7, 0.0 }
 0x50c   : > { %1120 = vrot.lane.b32.xlu0 %v7822_v53, %s9007_s25  ;;  %v1281_v53 = vsel %vm867_vm2, %v7463_v6, 0.0  ;;  %v7932_v10 = vpop.eup %7466 }
 0x50d   : > { %v1961_v15 = vsel %vm867_vm2, %v7932_v10, 0.0  ;;  %v7936_v16 = vpop.eup %7468 }
 0x50e   : > { %v1795_v17 = vsel %vm867_vm2, %v7936_v16, 0.0 }
 0x513   : > { %1800 = vrot.lane.b32.xlu1 %v7836_v54, %s9007_s25  ;;  %s9048_s25 = smov 64  }
 0x52b   : > { %1282 = vadd.xlane.f32.xlu0 %v1281_v53 }
 0x52e   : > { %v2123_v8 = vpop.xlane.xlu1 %2122 }
 0x52f   : > { %v2124_v11 = vsub.f32 %v2120_v37, %v2123_v8  ;;  %1630 = vadd.xlane.f32.xlu0 %v1629_v9 }
 0x531   : > { %v2125_v12 = vmul.f32 1.442695, %v2124_v11 }
 0x532   : > { %v1287_v20 = vpop.permute.xlu1 %1286 }
 0x533   : > { %7470 = vpow2.f32 %v2125_v12  ;;  %1962 = vadd.xlane.f32.xlu0 %v1961_v15 }
 0x536   : > { %v1453_v21 = vpop.permute.xlu1 %1452 }
 0x537   : > { %1796 = vadd.xlane.f32.xlu1 %v1795_v17 }
 0x53a   : > { %v1635_v22 = vpop.permute.xlu1 %1634 }
 0x53d   : > { %v7940_v18 = vpop.eup %7470 }
 0x53e   : > { %v2127_v19 = vsel %vm867_vm2, %v7940_v18, 0.0 }
 0x53f   : > { %2128 = vadd.xlane.f32.xlu0 %v2127_v19 }
 0x548   : > { %2132 = vrot.lane.b32.xlu1 %v7836_v54, %s9001_s29  ;;  %s9025_s29 = smov 8  }
 0x555   : > { %1966 = vrot.lane.b32.xlu0 %v7836_v54, %s9003_s4  ;;  %s9043_s4 = smov 96  }
 0x583   : > { %v951_v23 = vpop.xlane.xlu0 %950 }
 0x584   : > { %7472 = vrcp.f32 %v951_v23 }
 0x587   : > { %v1117_v24 = vpop.xlane.xlu1 %1116  ;;  %v1121_v27 = vpop.permute.xlu0 %1120 }
 0x588   : > { %7474 = vrcp.f32 %v1117_v24  ;;  %v6296_v24 = vld [vmem:[%s8984_s9] ss:$0 sm:$0xff] }
 0x58e   : > { %v7473_v25 = vpop.eup %7472 }
 0x58f   : > { %v953_v26 = vmul.f32 %v7473_v25, %v7457_v48  ;;  %v1449_v29 = vpop.xlane.xlu1 %1448 }
 0x591   : > { %6737 = vmatmul.mubr.msk.f32.vlgmr.msra.gmra.mrb[0].mxu1 %vm867_vm2, %v953_v26 }
 0x592   : > { %v7475_v28 = vpop.eup %7474  ;;  %6745 = vmatpush3.msra.mxu1 %v1121_v27  ;;  %6746 = vmatprep.mubr.msk.f32.mxu1 %vm7625_vm1, %v7624_v49 }
 0x593   : > { %6754 = vmatprep.subr.mxu1 %v7624_v49  ;;  %v1119_v54 = vmul.f32 %v7475_v28, %v7913_v52  ;;  %v1801_v32 = vpop.permute.xlu1 %1800 }
 0x595   : > { %6747 = vmatmul.mubr.msk.f32.vlgmr.msra.gmra.mrb[2].mxu1 %vm867_vm2, %v1119_v54 }
 0x596   : > { %6755 = vmatpush3.msra.mxu1 %v1287_v20  ;;  %6756 = vmatprep.mubr.msk.f32.mxu1 %vm7625_vm1, %v7624_v49 }
 0x597   : > { %6764 = vmatprep.subr.mxu1 %v7624_v49 }
 0x5b8   : > { %v1283_v30 = vpop.xlane.xlu0 %1282 }
 0x5b9   : > { %7476 = vrcp.f32 %v1283_v30 }
 0x5ba   : > { %7478 = vrcp.f32 %v1449_v29 }
 0x5bc   : > { %v1631_v31 = vpop.xlane.xlu0 %1630 }
 0x5bd   : > { %7480 = vrcp.f32 %v1631_v31 }
 0x5c0   : > { %v1963_v34 = vpop.xlane.xlu0 %1962 }
 0x5c3   : > { %v7477_v33 = vpop.eup %7476 }
 0x5c4   : > { %v1797_v35 = vpop.xlane.xlu1 %1796  ;;  %v1285_v36 = vmul.f32 %v7477_v33, %v7463_v6  ;;  %v7479_v37 = vpop.eup %7478 }
 0x5c5   : > { %7482 = vrcp.f32 %v1797_v35  ;;  %v1451_v38 = vmul.f32 %v7479_v37, %v7918_v58  ;;  %v773_v58 = vld [vmem:[%s8983_s8 + $0x8] sm:$0xff] }
 0x5c6   : > { %6757 = vmatmul.mubr.msk.f32.vlgmr.msra.gmra.mrb[4].mxu1 %vm867_vm2, %v1285_v36  ;;  %7484 = vrcp.f32 %v1963_v34  ;;  %v7177_v60 = vpack.c.bf16 %v773_v58, %v772_v57  ;;  %v2456_v58 = vld [vmem:[%s8989_s14 + $0x30] sm:$0xff] }
 0x5c7   : > { %6765 = vmatpush3.msra.mxu1 %v1453_v21  ;;  %6766 = vmatprep.mubr.msk.f32.mxu1 %vm7625_vm1, %v7624_v49  ;;  %v7481_v39 = vpop.eup %7480 }
 0x5c8   : > { %6774 = vmatprep.subr.mxu1 %v7624_v49  ;;  %v1633_v41 = vmul.f32 %v7481_v39, %v7928_v7  ;;  %v2133_v47 = vpop.permute.xlu1 %2132  ;;  %7178 = vmatprep.subr.bf16.mxu0 %v7177_v60 }
 0x5c9   : > { %7180 = vmatpush3.bf16.msra.mxu0 %v7177_v60 }
 0x5ca   : > { %6767 = vmatmul.mubr.msk.f32.vlgmr.msra.gmra.mrb[6].mxu1 %vm867_vm2, %v1451_v38  ;;  %7182 = vmatprep.subr.bf16.mxu0 %v7181_v1 }
 0x5cb   : > { %6775 = vmatpush3.msra.mxu1 %v1635_v22  ;;  %6776 = vmatprep.mubr.msk.f32.mxu1 %vm7625_vm1, %v7624_v49 }
 0x5cc   : > { %v2129_v40 = vpop.xlane.xlu0 %2128  ;;  %6784 = vmatprep.subr.mxu1 %v7624_v49 }
 0x5cd   : > { %7486 = vrcp.f32 %v2129_v40  ;;  %7184 = vmatpush3.bf16.msra.mxu0 %v7181_v1  ;;  %v2356_v40 = vld [vmem:[%s8987_s12] sm:$0xff]  ;;  %v2461_v1 = vld [vmem:[%s8989_s14 + $0x58] sm:$0xff] }
 0x5ce   : > { %6777 = vmatmul.mubr.msk.f32.vlgmr.msra.gmra.mrb[8].mxu1 %vm867_vm2, %v1633_v41  ;;  %v2357_v41 = vld [vmem:[%s8987_s12 + $0x8] sm:$0xff] }
 0x5cf   : > { %v7483_v42 = vpop.eup %7482  ;;  %6785 = vmatpush3.msra.mxu1 %v1801_v32  ;;  %6786 = vmatprep.mubr.msk.f32.mxu1 %vm7625_vm1, %v7624_v49 }
 0x5d0   : > { %v1967_v43 = vpop.permute.xlu0 %1966  ;;  %6794 = vmatprep.subr.mxu1 %v7624_v49  ;;  %v1799_v44 = vmul.f32 %v7483_v42, %v7936_v16  ;;  %v7485_v45 = vpop.eup %7484  ;;  %v2358_v42 = vld [vmem:[%s8987_s12 + $0x10] sm:$0xff] }
 0x5d1   : > { %v1965_v46 = vmul.f32 %v7485_v45, %v7932_v10 }
 0x5d2   : > { %6787 = vmatmul.mubr.msk.f32.vlgmr.msra.gmra.mrb[10].mxu1 %vm867_vm2, %v1799_v44  ;;  %v2359_v44 = vld [vmem:[%s8987_s12 + $0x18] sm:$0xff] }
 0x5d3   : > { %6795 = vmatpush3.msra.mxu1 %v1967_v43  ;;  %6796 = vmatprep.mubr.msk.f32.mxu1 %vm7625_vm1, %v7624_v49  ;;  %v7185_v43 = vpack.c.bf16 %v2357_v41, %v2356_v40  ;;  %v7189_v45 = vpack.c.bf16 %v2359_v44, %v2358_v42 }
 0x5d4   : > { %6804 = vmatprep.subr.mxu1 %v7624_v49 }
 0x5d6   : > { %6797 = vmatmul.mubr.msk.f32.vlgmr.msra.gmra.mrb[12].mxu1 %vm867_vm2, %v1965_v46  ;;  %v2450_v46 = vld [vmem:[%s8989_s14] sm:$0xff] }
 0x5d7   : > { %v7487_v48 = vpop.eup %7486  ;;  %6805 = vmatpush3.msra.mxu1 %v2133_v47  ;;  %6806 = vmatprep.mubr.msk.f32.mxu1 %vm7625_vm1, %v7624_v49  ;;  %v2451_v47 = vld [vmem:[%s8989_s14 + $0x8] sm:$0xff] }
 0x5d8   : > { %v2131_v50 = vmul.f32 %v7487_v48, %v7940_v18  ;;  %7186 = vmatprep.subr.bf16.mxu1 %v7185_v43  ;;  %v2452_v48 = vld [vmem:[%s8989_s14 + $0x10] sm:$0xff] }
 0x5da   : > { %6807 = vmatmul.mubr.msk.f32.vlgmr.msra.gmra.mrb[14].mxu1 %vm867_vm2, %v2131_v50  ;;  %v7193_v50 = vpack.c.bf16 %v2451_v47, %v2450_v46 }
 0x5db   : > { %7188 = vmatpush3.bf16.msra.mxu1 %v7185_v43 }
 0x5dc   : > { %7190 = vmatprep.subr.bf16.mxu1 %v7189_v45  ;;  %7194 = vmatprep.subr.bf16.mxu0 %v7193_v50 }
 0x5df   : > { %7192 = vmatpush3.bf16.msra.mxu1 %v7189_v45 }
 0x664   : > { %v1026_v51 = vpop.f32.mrb[0].mxu1 }
 0x665   : > { %v6738_v52 = vpop.f32.mrb[1].mxu1 }
 0x668   : > { %v1192_v55 = vpop.f32.mrb[2].mxu1 }
 0x669   : > { %1529 = vrot.lane.b32.xlu0 %v1192_v55, %s9025_s29  ;;  %v6748_v56 = vpop.f32.mrb[3].mxu1  ;;  %v2454_v55 = vld [vmem:[%s8989_s14 + $0x20] sm:$0xff] }
 0x66a   : > { %v2455_v56 = vld [vmem:[%s8989_s14 + $0x28] sm:$0xff] }
 0x66b   : > { %v7201_v57 = vpack.c.bf16 %v2455_v56, %v2454_v55  ;;  %v6312_v56 = vld [vmem:[%s8981_s6 + $0x38] sm:$0xff] }
 0x699   : > { %v1358_v59 = vpop.f32.mrb[4].mxu1 }
 0x69a   : > { %1533 = vrot.lane.b32.xlu1 %v1358_v59, %s9023_s28  ;;  %v6758_v61 = vpop.f32.mrb[5].mxu1  ;;  %v2457_v59 = vld [vmem:[%s8989_s14 + $0x38] sm:$0xff] }
 0x69b   : > { %v7205_v60 = vpack.c.bf16 %v2457_v59, %v2456_v58  ;;  %v2458_v61 = vld [vmem:[%s8989_s14 + $0x40] sm:$0xff] }
 0x69c   : > { %v7209_v63 = vpack.c.bf16 %v2459_v62, %v2458_v61 }
 0x69d   : > { %v1524_v0 = vpop.f32.mrb[6].mxu1 }
 0x69e   : > { %1537 = vrot.lane.b32.xlu1 %v1524_v0, %s9021_s30  ;;  %v6768_v2 = vpop.f32.mrb[7].mxu1  ;;  %v2460_v0 = vld [vmem:[%s8989_s14 + $0x50] sm:$0xff] }
 0x69f   : > { %v7213_v2 = vpack.c.bf16 %v2461_v1, %v2460_v0  ;;  %v6307_v1 = vld [vmem:[%s9042_s26 + $0x1] ss:$0 sm:$0xff] }
 0x6a1   : > { %v1706_v3 = vpop.f32.mrb[8].mxu1 }
 0x6a2   : > { %v6778_v4 = vpop.f32.mrb[9].mxu1 }
 0x6a3   : > { %v2463_v4 = vld [vmem:[%s8989_s14 + $0x68] sm:$0xff] }
 0x6a5   : > { %v1872_v5 = vpop.f32.mrb[10].mxu1 }
 0x6a6   : > { %2209 = vrot.lane.b32.xlu0 %v1872_v5, %s9025_s29  ;;  %v6788_v6 = vpop.f32.mrb[11].mxu1  ;;  %s9046_s29 = smov 104  }
 0x6a9   : > { %v2038_v53 = vpop.f32.mrb[12].mxu1 }
 0x6aa   : > { %2213 = vrot.lane.b32.xlu0 %v2038_v53, %s9023_s28  ;;  %v6798_v7 = vpop.f32.mrb[13].mxu1  ;;  %s9045_s28 = smov 112  }
 0x6ad   : > { %v2204_v8 = vpop.f32.mrb[14].mxu1 }
 0x6ae   : > { %2217 = vrot.lane.b32.xlu1 %v2204_v8, %s9021_s30  ;;  %v6808_v9 = vpop.f32.mrb[15].mxu1  ;;  %s9050_s30 = smov 56  }
 0x6db   : > { %v1530_v10 = vpop.permute.xlu0 %1529 }
 0x6dc   : > { %v1540_v12 = vsel %vm867_vm2, %v1026_v51, %v1530_v10  ;;  %v2453_v51 = vld [vmem:[%s8989_s14 + $0x18] sm:$0xff] }
 0x6dd   : > { %v7197_v52 = vpack.c.bf16 %v2453_v51, %v2452_v48  ;;  %v6310_v51 = vld [vmem:[%s8981_s6 + $0x28] sm:$0xff] }
 0x70c   : > { %v1534_v11 = vpop.permute.xlu1 %1533 }
 0x70d   : > { %v1542_v15 = vsel %vm1541_vm3, %v1540_v12, %v1534_v11  ;;  %v6299_v12 = vld [vmem:[%s8985_s10] ss:$0 sm:$0xff] }
 0x710   : > { %v1538_v16 = vpop.permute.xlu1 %1537 }
 0x711   : > { %v1544_v17 = vsel %vm1543_vm4, %v1542_v15, %v1538_v16  ;;  %v6300_v16 = vld [vmem:[%s8986_s11] ss:$0 sm:$0xff] }
 0x712   : > { %6817 = vmatprep.mubr.msk.f32.mxu0 %vm638_vm0, %v1544_v17 }
 0x718   : > { %v2210_v18 = vpop.permute.xlu0 %2209 }
 0x719   : > { %v2220_v20 = vsel %vm867_vm2, %v1706_v3, %v2210_v18  ;;  %v2462_v3 = vld [vmem:[%s8989_s14 + $0x60] sm:$0xff] }
 0x71a   : > { %v7217_v5 = vpack.c.bf16 %v2463_v4, %v2462_v3 }
 0x71c   : > { %v2214_v19 = vpop.permute.xlu0 %2213 }
 0x71d   : > { %v2221_v21 = vsel %vm1541_vm3, %v2220_v20, %v2214_v19 }
 0x720   : > { %v2218_v22 = vpop.permute.xlu1 %2217 }
 0x721   : > { %v2222_v23 = vsel %vm1543_vm4, %v2221_v21, %v2218_v22 }
 0x722   : > { %6818 = vmatmul.mubr.msk.f32.vlgmr.msra.gmra.mrb[20].mxu0 %vm638_vm0, %v2222_v23  ;;  %v2464_v23 = vld [vmem:[%s8989_s14 + $0x70] sm:$0xff] }
 0x723   : > { %7196 = vmatpush3.bf16.msra.mxu0 %v7193_v50  ;;  %v6309_v50 = vld [vmem:[%s8981_s6 + $0x20] sm:$0xff] }
 0x724   : > { %7198 = vmatprep.subr.bf16.mxu0 %v7197_v52  ;;  %v7225_v55 = vpack.c.bf16 %v6310_v51, %v6309_v50  ;;  %v2717_v50 = vlaneseq }
 0x726   : > { %7226 = vmatprep.subr.bf16.mxu1 %v7225_v55  ;;  %v2718_v51 = vshrl.u32 %v2717_v50, 7 }
 0x727   : > { %7200 = vmatpush3.bf16.msra.mxu0 %v7197_v52  ;;  %v6311_v52 = vld [vmem:[%s8981_s6 + $0x30] sm:$0xff] }
 0x728   : > { %7202 = vmatprep.subr.bf16.mxu0 %v7201_v57 }
 0x72b   : > { %7204 = vmatpush3.bf16.msra.mxu0 %v7201_v57  ;;  %v7229_v57 = vpack.c.bf16 %v6312_v56, %v6311_v52  ;;  %v626_v56 = vld [vmem:[%s9047_s24] sm:$0x3]  ;;  %s9052_s24 = smov 80  }
 0x72c   : > { %7206 = vmatprep.subr.bf16.mxu0 %v7205_v60 }
 0x72f   : > { %7208 = vmatpush3.bf16.msra.mxu0 %v7205_v60 }
 0x730   : > { %7210 = vmatprep.subr.bf16.mxu0 %v7209_v63 }
 0x733   : > { %7212 = vmatpush3.bf16.msra.mxu0 %v7209_v63 }
 0x734   : > { %7214 = vmatprep.subr.bf16.mxu0 %v7213_v2 }
 0x737   : > { %7216 = vmatpush3.bf16.msra.mxu0 %v7213_v2 }
 0x738   : > { %7218 = vmatprep.subr.bf16.mxu0 %v7217_v5 }
 0x73b   : > { %7220 = vmatpush3.bf16.msra.mxu0 %v7217_v5  ;;  %v6308_v5 = vld [vmem:[%s8980_s5 + $0x1] ss:$0 sm:$0xff] }
 0x7f5   : > { %v6819_v25 = vpop.f32.mrb[20].mxu0 }
 0x7f6   : > { %v2307_v26 = vadd.f32 %v6819_v25, %v6296_v24  ;;  %v2301_v27 = vpop.f32.mrb[21].mxu0 }
 0x7f7   : > { %v2302_v28 = vadd.f32 %v6296_v24, %v2301_v27  ;;  %v2465_v24 = vld [vmem:[%s8989_s14 + $0x78] sm:$0xff] }
 0x7f8   : > { %v8012_v54 = vadd.f32 %v2307_v26, %v7783_v14  ;;  %v7221_v25 = vpack.c.bf16 %v2465_v24, %v2464_v23  ;;  %v6301_v26 = vld [vmem:[%s8988_s13] ss:$0 sm:$0xff] }
 0x7f9   : > { %v8015_v29 = vadd.f32 %v2302_v28, %v7781_v13 }
 0x7fa   : > { %v2317_v30 = vsel %vm638_vm0, %v8012_v54, 0.0  ;;  %7222 = vmatprep.subr.bf16.mxu0 %v7221_v25 }
 0x7fb   : > { %2318 = vadd.xlane.f32.xlu1 %v2317_v30  ;;  %v2314_v31 = vsel %vm638_vm0, %v8015_v29, 0.0  ;;  %7224 = vmatpush3.bf16.msra.mxu0 %v7221_v25 }
 0x7fc   : > { %2315 = vadd.xlane.f32.xlu0 %v2314_v31 }
 0x888   : > { %v2319_v32 = vpop.xlane.xlu1 %2318 }
 0x889   : > { %v2321_v33 = vmul.f32 0.03125, %v2319_v32  ;;  %v2316_v34 = vpop.xlane.xlu0 %2315 }
 0x88a   : > { %v2320_v35 = vmul.f32 0.03125, %v2316_v34  ;;  %v6304_v34 = vld [vmem:[%s8990_s15] ss:$0 sm:$0xff] }
 0x88b   : > { %v8022_v36 = vsub.f32 %v8012_v54, %v2321_v33 }
 0x88c   : > { %v2322_v14 = vsub.f32 %v8015_v29, %v2320_v35 }
 0x88d   : > { %v2325_v38 = vmul.f32 %v8022_v36, %v8022_v36 }
 0x88e   : > { %v2324_v37 = vmul.f32 %v2322_v14, %v2322_v14 }
 0x88f   : > { %v2329_v39 = vsel %vm638_vm0, %v2325_v38, 0.0 }
 0x890   : > { %v2326_v13 = vsel %vm638_vm0, %v2324_v37, 0.0 }
 0x891   : > { %2327 = vadd.xlane.f32.xlu0 %v2326_v13 }
 0x895   : > { %2330 = vadd.xlane.f32.xlu0 %v2329_v39 }
 0x91e   : > { %v2328_v6 = vpop.xlane.xlu0 %2327 }
 0x91f   : > { %v2332_v53 = vmul.f32 0.03125, %v2328_v6 }
 0x921   : > { %v2334_v7 = vadd.f32 1e-05, %v2332_v53 }
 0x922   : > { %v2331_v8 = vpop.xlane.xlu0 %2330 }
 0x923   : > { %7488 = vrsqrt.f32 %v2334_v7  ;;  %v2333_v9 = vmul.f32 0.03125, %v2331_v8 }
 0x925   : > { %v2335_v10 = vadd.f32 1e-05, %v2333_v9  ;;  %v6319_v9 = vld [vmem:[%s8982_s7 + $0x1] ss:$0 sm:$0xff] }
 0x927   : > { %7490 = vrsqrt.f32 %v2335_v10 }
 0x92d   : > { %v7489_v11 = vpop.eup %7488 }
 0x92e   : > { %v2338_v15 = vmul.f32 %v7489_v11, %v2322_v14 }
 0x930   : > { %v2346_v17 = vmul.f32 %v6299_v12, %v2338_v15 }
 0x931   : > { %v7491_v18 = vpop.eup %7490 }
 0x932   : > { %v2339_v19 = vmul.f32 %v7491_v18, %v8022_v36  ;;  %v2354_v20 = vadd.f32 %v6300_v16, %v2346_v17 }
 0x934   : > { %v2347_v21 = vmul.f32 %v6299_v12, %v2339_v19  ;;  %6828 = vmatprep.mubr.msk.f32.mxu1 %vm638_vm0, %v2354_v20 }
 0x936   : > { %v2355_v22 = vadd.f32 %v6300_v16, %v2347_v21 }
 0x938   : > { %6829 = vmatmul.mubr.msk.f32.vlgmr.msra.gmra.mrb[16].mxu1 %vm638_vm0, %v2355_v22 }
 0x939   : > { %7228 = vmatpush3.bf16.msra.mxu1 %v7225_v55  ;;  %v2719_v55 = vsub.s32 0, %v2718_v51 }
 0x93a   : > { %7230 = vmatprep.subr.bf16.mxu1 %v7229_v57 }
 0x93d   : > { %7232 = vmatpush3.bf16.msra.mxu1 %v7229_v57 }
 0xa0b   : > { %v6830_v27 = vpop.f32.mrb[16].mxu1 }
 0xa0c   : > { %v2445_v28 = vadd.f32 %v6830_v27, %v6301_v26  ;;  %v2439_v30 = vpop.f32.mrb[17].mxu1 }
 0xa0d   : > { %v2440_v31 = vadd.f32 %v6301_v26, %v2439_v30 }
 0xa0e   : > { %v2449_v33 = vmax.f32 %v2445_v28, 0.0 }
 0xa0f   : > { %v2448_v32 = vmax.f32 %v2440_v31, 0.0 }
 0xa11   : > { %6863 = vmatprep.mubr.f32.mxu0 %v2448_v32 }
 0xa12   : > { %6864 = vmatmul.mubr.f32.vlgmr.msra.gmra.mrb[22].mxu0 %v2449_v33 }
 0xae5   : > { %v6865_v35 = vpop.f32.mrb[22].mxu0 }
 0xae6   : > { %v2545_v36 = vadd.f32 %v6865_v35, %v6304_v34  ;;  %v2539_v14 = vpop.f32.mrb[23].mxu0 }
 0xae7   : > { %v2540_v37 = vadd.f32 %v6304_v34, %v2539_v14 }
 0xae8   : > { %v8105_v13 = vadd.f32 %v2545_v36, %v8012_v54 }
 0xae9   : > { %v8108_v38 = vadd.f32 %v2540_v37, %v8015_v29 }
 0xaea   : > { %v2557_v39 = vsel %vm638_vm0, %v8105_v13, 0.0 }
 0xaeb   : > { %2558 = vadd.xlane.f32.xlu1 %v2557_v39  ;;  %v2554_v40 = vsel %vm638_vm0, %v8108_v38, 0.0 }
 0xaec   : > { %2555 = vadd.xlane.f32.xlu0 %v2554_v40 }
 0xb78   : > { %v2559_v41 = vpop.xlane.xlu1 %2558 }
 0xb79   : > { %v2561_v42 = vmul.f32 0.03125, %v2559_v41  ;;  %v2556_v43 = vpop.xlane.xlu0 %2555 }
 0xb7a   : > { %v2560_v44 = vmul.f32 0.03125, %v2556_v43 }
 0xb7b   : > { %v2563_v45 = vsub.f32 %v8105_v13, %v2561_v42 }
 0xb7c   : > { %v2562_v54 = vsub.f32 %v8108_v38, %v2560_v44 }
 0xb7d   : > { %v2565_v46 = vmul.f32 %v2563_v45, %v2563_v45 }
 0xb7e   : > { %v2564_v47 = vmul.f32 %v2562_v54, %v2562_v54 }
 0xb7f   : > { %v2569_v29 = vsel %vm638_vm0, %v2565_v46, 0.0 }
 0xb80   : > { %2570 = vadd.xlane.f32.xlu1 %v2569_v29  ;;  %v2566_v48 = vsel %vm638_vm0, %v2564_v47, 0.0 }
 0xb81   : > { %2567 = vadd.xlane.f32.xlu0 %v2566_v48 }
 0xc0d   : > { %v2571_v58 = vpop.xlane.xlu1 %2570 }
 0xc0e   : > { %v2573_v59 = vmul.f32 0.03125, %v2571_v58  ;;  %v2568_v60 = vpop.xlane.xlu0 %2567  ;;  %v8184_v58 = vrot.slane %v626_v56, %v2719_v55 }
 0xc0f   : > { %v2572_v61 = vmul.f32 0.03125, %v2568_v60 }
 0xc10   : > { %v2575_v62 = vadd.f32 1e-05, %v2573_v59  ;;  %v2759_v59 = vsub.s32 1, %v2718_v51 }
 0xc11   : > { %v2574_v63 = vadd.f32 1e-05, %v2572_v61 }
 0xc12   : > { %7492 = vrsqrt.f32 %v2575_v62 }
 0xc13   : > { %7494 = vrsqrt.f32 %v2574_v63 }
 0xc1c   : > { %v7493_v0 = vpop.eup %7492 }
 0xc1d   : > { %v7495_v2 = vpop.eup %7494  ;;  %v2579_v3 = vmul.f32 %v7493_v0, %v2563_v45 }
 0xc1e   : > { %v2578_v4 = vmul.f32 %v7495_v2, %v2562_v54  ;;  %v8188_v2 = vrot.slane %v626_v56, %v2759_v59 }
 0xc1f   : > { %v2587_v6 = vmul.f32 %v6307_v1, %v2579_v3 }
 0xc20   : > { %v2586_v53 = vmul.f32 %v6307_v1, %v2578_v4 }
 0xc21   : > { %v2595_v8 = vadd.f32 %v6308_v5, %v2587_v6 }
 0xc22   : > { %v2594_v7 = vadd.f32 %v6308_v5, %v2586_v53 }
 0xc24   : > { %6874 = vmatprep.mubr.msk.f32.mxu1 %vm638_vm0, %v2594_v7 }
 0xc25   : > { %6875 = vmatmul.mubr.msk.f32.vlgmr.msra.gmra.mrb[18].mxu1 %vm638_vm0, %v2595_v8 }
 0xcf8   : > { %v6876_v10 = vpop.f32.mrb[18].mxu1 }
 0xcf9   : > { %v8141_v11 = vadd.f32 %v6876_v10, %v6319_v9  ;;  %v2688_v12 = vpop.f32.mrb[19].mxu1 }
 0xcfa   : > { %v8143_v15 = vadd.f32 %v6319_v9, %v2688_v12 }
 0xcfb   : > { %2707 = vrot.lane.b32.xlu1 %v8141_v11, %s9043_s4 }
 0xcfc   : > { %2698 = vrot.lane.b32.xlu0 %v8143_v15, %s9043_s4 }
 0xd6d   : > { %v2708_v16 = vpop.permute.xlu1 %2707 }
 0xd6e   : > { %v2710_v17 = vmul.f32 %v2708_v16, %v8143_v15  ;;  %v2699_v18 = vpop.permute.xlu0 %2698  ;;  %v2751_v20 = vmul.f32 %v2708_v16, %v8141_v11 }
 0xd6f   : > { %v2746_v19 = vmul.f32 %v2699_v18, %v8141_v11  ;;  %v2701_v21 = vmul.f32 %v2699_v18, %v8143_v15 }
 0xd70   : > { %2794 = vrot.lane.b32.xlu1 %v2710_v17, %s9044_s21  ;;  %v2711_v24 = vsel %vm867_vm2, %v2710_v17, 0.0  ;;  %v2752_v25 = vsel %vm867_vm2, %v2751_v20, 0.0 }
 0xd71   : > { %2827 = vrot.lane.b32.xlu0 %v2746_v19, %s9044_s21  ;;  %v2702_v22 = vsel %vm867_vm2, %v2701_v21, 0.0  ;;  %v2747_v23 = vsel %vm867_vm2, %v2746_v19, 0.0 }
 0xd74   : > { %2835 = vrot.lane.b32.xlu1 %v2751_v20, %s9044_s21 }
 0xd75   : > { %2867 = vrot.lane.b32.xlu0 %v2701_v21, %s9045_s28 }
 0xd78   : > { %2874 = vrot.lane.b32.xlu1 %v2710_v17, %s9045_s28 }
 0xd79   : > { %2906 = vrot.lane.b32.xlu0 %v2746_v19, %s9045_s28 }
 0xd7c   : > { %2913 = vrot.lane.b32.xlu1 %v2751_v20, %s9045_s28 }
 0xd7d   : > { %2945 = vrot.lane.b32.xlu0 %v2701_v21, %s9046_s29 }
 0xd80   : > { %2952 = vrot.lane.b32.xlu1 %v2710_v17, %s9046_s29 }
 0xd81   : > { %2984 = vrot.lane.b32.xlu0 %v2746_v19, %s9046_s29 }
 0xd84   : > { %2786 = vrot.lane.b32.xlu1 %v2701_v21, %s9044_s21 }
 0xd88   : > { %2991 = vrot.lane.b32.xlu1 %v2751_v20, %s9046_s29 }
 0xda0   : > { %2703 = vadd.xlane.f32.xlu0 %v2702_v22 }
 0xda4   : > { %2748 = vadd.xlane.f32.xlu0 %v2747_v23 }
 0xdac   : > { %2712 = vadd.xlane.f32.xlu1 %v2711_v24 }
 0xdb0   : > { %2753 = vadd.xlane.f32.xlu1 %v2752_v25 }
 0xde2   : > { %v2795_v26 = vpop.permute.xlu1 %2794 }
 0xde3   : > { %v2797_v27 = vsel %vm867_vm2, %v2795_v26, 0.0  ;;  %v2828_v35 = vpop.permute.xlu0 %2827 }
 0xde4   : > { %2798 = vadd.xlane.f32.xlu0 %v2797_v27  ;;  %v2830_v42 = vsel %vm867_vm2, %v2828_v35, 0.0 }
 0xde6   : > { %v2836_v28 = vpop.permute.xlu1 %2835 }
 0xde7   : > { %v2838_v30 = vsel %vm867_vm2, %v2836_v28, 0.0  ;;  %v2868_v37 = vpop.permute.xlu0 %2867 }
 0xde8   : > { %2839 = vadd.xlane.f32.xlu1 %v2838_v30  ;;  %v2870_v45 = vsel %vm867_vm2, %v2868_v37, 0.0 }
 0xdea   : > { %v2875_v31 = vpop.permute.xlu1 %2874 }
 0xdeb   : > { %v2877_v32 = vsel %vm867_vm2, %v2875_v31, 0.0  ;;  %v2907_v44 = vpop.permute.xlu0 %2906 }
 0xdec   : > { %2878 = vadd.xlane.f32.xlu1 %v2877_v32  ;;  %v2909_v46 = vsel %vm867_vm2, %v2907_v44, 0.0 }
 0xdee   : > { %v2914_v33 = vpop.permute.xlu1 %2913 }
 0xdef   : > { %v2916_v34 = vsel %vm867_vm2, %v2914_v33, 0.0  ;;  %v2946_v54 = vpop.permute.xlu0 %2945 }
 0xdf0   : > { %2917 = vadd.xlane.f32.xlu1 %v2916_v34  ;;  %v2948_v47 = vsel %vm867_vm2, %v2946_v54, 0.0 }
 0xdf2   : > { %v2953_v36 = vpop.permute.xlu1 %2952 }
 0xdf3   : > { %v2955_v14 = vsel %vm867_vm2, %v2953_v36, 0.0  ;;  %v2985_v29 = vpop.permute.xlu0 %2984 }
 0xdf4   : > { %2956 = vadd.xlane.f32.xlu1 %v2955_v14  ;;  %v2987_v48 = vsel %vm867_vm2, %v2985_v29, 0.0 }
 0xdf6   : > { %v2787_v39 = vpop.permute.xlu1 %2786 }
 0xdf7   : > { %v2789_v40 = vsel %vm867_vm2, %v2787_v39, 0.0 }
 0xdf8   : > { %2790 = vadd.xlane.f32.xlu0 %v2789_v40 }
 0xdfa   : > { %v2992_v41 = vpop.permute.xlu1 %2991 }
 0xdfb   : > { %v2994_v43 = vsel %vm867_vm2, %v2992_v41, 0.0 }
 0xdfc   : > { %2831 = vadd.xlane.f32.xlu0 %v2830_v42  ;;  %2995 = vadd.xlane.f32.xlu1 %v2994_v43 }
 0xe00   : > { %2871 = vadd.xlane.f32.xlu0 %v2870_v45 }
 0xe04   : > { %2910 = vadd.xlane.f32.xlu0 %v2909_v46 }
 0xe08   : > { %2949 = vadd.xlane.f32.xlu0 %v2948_v47 }
 0xe0c   : > { %2988 = vadd.xlane.f32.xlu0 %v2987_v48 }
 0xe2d   : > { %v2704_v52 = vpop.xlane.xlu0 %2703 }
 0xe2e   : > { %v2705_v60 = vmul.f32 0.35355338, %v2704_v52 }
 0xe31   : > { %v2749_v62 = vpop.xlane.xlu0 %2748 }
 0xe32   : > { %v2750_v3 = vmul.f32 0.35355338, %v2749_v62 }
 0xe39   : > { %v2713_v57 = vpop.xlane.xlu1 %2712 }
 0xe3a   : > { %v2714_v61 = vmul.f32 0.35355338, %v2713_v57 }
 0xe3c   : > { %v2716_v63 = vsel %vm2715_vm5, %v2705_v60, %v2714_v61 }
 0xe3d   : > { %v2754_v0 = vpop.xlane.xlu1 %2753  ;;  %v2721_v1 = vadd.f32 %v8184_v58, %v2716_v63 }
 0xe3e   : > { %v2755_v4 = vmul.f32 0.35355338, %v2754_v0 }
 0xe3f   : > { %v2723_v5 = vsel %vm2722_vm6, %v2721_v1, -inf }
 0xe40   : > { %2724 = vmax.xlane.f32.xlu0 %v2723_v5  ;;  %v2756_v6 = vsel %vm2715_vm5, %v2750_v3, %v2755_v4  ;;  %v7640_v5 = vmov 1  }
 0xe41   : > { %v2761_v53 = vadd.f32 %v8188_v2, %v2756_v6  ;;  %7428 = vset.pattern.permute.xlu1 %v7640_v5  ;;  %v7641_v6 = vmov 0  }
 0xe42   : > { %7427 = vset.pattern.permute.xlu0 %v7641_v6 }
 0xe43   : > { %v2762_v7 = vsel %vm2722_vm6, %v2761_v53, -inf }
 0xe44   : > { %2763 = vmax.xlane.f32.xlu0 %v2762_v7 }
 0xe71   : > { %v2799_v8 = vpop.xlane.xlu0 %2798 }
 0xe72   : > { %v2800_v12 = vmul.f32 0.35355338, %v2799_v8 }
 0xe75   : > { %v2840_v9 = vpop.xlane.xlu1 %2839 }
 0xe76   : > { %v2841_v21 = vmul.f32 0.35355338, %v2840_v9 }
 0xe79   : > { %v2879_v17 = vpop.xlane.xlu1 %2878 }
 0xe7a   : > { %v2880_v28 = vmul.f32 0.35355338, %v2879_v17 }
 0xe7d   : > { %v2918_v25 = vpop.xlane.xlu1 %2917 }
 0xe7e   : > { %v2919_v35 = vmul.f32 0.35355338, %v2918_v25 }
 0xe81   : > { %v2957_v14 = vpop.xlane.xlu1 %2956 }
 0xe82   : > { %v2958_v42 = vmul.f32 0.35355338, %v2957_v14 }
 0xe85   : > { %v2791_v10 = vpop.xlane.xlu0 %2790 }
 0xe86   : > { %v2792_v16 = vmul.f32 0.35355338, %v2791_v10 }
 0xe88   : > { %v2801_v18 = vsel %vm2715_vm5, %v2792_v16, %v2800_v12 }
 0xe89   : > { %v2832_v19 = vpop.xlane.xlu0 %2831  ;;  %v2802_v20 = vadd.f32 %v2801_v18, %v8184_v58  ;;  %v2996_v44 = vpop.xlane.xlu1 %2995 }
 0xe8a   : > { %v2833_v22 = vmul.f32 0.35355338, %v2832_v19  ;;  %v2997_v29 = vmul.f32 0.35355338, %v2996_v44 }
 0xe8b   : > { %v2803_v23 = vsel %vm2722_vm6, %v2802_v20, -inf }
 0xe8c   : > { %2804 = vmax.xlane.f32.xlu1 %v2803_v23  ;;  %v2842_v24 = vsel %vm2715_vm5, %v2833_v22, %v2841_v21 }
 0xe8d   : > { %v2872_v26 = vpop.xlane.xlu0 %2871  ;;  %v2843_v27 = vadd.f32 %v2842_v24, %v8188_v2 }
 0xe8e   : > { %v2873_v30 = vmul.f32 0.35355338, %v2872_v26 }
 0xe8f   : > { %v2844_v31 = vsel %vm2722_vm6, %v2843_v27, -inf }
 0xe90   : > { %2845 = vmax.xlane.f32.xlu1 %v2844_v31  ;;  %v2881_v32 = vsel %vm2715_vm5, %v2873_v30, %v2880_v28 }
 0xe91   : > { %v2911_v33 = vpop.xlane.xlu0 %2910  ;;  %v2882_v34 = vadd.f32 %v2881_v32, %v8184_v58 }
 0xe92   : > { %v2912_v36 = vmul.f32 0.35355338, %v2911_v33 }
 0xe93   : > { %v2883_v37 = vsel %vm2722_vm6, %v2882_v34, -inf }
 0xe94   : > { %2884 = vmax.xlane.f32.xlu0 %v2883_v37  ;;  %v2920_v39 = vsel %vm2715_vm5, %v2912_v36, %v2919_v35 }
 0xe95   : > { %v2950_v40 = vpop.xlane.xlu0 %2949  ;;  %v2921_v41 = vadd.f32 %v2920_v39, %v8188_v2 }
 0xe96   : > { %v2951_v43 = vmul.f32 0.35355338, %v2950_v40 }
 0xe97   : > { %v2922_v45 = vsel %vm2722_vm6, %v2921_v41, -inf }
 0xe98   : > { %2923 = vmax.xlane.f32.xlu1 %v2922_v45  ;;  %v2959_v54 = vsel %vm2715_vm5, %v2951_v43, %v2958_v42 }
 0xe99   : > { %v2989_v46 = vpop.xlane.xlu0 %2988  ;;  %v2960_v47 = vadd.f32 %v2959_v54, %v8184_v58 }
 0xe9a   : > { %v2990_v48 = vmul.f32 0.35355338, %v2989_v46 }
 0xe9b   : > { %v2961_v50 = vsel %vm2722_vm6, %v2960_v47, -inf }
 0xe9c   : > { %2962 = vmax.xlane.f32.xlu0 %v2961_v50  ;;  %v2998_v51 = vsel %vm2715_vm5, %v2990_v48, %v2997_v29 }
 0xe9d   : > { %v2999_v52 = vadd.f32 %v2998_v51, %v8188_v2 }
 0xe9f   : > { %v3000_v55 = vsel %vm2722_vm6, %v2999_v52, -inf }
 0xea0   : > { %3001 = vmax.xlane.f32.xlu1 %v3000_v55 }
 0xecd   : > { %v2725_v56 = vpop.xlane.xlu0 %2724 }
 0xece   : > { %v2726_v57 = vsub.f32 %v2721_v1, %v2725_v56 }
 0xed0   : > { %v2727_v59 = vmul.f32 1.442695, %v2726_v57 }
 0xed1   : > { %v2764_v60 = vpop.xlane.xlu0 %2763 }
 0xed2   : > { %7496 = vpow2.f32 %v2727_v59  ;;  %v2765_v61 = vsub.f32 %v2761_v53, %v2764_v60 }
 0xed4   : > { %v2766_v62 = vmul.f32 1.442695, %v2765_v61 }
 0xed6   : > { %7498 = vpow2.f32 %v2766_v62 }
 0xedc   : > { %v7497_v63 = vpop.eup %7496 }
 0xedd   : > { %v2729_v0 = vsel %vm2722_vm6, %v7497_v63, 0.0 }
 0xede   : > { %2730 = vadd.xlane.f32.xlu0 %v2729_v0 }
 0xee0   : > { %v7499_v3 = vpop.eup %7498 }
 0xee1   : > { %v2768_v4 = vsel %vm2722_vm6, %v7499_v3, 0.0 }
 0xee2   : > { %2769 = vadd.xlane.f32.xlu0 %v2768_v4 }
 0xf19   : > { %v2805_v1 = vpop.xlane.xlu1 %2804 }
 0xf1a   : > { %v2806_v7 = vsub.f32 %v2802_v20, %v2805_v1 }
 0xf1c   : > { %v2807_v8 = vmul.f32 1.442695, %v2806_v7 }
 0xf1d   : > { %v2846_v53 = vpop.xlane.xlu1 %2845 }
 0xf1e   : > { %7500 = vpow2.f32 %v2807_v8  ;;  %v2847_v9 = vsub.f32 %v2843_v27, %v2846_v53 }
 0xf20   : > { %v2848_v10 = vmul.f32 1.442695, %v2847_v9 }
 0xf21   : > { %v2885_v12 = vpop.xlane.xlu0 %2884 }
 0xf22   : > { %7502 = vpow2.f32 %v2848_v10  ;;  %v2886_v16 = vsub.f32 %v2882_v34, %v2885_v12 }
 0xf24   : > { %v2887_v17 = vmul.f32 1.442695, %v2886_v16 }
 0xf25   : > { %v2924_v18 = vpop.xlane.xlu1 %2923 }
 0xf26   : > { %7504 = vpow2.f32 %v2887_v17  ;;  %v2925_v19 = vsub.f32 %v2921_v41, %v2924_v18 }
 0xf28   : > { %v7501_v21 = vpop.eup %7500  ;;  %v2926_v22 = vmul.f32 1.442695, %v2925_v19 }
 0xf29   : > { %v2963_v23 = vpop.xlane.xlu0 %2962  ;;  %v2809_v24 = vsel %vm2722_vm6, %v7501_v21, 0.0 }
 0xf2a   : > { %7506 = vpow2.f32 %v2926_v22  ;;  %v2964_v25 = vsub.f32 %v2960_v47, %v2963_v23  ;;  %2810 = vadd.xlane.f32.xlu1 %v2809_v24 }
 0xf2c   : > { %v7503_v20 = vpop.eup %7502  ;;  %v2965_v26 = vmul.f32 1.442695, %v2964_v25 }
 0xf2d   : > { %v3002_v28 = vpop.xlane.xlu1 %3001  ;;  %v2850_v27 = vsel %vm2722_vm6, %v7503_v20, 0.0 }
 0xf2e   : > { %7508 = vpow2.f32 %v2965_v26  ;;  %v3003_v30 = vsub.f32 %v2999_v52, %v3002_v28  ;;  %2851 = vadd.xlane.f32.xlu1 %v2850_v27 }
 0xf30   : > { %v7505_v31 = vpop.eup %7504  ;;  %v3004_v32 = vmul.f32 1.442695, %v3003_v30  ;;  %v6314_v30 = vld [vmem:[%s8983_s8 + $0x20] sm:$0xff] }
 0xf31   : > { %v2889_v33 = vsel %vm2722_vm6, %v7505_v31, 0.0 }
 0xf32   : > { %7510 = vpow2.f32 %v3004_v32  ;;  %2890 = vadd.xlane.f32.xlu0 %v2889_v33 }
 0xf34   : > { %v7507_v34 = vpop.eup %7506 }
 0xf35   : > { %v2928_v35 = vsel %vm2722_vm6, %v7507_v34, 0.0 }
 0xf36   : > { %2929 = vadd.xlane.f32.xlu1 %v2928_v35 }
 0xf38   : > { %v7509_v36 = vpop.eup %7508 }
 0xf39   : > { %v2967_v14 = vsel %vm2722_vm6, %v7509_v36, 0.0 }
 0xf3a   : > { %2968 = vadd.xlane.f32.xlu0 %v2967_v14  ;;  %v6316_v14 = vld [vmem:[%s8983_s8 + $0x30] sm:$0xff] }
 0xf3c   : > { %v7511_v37 = vpop.eup %7510 }
 0xf3d   : > { %v3006_v39 = vsel %vm2722_vm6, %v7511_v37, 0.0 }
 0xf3e   : > { %3007 = vadd.xlane.f32.xlu1 %v3006_v39 }
 0xf6b   : > { %v2731_v40 = vpop.xlane.xlu0 %2730 }
 0xf6c   : > { %7512 = vrcp.f32 %v2731_v40 }
 0xf6f   : > { %v2770_v41 = vpop.xlane.xlu0 %2769 }
 0xf70   : > { %7514 = vrcp.f32 %v2770_v41 }
 0xf76   : > { %v7513_v42 = vpop.eup %7512 }
 0xf77   : > { %v2733_v43 = vmul.f32 %v7513_v42, %v7497_v63 }
 0xf79   : > { %2736 = vperm.xlu0 %7427, %v2733_v43   ;;  %2741 = vperm.xlu1 %7428, %v2733_v43  }
 0xf7a   : > { %v7515_v44 = vpop.eup %7514 }
 0xf7b   : > { %v2772_v45 = vmul.f32 %v7515_v44, %v7499_v3 }
 0xf7d   : > { %7429 = vset.pattern.permute.xlu1 %v7641_v6  ;;  %7436 = vset.pattern.permute.xlu0 %v7640_v5 }
 0xf7e   : > { %2775 = vperm.xlu1 %7429, %v2772_v45  }
 0xf82   : > { %7430 = vset.pattern.permute.xlu1 %v7640_v5 }
 0xf83   : > { %2780 = vperm.xlu1 %7430, %v2772_v45  }
 0xf87   : > { %7431 = vset.pattern.permute.xlu1 %v7641_v6 }
 0xfb7   : > { %v2811_v54 = vpop.xlane.xlu1 %2810 }
 0xfb8   : > { %7516 = vrcp.f32 %v2811_v54 }
 0xfbb   : > { %v2852_v46 = vpop.xlane.xlu1 %2851 }
 0xfbc   : > { %7518 = vrcp.f32 %v2852_v46 }
 0xfbf   : > { %v2891_v47 = vpop.xlane.xlu0 %2890 }
 0xfc0   : > { %7520 = vrcp.f32 %v2891_v47 }
 0xfc2   : > { %v7517_v29 = vpop.eup %7516 }
 0xfc3   : > { %v2813_v48 = vmul.f32 %v7517_v29, %v7501_v21  ;;  %v2930_v50 = vpop.xlane.xlu1 %2929 }
 0xfc5   : > { %2816 = vperm.xlu1 %7431, %v2813_v48  }
 0xfc6   : > { %v7519_v52 = vpop.eup %7518 }
 0xfc7   : > { %v2969_v51 = vpop.xlane.xlu0 %2968  ;;  %v2854_v59 = vmul.f32 %v7519_v52, %v7503_v20 }
 0xfc8   : > { %7522 = vrcp.f32 %v2969_v51 }
 0xfc9   : > { %7432 = vset.pattern.permute.xlu1 %v7640_v5 }
 0xfca   : > { %v7521_v55 = vpop.eup %7520  ;;  %2821 = vperm.xlu1 %7432, %v2813_v48  }
 0xfcb   : > { %v3008_v56 = vpop.xlane.xlu1 %3007  ;;  %v2893_v57 = vmul.f32 %v7521_v55, %v7505_v31  ;;  %v6315_v31 = vld [vmem:[%s8983_s8 + $0x28] sm:$0xff] }
 0xfcc   : > { %7524 = vrcp.f32 %v3008_v56  ;;  %v7233_v32 = vpack.c.bf16 %v6315_v31, %v6314_v30  ;;  %v6330_v30 = vld [vmem:[%s8987_s12 + $0x28] sm:$0xff]  ;;  %v6331_v31 = vld [vmem:[%s8987_s12 + $0x30] sm:$0xff] }
 0xfcd   : > { %2901 = vperm.xlu0 %7436, %v2893_v57   ;;  %7526 = vrcp.f32 %v2930_v50 }
 0xfce   : > { %7433 = vset.pattern.permute.xlu1 %v7641_v6  ;;  %7234 = vmatprep.subr.bf16.mxu1 %v7233_v32 }
 0xfcf   : > { %2857 = vperm.xlu1 %7433, %v2854_v59   ;;  %7236 = vmatpush3.bf16.msra.mxu1 %v7233_v32 }
 0xfd1   : > { %7438 = vset.pattern.permute.xlu0 %v7641_v6 }
 0xfd2   : > { %v7523_v60 = vpop.eup %7522 }
 0xfd3   : > { %7434 = vset.pattern.permute.xlu1 %v7640_v5  ;;  %v2971_v61 = vmul.f32 %v7523_v60, %v7509_v36 }
 0xfd4   : > { %2862 = vperm.xlu1 %7434, %v2854_v59  }
 0xfd5   : > { %2974 = vperm.xlu0 %7438, %v2971_v61  }
 0xfd6   : > { %v7525_v62 = vpop.eup %7524 }
 0xfd7   : > { %v3010_v63 = vmul.f32 %v7525_v62, %v7511_v37  ;;  %v7527_v0 = vpop.eup %7526  ;;  %v6317_v37 = vld [vmem:[%s8983_s8 + $0x38] sm:$0xff] }
 0xfd8   : > { %7435 = vset.pattern.permute.xlu1 %v7641_v6  ;;  %v2932_v3 = vmul.f32 %v7527_v0, %v7507_v34  ;;  %v7237_v39 = vpack.c.bf16 %v6317_v37, %v6316_v14 }
 0xfd9   : > { %7440 = vset.pattern.permute.xlu0 %v7640_v5  ;;  %2896 = vperm.xlu1 %7435, %v2893_v57  }
 0xfda   : > { %3018 = vperm.xlu0 %7440, %v3010_v63   ;;  %7238 = vmatprep.subr.bf16.mxu1 %v7237_v39 }
 0xfdb   : > { %7240 = vmatpush3.bf16.msra.mxu1 %v7237_v39 }
 0xfdd   : > { %2935 = vperm.xlu1 %7435, %v2932_v3  }
 0xfe1   : > { %7437 = vset.pattern.permute.xlu1 %v7640_v5 }
 0xfe2   : > { %2940 = vperm.xlu1 %7437, %v2932_v3  }
 0xfe6   : > { %2979 = vperm.xlu1 %7437, %v2971_v61  }
 0xfea   : > { %7439 = vset.pattern.permute.xlu1 %v7641_v6 }
 0xfeb   : > { %3013 = vperm.xlu1 %7439, %v3010_v63  }
 0xff8   : > { %v2737_v4 = vpop.permute.xlu0 %2736  ;;  %v2742_v1 = vpop.permute.xlu1 %2741 }
 0xff9   : > { %v2739_v7 = vmul.f32 %v2737_v4, %v8143_v15  ;;  %v2744_v8 = vmul.f32 %v2742_v1, %v8141_v11 }
 0xffb   : > { %v2745_v53 = vadd.f32 %v2744_v8, %v2739_v7  ;;  %v6322_v8 = vld [vmem:[%s8984_s9 + $0x1] ss:$0 sm:$0xff] }
 0xffd   : > { %3024 = vrot.lane.b32.xlu1 %v2745_v53, %s9048_s25  ;;  %v2776_v9 = vpop.permute.xlu1 %2775 }
 0xffe   : > { %v2778_v12 = vmul.f32 %v2776_v9, %v8143_v15 }
0x1002   : > { %v2781_v10 = vpop.permute.xlu1 %2780 }
0x1003   : > { %v2783_v16 = vmul.f32 %v2781_v10, %v8141_v11 }
0x1005   : > { %v2784_v17 = vadd.f32 %v2783_v16, %v2778_v12 }
0x1007   : > { %3043 = vrot.lane.b32.xlu1 %v2784_v17, %s9048_s25 }
0x1044   : > { %v2817_v18 = vpop.permute.xlu1 %2816 }
0x1045   : > { %v2819_v21 = vmul.f32 %v2817_v18, %v8143_v15 }
0x1049   : > { %v2822_v19 = vpop.permute.xlu1 %2821 }
0x104a   : > { %v2824_v22 = vmul.f32 %v2822_v19, %v8141_v11 }
0x104c   : > { %v2825_v23 = vadd.f32 %v2824_v22, %v2819_v21  ;;  %v2902_v20 = vpop.permute.xlu0 %2901 }
0x104d   : > { %v2904_v28 = vmul.f32 %v2902_v20, %v8141_v11 }
0x104e   : > { %3028 = vrot.lane.b32.xlu1 %v2825_v23, %s9048_s25  ;;  %v2858_v24 = vpop.permute.xlu1 %2857 }
0x104f   : > { %v2860_v36 = vmul.f32 %v2858_v24, %v8143_v15 }
0x1053   : > { %v2863_v25 = vpop.permute.xlu1 %2862 }
0x1054   : > { %v2865_v33 = vmul.f32 %v2863_v25, %v8141_v11  ;;  %v2975_v42 = vpop.permute.xlu0 %2974 }
0x1055   : > { %v2977_v46 = vmul.f32 %v2975_v42, %v8143_v15 }
0x1056   : > { %v2866_v40 = vadd.f32 %v2865_v33, %v2860_v36  ;;  %v6332_v33 = vld [vmem:[%s8987_s12 + $0x38] sm:$0xff]  ;;  %v6338_v36 = vld [vmem:[%s8989_s14 + $0x88] sm:$0xff] }
0x1058   : > { %v2897_v26 = vpop.permute.xlu1 %2896 }
0x1059   : > { %v2899_v27 = vmul.f32 %v2897_v26, %v8143_v15  ;;  %v3019_v29 = vpop.permute.xlu0 %3018 }
0x105a   : > { %v3021_v51 = vmul.f32 %v3019_v29, %v8141_v11 }
0x105b   : > { %v2905_v34 = vadd.f32 %v2904_v28, %v2899_v27  ;;  %v6329_v27 = vld [vmem:[%s8987_s12 + $0x20] sm:$0xff] }
0x105c   : > { %v2936_v35 = vpop.permute.xlu1 %2935  ;;  %v7241_v32 = vpack.c.bf16 %v6330_v30, %v6329_v27 }
0x105d   : > { %3032 = vrot.lane.b32.xlu0 %v2905_v34, %s9048_s25  ;;  %v2938_v43 = vmul.f32 %v2936_v35, %v8143_v15  ;;  %v7245_v34 = vpack.c.bf16 %v6332_v33, %v6331_v31  ;;  %v6337_v35 = vld [vmem:[%s8989_s14 + $0x80] sm:$0xff] }
0x105e   : > { %7242 = vmatprep.subr.bf16.mxu1 %v7241_v32  ;;  %v7249_v14 = vpack.c.bf16 %v6338_v36, %v6337_v35 }
0x1061   : > { %3047 = vrot.lane.b32.xlu0 %v2866_v40, %s9048_s25  ;;  %v2941_v41 = vpop.permute.xlu1 %2940 }
0x1062   : > { %v2943_v44 = vmul.f32 %v2941_v41, %v8141_v11 }
0x1064   : > { %v2944_v45 = vadd.f32 %v2943_v44, %v2938_v43 }
0x1065   : > { %v2980_v54 = vpop.permute.xlu1 %2979 }
0x1066   : > { %v2982_v47 = vmul.f32 %v2980_v54, %v8141_v11  ;;  %3051 = vrot.lane.b32.xlu0 %v2944_v45, %s9048_s25  ;;  %v6327_v45 = vld [vmem:[%s8985_s10 + $0x1] ss:$0 sm:$0xff] }
0x1068   : > { %v2983_v48 = vadd.f32 %v2982_v47, %v2977_v46  ;;  %v6328_v46 = vld [vmem:[%s8986_s11 + $0x1] ss:$0 sm:$0xff] }
0x106a   : > { %3036 = vrot.lane.b32.xlu1 %v2983_v48, %s9048_s25  ;;  %v3014_v50 = vpop.permute.xlu1 %3013 }
0x106b   : > { %v3016_v52 = vmul.f32 %v3014_v50, %v8143_v15 }
0x106d   : > { %v3022_v55 = vadd.f32 %v3021_v51, %v3016_v52  ;;  %v6339_v51 = vld [vmem:[%s8989_s14 + $0x90] sm:$0xff]  ;;  %v6340_v52 = vld [vmem:[%s8989_s14 + $0x98] sm:$0xff] }
0x106f   : > { %3055 = vrot.lane.b32.xlu1 %v3022_v55, %s9048_s25  ;;  %v3025_v56 = vpop.permute.xlu1 %3024 }
0x1079   : > { %v3044_v59 = vpop.permute.xlu1 %3043 }
0x10c0   : > { %v3029_v60 = vpop.permute.xlu1 %3028 }
0x10c1   : > { %v3039_v62 = vsel %vm867_vm2, %v3025_v56, %v3029_v60  ;;  %v6342_v60 = vld [vmem:[%s8989_s14 + $0xa8] sm:$0xff] }
0x10cf   : > { %v3033_v57 = vpop.permute.xlu0 %3032 }
0x10d0   : > { %v3040_v63 = vsel %vm1541_vm3, %v3039_v62, %v3033_v57  ;;  %v7253_v57 = vpack.c.bf16 %v6340_v52, %v6339_v51  ;;  %v6343_v62 = vld [vmem:[%s8989_s14 + $0xb0] sm:$0xff] }
0x10d3   : > { %v3048_v61 = vpop.permute.xlu0 %3047 }
0x10d4   : > { %v3058_v11 = vsel %vm867_vm2, %v3044_v59, %v3048_v61  ;;  %v6341_v59 = vld [vmem:[%s8989_s14 + $0xa0] sm:$0xff] }
0x10d5   : > { %v7257_v61 = vpack.c.bf16 %v6342_v60, %v6341_v59 }
0x10d8   : > { %v3052_v4 = vpop.permute.xlu0 %3051 }
0x10d9   : > { %v3059_v15 = vsel %vm1541_vm3, %v3058_v11, %v3052_v4  ;;  %v6346_v4 = vld [vmem:[%s8989_s14 + $0xc8] sm:$0xff] }
0x10dc   : > { %v3037_v0 = vpop.permute.xlu1 %3036 }
0x10dd   : > { %v3041_v3 = vsel %vm1543_vm4, %v3040_v63, %v3037_v0  ;;  %v6344_v63 = vld [vmem:[%s8989_s14 + $0xb8] sm:$0xff] }
0x10de   : > { %6885 = vmatprep.mubr.msk.f32.mxu1 %vm638_vm0, %v3041_v3  ;;  %v7261_v0 = vpack.c.bf16 %v6344_v63, %v6343_v62  ;;  %v6345_v3 = vld [vmem:[%s8989_s14 + $0xc0] sm:$0xff] }
0x10df   : > { %v7265_v11 = vpack.c.bf16 %v6346_v4, %v6345_v3  ;;  %v6369_v4 = vld [vmem:[%s8982_s7 + $0x2] ss:$0 sm:$0xff] }
0x10e1   : > { %v3056_v1 = vpop.permute.xlu1 %3055 }
0x10e2   : > { %v3060_v7 = vsel %vm1543_vm4, %v3059_v15, %v3056_v1  ;;  %v6347_v15 = vld [vmem:[%s8989_s14 + $0xd0] sm:$0xff]  ;;  %v6348_v1 = vld [vmem:[%s8989_s14 + $0xd8] sm:$0xff] }
0x10e3   : > { %6886 = vmatmul.mubr.msk.f32.vlgmr.msra.gmra.mrb[20].mxu1 %vm638_vm0, %v3060_v7  ;;  %v7269_v7 = vpack.c.bf16 %v6348_v1, %v6347_v15 }
0x10e4   : > { %7244 = vmatpush3.bf16.msra.mxu1 %v7241_v32 }
0x10e5   : > { %7246 = vmatprep.subr.bf16.mxu1 %v7245_v34 }
0x10e8   : > { %7248 = vmatpush3.bf16.msra.mxu1 %v7245_v34 }
0x10e9   : > { %7250 = vmatprep.subr.bf16.mxu1 %v7249_v14 }
0x11b6   : > { %v6887_v53 = vpop.f32.mrb[20].mxu1 }
0x11b7   : > { %v3145_v9 = vadd.f32 %v6887_v53, %v6322_v8  ;;  %v3139_v10 = vpop.f32.mrb[21].mxu1  ;;  %v6350_v53 = vld [vmem:[%s8989_s14 + $0xe8] sm:$0xff] }
0x11b8   : > { %v3140_v12 = vadd.f32 %v6322_v8, %v3139_v10  ;;  %v6349_v8 = vld [vmem:[%s8989_s14 + $0xe0] sm:$0xff]  ;;  %v6351_v10 = vld [vmem:[%s8989_s14 + $0xf0] sm:$0xff] }
0x11b9   : > { %v8282_v16 = vadd.f32 %v3145_v9, %v8105_v13  ;;  %v7273_v9 = vpack.c.bf16 %v6350_v53, %v6349_v8 }
0x11ba   : > { %v8285_v17 = vadd.f32 %v3140_v12, %v8108_v38  ;;  %v6352_v12 = vld [vmem:[%s8989_s14 + $0xf8] sm:$0xff] }
0x11bb   : > { %v3157_v18 = vsel %vm638_vm0, %v8282_v16, 0.0 }
0x11bc   : > { %3158 = vadd.xlane.f32.xlu1 %v3157_v18  ;;  %v3154_v19 = vsel %vm638_vm0, %v8285_v17, 0.0  ;;  %v7277_v18 = vpack.c.bf16 %v6352_v12, %v6351_v10 }
0x11bd   : > { %3155 = vadd.xlane.f32.xlu0 %v3154_v19  ;;  %v6334_v19 = vld [vmem:[%s8988_s13 + $0x1] ss:$0 sm:$0xff] }
0x1249   : > { %v3159_v21 = vpop.xlane.xlu1 %3158 }
0x124a   : > { %v3161_v22 = vmul.f32 0.03125, %v3159_v21  ;;  %v3156_v23 = vpop.xlane.xlu0 %3155 }
0x124b   : > { %v3160_v24 = vmul.f32 0.03125, %v3156_v23 }
0x124c   : > { %v3163_v25 = vsub.f32 %v8282_v16, %v3161_v22 }
0x124d   : > { %v3162_v13 = vsub.f32 %v8285_v17, %v3160_v24 }
0x124e   : > { %v3165_v26 = vmul.f32 %v3163_v25, %v3163_v25 }
0x124f   : > { %v3164_v20 = vmul.f32 %v3162_v13, %v3162_v13 }
0x1250   : > { %v3169_v28 = vsel %vm638_vm0, %v3165_v26, 0.0 }
0x1251   : > { %v3166_v38 = vsel %vm638_vm0, %v3164_v20, 0.0  ;;  %v6354_v20 = vld [vmem:[%s8990_s15 + $0x1] ss:$0 sm:$0xff] }
0x1252   : > { %3167 = vadd.xlane.f32.xlu0 %v3166_v38 }
0x1256   : > { %3170 = vadd.xlane.f32.xlu0 %v3169_v28 }
0x12df   : > { %v3168_v37 = vpop.xlane.xlu0 %3167 }
0x12e0   : > { %v3172_v39 = vmul.f32 0.03125, %v3168_v37 }
0x12e2   : > { %v3174_v40 = vadd.f32 1e-05, %v3172_v39 }
0x12e3   : > { %v3171_v41 = vpop.xlane.xlu0 %3170 }
0x12e4   : > { %7528 = vrsqrt.f32 %v3174_v40  ;;  %v3173_v42 = vmul.f32 0.03125, %v3171_v41 }
0x12e6   : > { %v3175_v43 = vadd.f32 1e-05, %v3173_v42  ;;  %v6359_v42 = vld [vmem:[%s8981_s6 + $0x40] sm:$0xff] }
0x12e8   : > { %7530 = vrsqrt.f32 %v3175_v43  ;;  %v6360_v43 = vld [vmem:[%s8981_s6 + $0x48] sm:$0xff] }
0x12ee   : > { %v7529_v44 = vpop.eup %7528 }
0x12ef   : > { %v3178_v54 = vmul.f32 %v7529_v44, %v3162_v13  ;;  %v6361_v44 = vld [vmem:[%s8981_s6 + $0x50] sm:$0xff] }
0x12f1   : > { %v3186_v47 = vmul.f32 %v6327_v45, %v3178_v54  ;;  %v6362_v54 = vld [vmem:[%s8981_s6 + $0x58] sm:$0xff] }
0x12f2   : > { %v7531_v29 = vpop.eup %7530 }
0x12f3   : > { %v3179_v48 = vmul.f32 %v7531_v29, %v3163_v25  ;;  %v3194_v50 = vadd.f32 %v6328_v46, %v3186_v47 }
0x12f5   : > { %v3187_v55 = vmul.f32 %v6327_v45, %v3179_v48  ;;  %6896 = vmatprep.mubr.msk.f32.mxu1 %vm638_vm0, %v3194_v50  ;;  %v7281_v45 = vpack.c.bf16 %v6360_v43, %v6359_v42 }
0x12f7   : > { %v3195_v56 = vadd.f32 %v6328_v46, %v3187_v55  ;;  %v7285_v46 = vpack.c.bf16 %v6362_v54, %v6361_v44  ;;  %7282 = vmatprep.subr.bf16.mxu0 %v7281_v45 }
0x12f8   : > { %7284 = vmatpush3.bf16.msra.mxu0 %v7281_v45 }
0x12f9   : > { %6897 = vmatmul.mubr.msk.f32.vlgmr.msra.gmra.mrb[22].mxu1 %vm638_vm0, %v3195_v56  ;;  %7286 = vmatprep.subr.bf16.mxu0 %v7285_v46  ;;  %v6357_v56 = vld [vmem:[%s9042_s26 + $0x2] ss:$0 sm:$0xff] }
0x12fa   : > { %7252 = vmatpush3.bf16.msra.mxu1 %v7249_v14 }
0x12fb   : > { %7254 = vmatprep.subr.bf16.mxu1 %v7253_v57 }
0x12fc   : > { %7288 = vmatpush3.bf16.msra.mxu0 %v7285_v46 }
0x12fd   : > { %6945 = vmatprep.subr.mxu0 %v7624_v49 }
0x12fe   : > { %7256 = vmatpush3.bf16.msra.mxu1 %v7253_v57 }
0x12ff   : > { %7258 = vmatprep.subr.bf16.mxu1 %v7257_v61 }
0x1302   : > { %7260 = vmatpush3.bf16.msra.mxu1 %v7257_v61  ;;  %v6358_v61 = vld [vmem:[%s8980_s5 + $0x2] ss:$0 sm:$0xff] }
0x1303   : > { %7262 = vmatprep.subr.bf16.mxu1 %v7261_v0 }
0x1306   : > { %7264 = vmatpush3.bf16.msra.mxu1 %v7261_v0 }
0x1307   : > { %7266 = vmatprep.subr.bf16.mxu1 %v7265_v11 }
0x130a   : > { %7268 = vmatpush3.bf16.msra.mxu1 %v7265_v11 }
0x130b   : > { %7270 = vmatprep.subr.bf16.mxu1 %v7269_v7 }
0x130e   : > { %7272 = vmatpush3.bf16.msra.mxu1 %v7269_v7 }
0x130f   : > { %7274 = vmatprep.subr.bf16.mxu1 %v7273_v9 }
0x1312   : > { %7276 = vmatpush3.bf16.msra.mxu1 %v7273_v9 }
0x1313   : > { %7278 = vmatprep.subr.bf16.mxu1 %v7277_v18 }
0x1316   : > { %7280 = vmatpush3.bf16.msra.mxu1 %v7277_v18 }
0x1317   : > { %6970 = vmatprep.subr.mxu1 %v7624_v49 }
0x13cc   : > { %v6898_v21 = vpop.f32.mrb[22].mxu1 }
0x13cd   : > { %v3287_v22 = vadd.f32 %v6898_v21, %v6334_v19  ;;  %v3281_v23 = vpop.f32.mrb[23].mxu1 }
0x13ce   : > { %v3282_v24 = vadd.f32 %v6334_v19, %v3281_v23 }
0x13cf   : > { %v3291_v13 = vmax.f32 %v3287_v22, 0.0 }
0x13d0   : > { %v3290_v25 = vmax.f32 %v3282_v24, 0.0 }
0x13d2   : > { %6931 = vmatprep.mubr.f32.mxu1 %v3290_v25 }
0x13d3   : > { %6932 = vmatmul.mubr.f32.vlgmr.msra.gmra.mrb[24].mxu1 %v3291_v13 }
0x13d4   : > { %6972 = vmatprep.mubr.msk.f32.mxu1 %vm7625_vm1, %v7624_v49 }
0x14a6   : > { %v6933_v38 = vpop.f32.mrb[24].mxu1 }
0x14a7   : > { %v3389_v26 = vadd.f32 %v6933_v38, %v6354_v20  ;;  %v3383_v28 = vpop.f32.mrb[25].mxu1 }
0x14a8   : > { %v3384_v27 = vadd.f32 %v6354_v20, %v3383_v28 }
0x14a9   : > { %v8373_v30 = vadd.f32 %v3389_v26, %v8282_v16 }
0x14aa   : > { %v8376_v31 = vadd.f32 %v3384_v27, %v8285_v17 }
0x14ab   : > { %v3401_v32 = vsel %vm638_vm0, %v8373_v30, 0.0 }
0x14ac   : > { %3402 = vadd.xlane.f32.xlu0 %v3401_v32  ;;  %v3398_v33 = vsel %vm638_vm0, %v8376_v31, 0.0 }
0x14ad   : > { %3399 = vadd.xlane.f32.xlu1 %v3398_v33 }
0x1539   : > { %v3403_v34 = vpop.xlane.xlu0 %3402 }
0x153a   : > { %v3405_v35 = vmul.f32 0.03125, %v3403_v34  ;;  %v3400_v36 = vpop.xlane.xlu1 %3399 }
0x153b   : > { %v3404_v14 = vmul.f32 0.03125, %v3400_v36 }
0x153c   : > { %v3407_v37 = vsub.f32 %v8373_v30, %v3405_v35 }
0x153d   : > { %v3406_v16 = vsub.f32 %v8376_v31, %v3404_v14 }
0x153e   : > { %v3409_v39 = vmul.f32 %v3407_v37, %v3407_v37 }
0x153f   : > { %v3408_v40 = vmul.f32 %v3406_v16, %v3406_v16 }
0x1540   : > { %v3413_v17 = vsel %vm638_vm0, %v3409_v39, 0.0 }
0x1541   : > { %3414 = vadd.xlane.f32.xlu0 %v3413_v17  ;;  %v3410_v41 = vsel %vm638_vm0, %v3408_v40, 0.0 }
0x1542   : > { %3411 = vadd.xlane.f32.xlu1 %v3410_v41 }
0x15ce   : > { %v3415_v47 = vpop.xlane.xlu0 %3414 }
0x15cf   : > { %v3417_v29 = vmul.f32 0.03125, %v3415_v47  ;;  %v3412_v48 = vpop.xlane.xlu1 %3411 }
0x15d0   : > { %v3416_v50 = vmul.f32 0.03125, %v3412_v48 }
0x15d1   : > { %v3419_v51 = vadd.f32 1e-05, %v3417_v29 }
0x15d2   : > { %v3418_v52 = vadd.f32 1e-05, %v3416_v50 }
0x15d3   : > { %7532 = vrsqrt.f32 %v3419_v51 }
0x15d4   : > { %7534 = vrsqrt.f32 %v3418_v52 }
0x15dd   : > { %v7533_v55 = vpop.eup %7532 }
0x15de   : > { %v7535_v57 = vpop.eup %7534  ;;  %v3423_v59 = vmul.f32 %v7533_v55, %v3407_v37 }
0x15df   : > { %v3422_v60 = vmul.f32 %v7535_v57, %v3406_v16 }
0x15e0   : > { %v3431_v62 = vmul.f32 %v6357_v56, %v3423_v59 }
0x15e1   : > { %v3430_v63 = vmul.f32 %v6357_v56, %v3422_v60 }
0x15e2   : > { %v3439_v3 = vadd.f32 %v6358_v61, %v3431_v62 }
0x15e3   : > { %v3438_v0 = vadd.f32 %v6358_v61, %v3430_v63 }
0x15e5   : > { %6942 = vmatprep.mubr.msk.f32.mxu0 %vm638_vm0, %v3438_v0 }
0x15e6   : > { %6943 = vmatmul.mubr.msk.f32.vlgmr.msra.gmra.mrb[24].mxu0 %vm638_vm0, %v3439_v3 }
0x15e7   : > { %6947 = vmatprep.mubr.msk.f32.mxu0 %vm7625_vm1, %v7624_v49 }
0x16b9   : > { %v6944_v11 = vpop.f32.mrb[24].mxu0 }
0x16ba   : > { %v8412_v15 = vadd.f32 %v6944_v11, %v6369_v4  ;;  %v3532_v1 = vpop.f32.mrb[25].mxu0 }
0x16bb   : > { %v8414_v7 = vadd.f32 %v6369_v4, %v3532_v1 }
0x16bd   : > { %3542 = vrot.lane.b32.xlu1 %v8414_v7, %s9043_s4 }
0x16c1   : > { %3708 = vrot.lane.b32.xlu1 %v8414_v7, %s9049_s0 }
0x16c5   : > { %3706 = vrot.lane.b32.xlu1 %v8414_v7, %s9044_s21 }
0x172f   : > { %v3543_v8 = vpop.permute.xlu1 %3542 }
0x1730   : > { %6946 = vmatpush3.xpose.msk.msra.mxu0 %vm867_vm2, %v3543_v8 }
0x1731   : > { %6950 = vmatprep.subr.mxu0 %v7624_v49 }
0x1733   : > { %6948 = vmatmul.mubr.msk.f32.vlgmr.msra.gmra.mrb[26].mxu0 %vm867_vm2, %v8414_v7  ;;  %v3709_v20 = vpop.permute.xlu1 %3708 }
0x1734   : > { %6952 = vmatprep.mubr.msk.f32.mxu0 %vm7625_vm1, %v7624_v49 }
0x1737   : > { %v3707_v26 = vpop.permute.xlu1 %3706 }
0x1806   : > { %v3614_v53 = vpop.f32.mrb[26].mxu0 }
0x1807   : > { %v3618_v9 = vmul.f32 0.35355338, %v3614_v53  ;;  %v6949_v10 = vpop.f32.mrb[27].mxu0 }
0x1809   : > { %v3619_v12 = vsel %vm867_vm2, %v3618_v9, -inf }
0x180a   : > { %3620 = vmax.xlane.f32.xlu0 %v3619_v12 }
0x1897   : > { %v3621_v18 = vpop.xlane.xlu0 %3620 }
0x1898   : > { %v3622_v19 = vsub.f32 %v3618_v9, %v3621_v18 }
0x189a   : > { %v3623_v21 = vmul.f32 1.442695, %v3622_v19 }
0x189c   : > { %7536 = vpow2.f32 %v3623_v21 }
0x18a6   : > { %v7537_v22 = vpop.eup %7536 }
0x18a7   : > { %v3625_v23 = vsel %vm867_vm2, %v7537_v22, 0.0 }
0x18a8   : > { %3626 = vadd.xlane.f32.xlu0 %v3625_v23 }
0x18be   : > { %3630 = vrot.lane.b32.xlu0 %v8414_v7, %s9048_s25 }
0x1935   : > { %v3627_v24 = vpop.xlane.xlu0 %3626 }
0x1936   : > { %7538 = vrcp.f32 %v3627_v24 }
0x1939   : > { %v3631_v25 = vpop.permute.xlu0 %3630 }
0x193a   : > { %6951 = vmatpush3.msra.mxu0 %v3631_v25 }
0x193b   : > { %6955 = vmatprep.subr.mxu0 %v7624_v49 }
0x1940   : > { %v7539_v13 = vpop.eup %7538 }
0x1941   : > { %v3629_v38 = vmul.f32 %v7539_v13, %v7537_v22 }
0x1943   : > { %6953 = vmatmul.mubr.msk.f32.vlgmr.msra.gmra.mrb[28].mxu0 %vm867_vm2, %v3629_v38 }
0x1944   : > { %6956 = vmatpush3.xpose.msk.msra.mxu0 %vm867_vm2, %v3709_v20  ;;  %6957 = vmatprep.mubr.msk.f32.mxu0 %vm7625_vm1, %v7624_v49 }
0x1945   : > { %6960 = vmatprep.subr.mxu0 %v7624_v49 }
0x1947   : > { %6958 = vmatmul.mubr.msk.f32.vlgmr.msra.gmra.mrb[30].mxu0 %vm867_vm2, %v3707_v26 }
0x1948   : > { %6962 = vmatprep.mubr.msk.f32.mxu0 %vm7625_vm1, %v7624_v49 }
0x1a16   : > { %v8441_v28 = vpop.f32.mrb[28].mxu0 }
0x1a17   : > { %v6954_v27 = vpop.f32.mrb[29].mxu0 }
0x1a1a   : > { %v3780_v32 = vpop.f32.mrb[30].mxu0 }
0x1a1b   : > { %v3784_v33 = vmul.f32 0.35355338, %v3780_v32  ;;  %v6959_v34 = vpop.f32.mrb[31].mxu0 }
0x1a1d   : > { %v3785_v35 = vsel %vm867_vm2, %v3784_v33, -inf }
0x1a1e   : > { %3786 = vmax.xlane.f32.xlu1 %v3785_v35 }
0x1a2f   : > { %3796 = vrot.lane.b32.xlu1 %v8414_v7, %s9050_s30 }
0x1a33   : > { %3872 = vrot.lane.b32.xlu1 %v8414_v7, %s9045_s28 }
0x1a37   : > { %4040 = vrot.lane.b32.xlu1 %v8414_v7, %s9051_s23 }
0x1a3b   : > { %4220 = vrot.lane.b32.xlu1 %v8412_v15, %s9043_s4 }
0x1a3f   : > { %4384 = vrot.lane.b32.xlu1 %v8412_v15, %s9044_s21 }
0x1a43   : > { %4550 = vrot.lane.b32.xlu1 %v8412_v15, %s9045_s28 }
0x1a47   : > { %4716 = vrot.lane.b32.xlu1 %v8412_v15, %s9046_s29 }
0x1aab   : > { %v3787_v36 = vpop.xlane.xlu1 %3786 }
0x1aac   : > { %v3788_v14 = vsub.f32 %v3784_v33, %v3787_v36 }
0x1aae   : > { %v3789_v37 = vmul.f32 1.442695, %v3788_v14 }
0x1aaf   : > { %v3797_v16 = vpop.permute.xlu1 %3796 }
0x1ab0   : > { %7540 = vpow2.f32 %v3789_v37  ;;  %6961 = vmatpush3.msra.mxu0 %v3797_v16 }
0x1ab1   : > { %6965 = vmatprep.subr.mxu0 %v7624_v49 }
0x1ab3   : > { %v3873_v41 = vpop.permute.xlu1 %3872 }
0x1ab7   : > { %v4041_v45 = vpop.permute.xlu1 %4040 }
0x1aba   : > { %v7541_v39 = vpop.eup %7540 }
0x1abb   : > { %v3791_v40 = vsel %vm867_vm2, %v7541_v39, 0.0  ;;  %v4221_v46 = vpop.permute.xlu1 %4220 }
0x1abc   : > { %3792 = vadd.xlane.f32.xlu0 %v3791_v40 }
0x1abf   : > { %v4385_v29 = vpop.permute.xlu1 %4384 }
0x1ac3   : > { %v4551_v50 = vpop.permute.xlu1 %4550 }
0x1ac7   : > { %v4717_v52 = vpop.permute.xlu1 %4716 }
0x1ad2   : > { %3874 = vrot.lane.b32.xlu0 %v8414_v7, %s9052_s24 }
0x1ad6   : > { %4038 = vrot.lane.b32.xlu0 %v8414_v7, %s9046_s29 }
0x1ada   : > { %4386 = vrot.lane.b32.xlu0 %v8412_v15, %s9049_s0  ;;  %s9057_s0 = smov 24  }
0x1ade   : > { %4552 = vrot.lane.b32.xlu0 %v8412_v15, %s9052_s24 }
0x1ae2   : > { %4718 = vrot.lane.b32.xlu0 %v8412_v15, %s9051_s23 }
0x1b49   : > { %v3793_v17 = vpop.xlane.xlu0 %3792 }
0x1b4a   : > { %7542 = vrcp.f32 %v3793_v17 }
0x1b4d   : > { %v3875_v42 = vpop.permute.xlu0 %3874 }
0x1b51   : > { %v4039_v54 = vpop.permute.xlu0 %4038 }
0x1b54   : > { %v7543_v43 = vpop.eup %7542 }
0x1b55   : > { %v3795_v44 = vmul.f32 %v7543_v43, %v7541_v39  ;;  %v4387_v47 = vpop.permute.xlu0 %4386 }
0x1b57   : > { %6963 = vmatmul.mubr.msk.f32.vlgmr.msra.gmra.mrb[32].mxu0 %vm867_vm2, %v3795_v44 }
0x1b58   : > { %6966 = vmatpush3.xpose.msk.msra.mxu0 %vm867_vm2, %v3875_v42  ;;  %6967 = vmatprep.mubr.msk.f32.mxu0 %vm7625_vm1, %v7624_v49 }
0x1b59   : > { %6975 = vmatprep.subr.mxu0 %v7624_v49  ;;  %v4553_v48 = vpop.permute.xlu0 %4552 }
0x1b5b   : > { %6968 = vmatmul.mubr.msk.f32.vlgmr.msra.gmra.mrb[34].mxu0 %vm867_vm2, %v3873_v41 }
0x1b5c   : > { %6976 = vmatpush3.xpose.msk.msra.mxu0 %vm867_vm2, %v4041_v45  ;;  %6977 = vmatprep.mubr.msk.f32.mxu0 %vm7625_vm1, %v7624_v49 }
0x1b5d   : > { %6985 = vmatprep.subr.mxu0 %v7624_v49  ;;  %v4719_v51 = vpop.permute.xlu0 %4718 }
0x1b5f   : > { %6978 = vmatmul.mubr.msk.f32.vlgmr.msra.gmra.mrb[36].mxu0 %vm867_vm2, %v4039_v54 }
0x1b60   : > { %6986 = vmatpush3.xpose.msk.msra.mxu0 %vm867_vm2, %v4221_v46  ;;  %6987 = vmatprep.mubr.msk.f32.mxu0 %vm7625_vm1, %v7624_v49 }
0x1b61   : > { %6995 = vmatprep.subr.mxu0 %v7624_v49 }
0x1b63   : > { %6988 = vmatmul.mubr.msk.f32.vlgmr.msra.gmra.mrb[38].mxu0 %vm867_vm2, %v8412_v15 }
0x1b64   : > { %6996 = vmatpush3.xpose.msk.msra.mxu0 %vm867_vm2, %v4387_v47  ;;  %6997 = vmatprep.mubr.msk.f32.mxu0 %vm7625_vm1, %v7624_v49 }
0x1b65   : > { %7005 = vmatprep.subr.mxu0 %v7624_v49 }
0x1b67   : > { %6998 = vmatmul.mubr.msk.f32.vlgmr.msra.gmra.mrb[40].mxu0 %vm867_vm2, %v4385_v29 }
0x1b68   : > { %7006 = vmatpush3.xpose.msk.msra.mxu0 %vm867_vm2, %v4553_v48  ;;  %7007 = vmatprep.mubr.msk.f32.mxu0 %vm7625_vm1, %v7624_v49 }
0x1b69   : > { %7015 = vmatprep.subr.mxu0 %v7624_v49 }
0x1b6b   : > { %7008 = vmatmul.mubr.msk.f32.vlgmr.msra.gmra.mrb[42].mxu0 %vm867_vm2, %v4551_v50 }
0x1b6c   : > { %7016 = vmatpush3.xpose.msk.msra.mxu0 %vm867_vm2, %v4719_v51  ;;  %7017 = vmatprep.mubr.msk.f32.mxu0 %vm7625_vm1, %v7624_v49 }
0x1b6f   : > { %7018 = vmatmul.mubr.msk.f32.vlgmr.msra.gmra.mrb[44].mxu0 %vm867_vm2, %v4717_v52 }
0x1c2a   : > { %v8501_v55 = vpop.f32.mrb[32].mxu0 }
0x1c2b   : > { %v6964_v56 = vpop.f32.mrb[33].mxu0 }
0x1c2e   : > { %v3946_v57 = vpop.f32.mrb[34].mxu0 }
0x1c2f   : > { %v3950_v59 = vmul.f32 0.35355338, %v3946_v57  ;;  %v6969_v60 = vpop.f32.mrb[35].mxu0 }
0x1c31   : > { %v3951_v61 = vsel %vm867_vm2, %v3950_v59, -inf }
0x1c32   : > { %3952 = vmax.xlane.f32.xlu0 %v3951_v61  ;;  %v4112_v62 = vpop.f32.mrb[36].mxu0 }
0x1c33   : > { %v4116_v63 = vmul.f32 0.35355338, %v4112_v62  ;;  %v6979_v0 = vpop.f32.mrb[37].mxu0 }
0x1c35   : > { %v4117_v3 = vsel %vm867_vm2, %v4116_v63, -inf }
0x1c36   : > { %4118 = vmax.xlane.f32.xlu1 %v4117_v3  ;;  %v4292_v4 = vpop.f32.mrb[38].mxu0 }
0x1c37   : > { %v4296_v11 = vmul.f32 0.35355338, %v4292_v4  ;;  %v6989_v1 = vpop.f32.mrb[39].mxu0 }
0x1c39   : > { %v4297_v8 = vsel %vm867_vm2, %v4296_v11, -inf }
0x1c3a   : > { %4298 = vmax.xlane.f32.xlu0 %v4297_v8  ;;  %v4458_v53 = vpop.f32.mrb[40].mxu0 }
0x1c3b   : > { %v4462_v9 = vmul.f32 0.35355338, %v4458_v53  ;;  %v6999_v10 = vpop.f32.mrb[41].mxu0 }
0x1c3d   : > { %v4463_v12 = vsel %vm867_vm2, %v4462_v9, -inf }
0x1c3e   : > { %4464 = vmax.xlane.f32.xlu0 %v4463_v12  ;;  %v4624_v18 = vpop.f32.mrb[42].mxu0 }
0x1c3f   : > { %v4628_v19 = vmul.f32 0.35355338, %v4624_v18  ;;  %v7009_v21 = vpop.f32.mrb[43].mxu0 }
0x1c41   : > { %v4629_v22 = vsel %vm867_vm2, %v4628_v19, -inf }
0x1c42   : > { %4630 = vmax.xlane.f32.xlu1 %v4629_v22  ;;  %v4790_v23 = vpop.f32.mrb[44].mxu0 }
0x1c43   : > { %v4794_v24 = vmul.f32 0.35355338, %v4790_v23  ;;  %v7019_v25 = vpop.f32.mrb[45].mxu0 }
0x1c45   : > { %v4795_v13 = vsel %vm867_vm2, %v4794_v24, -inf }
0x1c46   : > { %4796 = vmax.xlane.f32.xlu0 %v4795_v13 }
0x1c53   : > { %3962 = vrot.lane.b32.xlu1 %v8414_v7, %s9053_s3 }
0x1c57   : > { %4308 = vrot.lane.b32.xlu1 %v8412_v15, %s9048_s25 }
0x1c5c   : > { %4128 = vrot.lane.b32.xlu0 %v8414_v7, %s9054_s27 }
0x1cbf   : > { %v3953_v20 = vpop.xlane.xlu0 %3952 }
0x1cc0   : > { %v3954_v38 = vsub.f32 %v3950_v59, %v3953_v20 }
0x1cc2   : > { %v3955_v26 = vmul.f32 1.442695, %v3954_v38 }
0x1cc3   : > { %v4119_v27 = vpop.xlane.xlu1 %4118 }
0x1cc4   : > { %7544 = vpow2.f32 %v3955_v26  ;;  %v4120_v32 = vsub.f32 %v4116_v63, %v4119_v27  ;;  %v6364_v26 = vld [vmem:[%s8983_s8 + $0x40] sm:$0xff] }
0x1cc6   : > { %v4121_v33 = vmul.f32 1.442695, %v4120_v32  ;;  %v6366_v32 = vld [vmem:[%s8983_s8 + $0x50] sm:$0xff] }
0x1cc7   : > { %v4299_v34 = vpop.xlane.xlu0 %4298 }
0x1cc8   : > { %7546 = vpow2.f32 %v4121_v33  ;;  %v4300_v47 = vsub.f32 %v4296_v11, %v4299_v34  ;;  %v6367_v33 = vld [vmem:[%s8983_s8 + $0x58] sm:$0xff] }
0x1cc9   : > { %v7293_v34 = vpack.c.bf16 %v6367_v33, %v6366_v32  ;;  %v6419_v32 = vld [vmem:[%s8989_s14 + $0x140] sm:$0xff]  ;;  %v6420_v33 = vld [vmem:[%s8989_s14 + $0x148] sm:$0xff] }
0x1cca   : > { %v4301_v29 = vmul.f32 1.442695, %v4300_v47 }
0x1ccb   : > { %v4465_v35 = vpop.xlane.xlu0 %4464 }
0x1ccc   : > { %v4466_v36 = vsub.f32 %v4462_v9, %v4465_v35 }
0x1cce   : > { %v7545_v14 = vpop.eup %7544  ;;  %v4467_v37 = vmul.f32 1.442695, %v4466_v36 }
0x1ccf   : > { %v4631_v16 = vpop.xlane.xlu1 %4630  ;;  %v3957_v39 = vsel %vm867_vm2, %v7545_v14, 0.0 }
0x1cd0   : > { %7548 = vpow2.f32 %v4467_v37  ;;  %3958 = vadd.xlane.f32.xlu1 %v3957_v39  ;;  %v4632_v48 = vsub.f32 %v4628_v19, %v4631_v16 }
0x1cd2   : > { %v7547_v40 = vpop.eup %7546  ;;  %v4633_v50 = vmul.f32 1.442695, %v4632_v48 }
0x1cd3   : > { %v3963_v7 = vpop.permute.xlu1 %3962  ;;  %v4797_v17 = vpop.xlane.xlu0 %4796  ;;  %v4123_v41 = vsel %vm867_vm2, %v7547_v40, 0.0 }
0x1cd4   : > { %v4798_v42 = vsub.f32 %v4794_v24, %v4797_v17  ;;  %6971 = vmatpush3.msra.mxu1 %v3963_v7  ;;  %4124 = vadd.xlane.f32.xlu0 %v4123_v41 }
0x1cd5   : > { %6980 = vmatprep.subr.mxu1 %v7624_v49 }
0x1cd6   : > { %v4799_v43 = vmul.f32 1.442695, %v4798_v42 }
0x1cd7   : > { %v4309_v59 = vpop.permute.xlu1 %4308  ;;  %v4129_v60 = vpop.permute.xlu0 %4128 }
0x1cd8   : > { %7550 = vpow2.f32 %v4799_v43 }
0x1cd9   : > { %7552 = vpow2.f32 %v4301_v29 }
0x1cda   : > { %v7549_v44 = vpop.eup %7548  ;;  %7554 = vpow2.f32 %v4633_v50 }
0x1cdb   : > { %v4469_v45 = vsel %vm867_vm2, %v7549_v44, 0.0 }
0x1cdc   : > { %4470 = vadd.xlane.f32.xlu0 %v4469_v45 }
0x1ce1   : > { %4474 = vrot.lane.b32.xlu1 %v8412_v15, %s9050_s30  ;;  %s9060_s30 = sld [smem:[#allocation10_spill]] }
0x1ce2   : > { %v8521_v54 = vpop.eup %7550 }
0x1ce3   : > { %v4801_v46 = vsel %vm867_vm2, %v8521_v54, 0.0  ;;  %v7553_v51 = vpop.eup %7552 }
0x1ce4   : > { %4802 = vadd.xlane.f32.xlu0 %v4801_v46  ;;  %v4303_v52 = vsel %vm867_vm2, %v7553_v51, 0.0  ;;  %v7555_v56 = vpop.eup %7554 }
0x1ce5   : > { %v4635_v57 = vsel %vm867_vm2, %v7555_v56, 0.0 }
0x1cfa   : > { %4640 = vrot.lane.b32.xlu0 %v8412_v15, %s9053_s3 }
0x1cfe   : > { %4205 = vrot.lane.b32.xlu0 %v8501_v55, %s9055_s1 }
0x1d05   : > { %4304 = vadd.xlane.f32.xlu1 %v4303_v52 }
0x1d09   : > { %4636 = vadd.xlane.f32.xlu1 %v4635_v57 }
0x1d1a   : > { %4806 = vrot.lane.b32.xlu1 %v8412_v15, %s9054_s27 }
0x1d5d   : > { %v3959_v61 = vpop.xlane.xlu1 %3958 }
0x1d5e   : > { %7556 = vrcp.f32 %v3959_v61 }
0x1d61   : > { %v4125_v62 = vpop.xlane.xlu0 %4124  ;;  %v4475_v15 = vpop.permute.xlu1 %4474 }
0x1d62   : > { %7558 = vrcp.f32 %v4125_v62 }
0x1d68   : > { %v7557_v63 = vpop.eup %7556 }
0x1d69   : > { %v3961_v0 = vmul.f32 %v7557_v63, %v7545_v14  ;;  %v4471_v4 = vpop.xlane.xlu0 %4470 }
0x1d6b   : > { %6973 = vmatmul.mubr.msk.f32.vlgmr.msra.gmra.mrb[26].mxu1 %vm867_vm2, %v3961_v0 }
0x1d6c   : > { %v7559_v55 = vpop.eup %7558  ;;  %6981 = vmatpush3.msra.mxu1 %v4129_v60  ;;  %6982 = vmatprep.mubr.msk.f32.mxu1 %vm7625_vm1, %v7624_v49 }
0x1d6d   : > { %v4127_v3 = vmul.f32 %v7559_v55, %v7547_v40  ;;  %6990 = vmatprep.subr.mxu1 %v7624_v49 }
0x1d6f   : > { %6983 = vmatmul.mubr.msk.f32.vlgmr.msra.gmra.mrb[28].mxu1 %vm867_vm2, %v4127_v3 }
0x1d70   : > { %6991 = vmatpush3.msra.mxu1 %v4309_v59  ;;  %6992 = vmatprep.mubr.msk.f32.mxu1 %vm7625_vm1, %v7624_v49 }
0x1d71   : > { %7000 = vmatprep.subr.mxu1 %v7624_v49  ;;  %v4803_v8 = vpop.xlane.xlu0 %4802 }
0x1d75   : > { %v4641_v19 = vpop.permute.xlu0 %4640 }
0x1d79   : > { %v4206_v17 = vpop.permute.xlu0 %4205 }
0x1d7a   : > { %v4216_v42 = vsel %vm867_vm2, %v8441_v28, %v4206_v17  ;;  %v6396_v28 = vld [vmem:[%s8984_s9 + $0x2] ss:$0 sm:$0xff] }
0x1d92   : > { %v4305_v11 = vpop.xlane.xlu1 %4304 }
0x1d93   : > { %7560 = vrcp.f32 %v4305_v11 }
0x1d94   : > { %7562 = vrcp.f32 %v4471_v4 }
0x1d96   : > { %v4637_v1 = vpop.xlane.xlu1 %4636 }
0x1d97   : > { %7564 = vrcp.f32 %v4637_v1 }
0x1d98   : > { %7566 = vrcp.f32 %v4803_v8  ;;  %v6403_v8 = vld [vmem:[%s8987_s12 + $0x40] sm:$0xff] }
0x1d9a   : > { %v4807_v23 = vpop.permute.xlu1 %4806 }
0x1d9d   : > { %v7561_v53 = vpop.eup %7560 }
0x1d9e   : > { %v4307_v9 = vmul.f32 %v7561_v53, %v7553_v51  ;;  %v7563_v10 = vpop.eup %7562  ;;  %v6404_v53 = vld [vmem:[%s8987_s12 + $0x48] sm:$0xff] }
0x1d9f   : > { %v4473_v12 = vmul.f32 %v7563_v10, %v7549_v44  ;;  %v6405_v10 = vld [vmem:[%s8987_s12 + $0x50] sm:$0xff] }
0x1da0   : > { %6993 = vmatmul.mubr.msk.f32.vlgmr.msra.gmra.mrb[30].mxu1 %vm867_vm2, %v4307_v9  ;;  %v7297_v9 = vpack.c.bf16 %v6404_v53, %v6403_v8 }
0x1da1   : > { %7001 = vmatpush3.msra.mxu1 %v4475_v15  ;;  %7002 = vmatprep.mubr.msk.f32.mxu1 %vm7625_vm1, %v7624_v49  ;;  %v7565_v18 = vpop.eup %7564 }
0x1da2   : > { %7010 = vmatprep.subr.mxu1 %v7624_v49  ;;  %v4639_v21 = vmul.f32 %v7565_v18, %v7555_v56  ;;  %v7567_v22 = vpop.eup %7566 }
0x1da3   : > { %v4805_v24 = vmul.f32 %v7567_v22, %v8521_v54  ;;  %v6413_v22 = vld [vmem:[%s8989_s14 + $0x110] sm:$0xff] }
0x1da4   : > { %7003 = vmatmul.mubr.msk.f32.vlgmr.msra.gmra.mrb[32].mxu1 %vm867_vm2, %v4473_v12  ;;  %v6406_v12 = vld [vmem:[%s8987_s12 + $0x58] sm:$0xff] }
0x1da5   : > { %7011 = vmatpush3.msra.mxu1 %v4641_v19  ;;  %7012 = vmatprep.mubr.msk.f32.mxu1 %vm7625_vm1, %v7624_v49  ;;  %v7301_v18 = vpack.c.bf16 %v6406_v12, %v6405_v10  ;;  %v6411_v19 = vld [vmem:[%s8989_s14 + $0x100] sm:$0xff] }
0x1da6   : > { %7020 = vmatprep.subr.mxu1 %v7624_v49 }
0x1da8   : > { %7013 = vmatmul.mubr.msk.f32.vlgmr.msra.gmra.mrb[34].mxu1 %vm867_vm2, %v4639_v21  ;;  %v6412_v21 = vld [vmem:[%s8989_s14 + $0x108] sm:$0xff] }
0x1da9   : > { %7021 = vmatpush3.msra.mxu1 %v4807_v23  ;;  %7022 = vmatprep.mubr.msk.f32.mxu1 %vm7625_vm1, %v7624_v49  ;;  %v6365_v49 = vld [vmem:[%s8983_s8 + $0x48] sm:$0xff]  ;;  %v7305_v23 = vpack.c.bf16 %v6412_v21, %v6411_v19 }
0x1daa   : > { %v7289_v27 = vpack.c.bf16 %v6365_v49, %v6364_v26  ;;  %7298 = vmatprep.subr.bf16.mxu1 %v7297_v9  ;;  %v6417_v26 = vld [vmem:[%s8989_s14 + $0x130] sm:$0xff]  ;;  %v6418_v49 = vld [vmem:[%s8989_s14 + $0x138] sm:$0xff] }
0x1dac   : > { %7023 = vmatmul.mubr.msk.f32.vlgmr.msra.gmra.mrb[36].mxu1 %vm867_vm2, %v4805_v24  ;;  %7290 = vmatprep.subr.bf16.mxu0 %v7289_v27  ;;  %v6414_v24 = vld [vmem:[%s8989_s14 + $0x118] sm:$0xff] }
0x1dad   : > { %7292 = vmatpush3.bf16.msra.mxu0 %v7289_v27  ;;  %7300 = vmatpush3.bf16.msra.mxu1 %v7297_v9  ;;  %v7317_v27 = vpack.c.bf16 %v6418_v49, %v6417_v26  ;;  %v6435_v26 = vld [vmem:[%s8981_s6 + $0x70] sm:$0xff]  ;;  %v6436_v49 = vld [vmem:[%s8981_s6 + $0x78] sm:$0xff] }
0x1dae   : > { %7294 = vmatprep.subr.bf16.mxu0 %v7293_v34  ;;  %7302 = vmatprep.subr.bf16.mxu1 %v7301_v18 }
0x1db1   : > { %7296 = vmatpush3.bf16.msra.mxu0 %v7293_v34  ;;  %7304 = vmatpush3.bf16.msra.mxu1 %v7301_v18  ;;  %v7321_v34 = vpack.c.bf16 %v6420_v33, %v6419_v32 }
0x1db2   : > { %7306 = vmatprep.subr.bf16.mxu0 %v7305_v23 }
0x1e3e   : > { %v4034_v25 = vpop.f32.mrb[26].mxu1 }
0x1e3f   : > { %4209 = vrot.lane.b32.xlu1 %v4034_v25, %s9056_s2  ;;  %v6974_v13 = vpop.f32.mrb[27].mxu1  ;;  %v7309_v25 = vpack.c.bf16 %v6414_v24, %v6413_v22 }
0x1e40   : > { %v6415_v13 = vld [vmem:[%s8989_s14 + $0x120] sm:$0xff] }
0x1e42   : > { %v4200_v20 = vpop.f32.mrb[28].mxu1 }
0x1e43   : > { %4213 = vrot.lane.b32.xlu1 %v4200_v20, %s9057_s0  ;;  %v6984_v38 = vpop.f32.mrb[29].mxu1  ;;  %v6416_v20 = vld [vmem:[%s8989_s14 + $0x128] sm:$0xff] }
0x1e44   : > { %v7313_v38 = vpack.c.bf16 %v6416_v20, %v6415_v13  ;;  %v6433_v13 = vld [vmem:[%s8981_s6 + $0x60] sm:$0xff]  ;;  %v6434_v20 = vld [vmem:[%s8981_s6 + $0x68] sm:$0xff] }
0x1e73   : > { %v4380_v35 = vpop.f32.mrb[30].mxu1 }
0x1e74   : > { %v6994_v36 = vpop.f32.mrb[31].mxu1 }
0x1e75   : > { %v6422_v36 = vld [vmem:[%s8989_s14 + $0x158] sm:$0xff] }
0x1e77   : > { %v4546_v14 = vpop.f32.mrb[32].mxu1 }
0x1e78   : > { %4883 = vrot.lane.b32.xlu0 %v4546_v14, %s9055_s1  ;;  %v7004_v37 = vpop.f32.mrb[33].mxu1  ;;  %s6486_s1 = sshll.u32 %s9063_s22, 4 }
0x1e79   : > { %v6423_v37 = vld [vmem:[%s8989_s14 + $0x160] sm:$0xff]  ;;  %s623_s23 = scalar_lea.vmem %s9060_s30, %s6486_s1 }
0x1e7b   : > { %v4712_v16 = vpop.f32.mrb[34].mxu1 }
0x1e7c   : > { %4887 = vrot.lane.b32.xlu0 %v4712_v16, %s9056_s2  ;;  %v7014_v39 = vpop.f32.mrb[35].mxu1  ;;  %v6424_v16 = vld [vmem:[%s8989_s14 + $0x168] sm:$0xff] }
0x1e7d   : > { %v7329_v39 = vpack.c.bf16 %v6424_v16, %v6423_v37  ;;  %v6431_v16 = vld [vmem:[%s9042_s26 + $0x3] ss:$0 sm:$0xff] }
0x1e7f   : > { %v4878_v40 = vpop.f32.mrb[36].mxu1 }
0x1e80   : > { %4891 = vrot.lane.b32.xlu1 %v4878_v40, %s9057_s0  ;;  %v7024_v7 = vpop.f32.mrb[37].mxu1 }
0x1eb1   : > { %v4210_v41 = vpop.permute.xlu1 %4209 }
0x1eb2   : > { %v4217_v43 = vsel %vm1541_vm3, %v4216_v42, %v4210_v41 }
0x1eb5   : > { %v4214_v44 = vpop.permute.xlu1 %4213 }
0x1eb6   : > { %v4218_v45 = vsel %vm1543_vm4, %v4217_v43, %v4214_v44 }
0x1eb7   : > { %7033 = vmatprep.mubr.msk.f32.mxu0 %vm638_vm0, %v4218_v45  ;;  %v6401_v45 = vld [vmem:[%s8985_s10 + $0x2] ss:$0 sm:$0xff] }
0x1eea   : > { %v4884_v54 = vpop.permute.xlu0 %4883 }
0x1eeb   : > { %v4894_v47 = vsel %vm867_vm2, %v4380_v35, %v4884_v54  ;;  %v6421_v35 = vld [vmem:[%s8989_s14 + $0x150] sm:$0xff] }
0x1eec   : > { %v7325_v14 = vpack.c.bf16 %v6422_v36, %v6421_v35 }
0x1eee   : > { %v4888_v46 = vpop.permute.xlu0 %4887 }
0x1eef   : > { %v4895_v29 = vsel %vm1541_vm3, %v4894_v47, %v4888_v46  ;;  %v6402_v46 = vld [vmem:[%s8986_s11 + $0x2] ss:$0 sm:$0xff] }
0x1ef2   : > { %v4892_v48 = vpop.permute.xlu1 %4891 }
0x1ef3   : > { %v4896_v50 = vsel %vm1543_vm4, %v4895_v29, %v4892_v48 }
0x1ef4   : > { %7034 = vmatmul.mubr.msk.f32.vlgmr.msra.gmra.mrb[46].mxu0 %vm638_vm0, %v4896_v50 }
0x1ef5   : > { %7308 = vmatpush3.bf16.msra.mxu0 %v7305_v23 }
0x1ef6   : > { %7310 = vmatprep.subr.bf16.mxu0 %v7309_v25 }
0x1ef9   : > { %7312 = vmatpush3.bf16.msra.mxu0 %v7309_v25 }
0x1efa   : > { %7314 = vmatprep.subr.bf16.mxu0 %v7313_v38 }
0x1efd   : > { %7316 = vmatpush3.bf16.msra.mxu0 %v7313_v38  ;;  %v7337_v38 = vpack.c.bf16 %v6434_v20, %v6433_v13 }
0x1efe   : > { %7318 = vmatprep.subr.bf16.mxu0 %v7317_v27 }
0x1eff   : > { %7338 = vmatprep.subr.bf16.mxu1 %v7337_v38 }
0x1f01   : > { %7320 = vmatpush3.bf16.msra.mxu0 %v7317_v27  ;;  %v7341_v27 = vpack.c.bf16 %v6436_v49, %v6435_v26 }
0x1f02   : > { %7322 = vmatprep.subr.bf16.mxu0 %v7321_v34 }
0x1f05   : > { %7324 = vmatpush3.bf16.msra.mxu0 %v7321_v34 }
0x1f06   : > { %7326 = vmatprep.subr.bf16.mxu0 %v7325_v14 }
0x1f09   : > { %7328 = vmatpush3.bf16.msra.mxu0 %v7325_v14 }
0x1f0a   : > { %7330 = vmatprep.subr.bf16.mxu0 %v7329_v39 }
0x1f0d   : > { %7332 = vmatpush3.bf16.msra.mxu0 %v7329_v39 }
0x1fc7   : > { %v7035_v51 = vpop.f32.mrb[46].mxu0 }
0x1fc8   : > { %v4981_v52 = vadd.f32 %v7035_v51, %v6396_v28  ;;  %v4975_v56 = vpop.f32.mrb[47].mxu0 }
0x1fc9   : > { %v4976_v57 = vadd.f32 %v6396_v28, %v4975_v56  ;;  %v6426_v56 = vld [vmem:[%s8989_s14 + $0x178] sm:$0xff] }
0x1fca   : > { %v8584_v59 = vadd.f32 %v4981_v52, %v8373_v30  ;;  %v6425_v52 = vld [vmem:[%s8989_s14 + $0x170] sm:$0xff] }
0x1fcb   : > { %v8587_v60 = vadd.f32 %v4976_v57, %v8376_v31  ;;  %v7333_v57 = vpack.c.bf16 %v6426_v56, %v6425_v52 }
0x1fcc   : > { %v4993_v61 = vsel %vm638_vm0, %v8584_v59, 0.0 }
0x1fcd   : > { %4994 = vadd.xlane.f32.xlu1 %v4993_v61  ;;  %v4990_v62 = vsel %vm638_vm0, %v8587_v60, 0.0  ;;  %7334 = vmatprep.subr.bf16.mxu0 %v7333_v57  ;;  %v6408_v61 = vld [vmem:[%s8988_s13 + $0x2] ss:$0 sm:$0xff] }
0x1fce   : > { %4991 = vadd.xlane.f32.xlu0 %v4990_v62  ;;  %7336 = vmatpush3.bf16.msra.mxu0 %v7333_v57 }
0x205a   : > { %v4995_v63 = vpop.xlane.xlu1 %4994 }
0x205b   : > { %v4997_v0 = vmul.f32 0.03125, %v4995_v63  ;;  %v4992_v55 = vpop.xlane.xlu0 %4991 }
0x205c   : > { %v4996_v3 = vmul.f32 0.03125, %v4992_v55 }
0x205d   : > { %v8594_v15 = vsub.f32 %v8584_v59, %v4997_v0 }
0x205e   : > { %v4998_v30 = vsub.f32 %v8587_v60, %v4996_v3 }
0x205f   : > { %v5001_v11 = vmul.f32 %v8594_v15, %v8594_v15 }
0x2060   : > { %v5000_v4 = vmul.f32 %v4998_v30, %v4998_v30 }
0x2061   : > { %v5005_v1 = vsel %vm638_vm0, %v5001_v11, 0.0 }
0x2062   : > { %v5002_v31 = vsel %vm638_vm0, %v5000_v4, 0.0 }
0x2063   : > { %5003 = vadd.xlane.f32.xlu0 %v5002_v31 }
0x2067   : > { %5006 = vadd.xlane.f32.xlu0 %v5005_v1 }
0x20f0   : > { %v5004_v40 = vpop.xlane.xlu0 %5003 }
0x20f1   : > { %v5008_v7 = vmul.f32 0.03125, %v5004_v40 }
0x20f3   : > { %v5010_v17 = vadd.f32 1e-05, %v5008_v7 }
0x20f4   : > { %v5007_v41 = vpop.xlane.xlu0 %5006 }
0x20f5   : > { %7568 = vrsqrt.f32 %v5010_v17  ;;  %v5009_v42 = vmul.f32 0.03125, %v5007_v41  ;;  %v6432_v17 = vld [vmem:[%s8980_s5 + $0x3] ss:$0 sm:$0xff] }
0x20f7   : > { %v5011_v43 = vadd.f32 1e-05, %v5009_v42 }
0x20f9   : > { %7570 = vrsqrt.f32 %v5011_v43 }
0x20ff   : > { %v7569_v44 = vpop.eup %7568 }
0x2100   : > { %v5014_v54 = vmul.f32 %v7569_v44, %v4998_v30  ;;  %v6428_v30 = vld [vmem:[%s8990_s15 + $0x2] ss:$0 sm:$0xff] }
0x2102   : > { %v5022_v47 = vmul.f32 %v6401_v45, %v5014_v54 }
0x2103   : > { %v7571_v29 = vpop.eup %7570 }
0x2104   : > { %v5015_v48 = vmul.f32 %v7571_v29, %v8594_v15  ;;  %v5030_v50 = vadd.f32 %v6402_v46, %v5022_v47 }
0x2106   : > { %v5023_v28 = vmul.f32 %v6401_v45, %v5015_v48  ;;  %7044 = vmatprep.mubr.msk.f32.mxu1 %vm638_vm0, %v5030_v50  ;;  %v6443_v45 = vld [vmem:[%s8982_s7 + $0x3] ss:$0 sm:$0xff] }
0x2108   : > { %v5031_v51 = vadd.f32 %v6402_v46, %v5023_v28 }
0x210a   : > { %7045 = vmatmul.mubr.msk.f32.vlgmr.msra.gmra.mrb[38].mxu1 %vm638_vm0, %v5031_v51 }
0x210b   : > { %7340 = vmatpush3.bf16.msra.mxu1 %v7337_v38 }
0x210c   : > { %7342 = vmatprep.subr.bf16.mxu1 %v7341_v27 }
0x210f   : > { %7344 = vmatpush3.bf16.msra.mxu1 %v7341_v27 }
0x21dd   : > { %v7046_v62 = vpop.f32.mrb[38].mxu1 }
0x21de   : > { %v5123_v63 = vadd.f32 %v7046_v62, %v6408_v61  ;;  %v5117_v0 = vpop.f32.mrb[39].mxu1 }
0x21df   : > { %v5118_v55 = vadd.f32 %v6408_v61, %v5117_v0 }
0x21e0   : > { %v5127_v15 = vmax.f32 %v5123_v63, 0.0 }
0x21e1   : > { %v5126_v3 = vmax.f32 %v5118_v55, 0.0 }
0x21e3   : > { %7079 = vmatprep.mubr.f32.mxu0 %v5126_v3 }
0x21e4   : > { %7080 = vmatmul.mubr.f32.vlgmr.msra.gmra.mrb[48].mxu0 %v5127_v15 }
0x22b7   : > { %v7081_v4 = vpop.f32.mrb[48].mxu0 }
0x22b8   : > { %v5225_v31 = vadd.f32 %v7081_v4, %v6428_v30  ;;  %v5219_v11 = vpop.f32.mrb[49].mxu0 }
0x22b9   : > { %v5220_v1 = vadd.f32 %v6428_v30, %v5219_v11 }
0x22ba   : > { %v8677_v8 = vadd.f32 %v5225_v31, %v8584_v59 }
0x22bb   : > { %v8680_v53 = vadd.f32 %v5220_v1, %v8587_v60 }
0x22bc   : > { %v5237_v9 = vsel %vm638_vm0, %v8677_v8, 0.0 }
0x22bd   : > { %5238 = vadd.xlane.f32.xlu0 %v5237_v9  ;;  %v5234_v10 = vsel %vm638_vm0, %v8680_v53, 0.0 }
0x22be   : > { %5235 = vadd.xlane.f32.xlu1 %v5234_v10 }
0x234a   : > { %v5239_v12 = vpop.xlane.xlu0 %5238 }
0x234b   : > { %v5241_v18 = vmul.f32 0.03125, %v5239_v12  ;;  %v5236_v19 = vpop.xlane.xlu1 %5235 }
0x234c   : > { %v5240_v21 = vmul.f32 0.03125, %v5236_v19 }
0x234d   : > { %v5243_v22 = vsub.f32 %v8677_v8, %v5241_v18 }
0x234e   : > { %v5242_v59 = vsub.f32 %v8680_v53, %v5240_v21 }
0x234f   : > { %v5245_v23 = vmul.f32 %v5243_v22, %v5243_v22 }
0x2350   : > { %v5244_v24 = vmul.f32 %v5242_v59, %v5242_v59 }
0x2351   : > { %v5249_v60 = vsel %vm638_vm0, %v5245_v23, 0.0 }
0x2352   : > { %5250 = vadd.xlane.f32.xlu0 %v5249_v60  ;;  %v5246_v25 = vsel %vm638_vm0, %v5244_v24, 0.0 }
0x2353   : > { %5247 = vadd.xlane.f32.xlu1 %v5246_v25 }
0x23df   : > { %v5251_v32 = vpop.xlane.xlu0 %5250 }
0x23e0   : > { %v5253_v33 = vmul.f32 0.03125, %v5251_v32  ;;  %v5248_v34 = vpop.xlane.xlu1 %5247 }
0x23e1   : > { %v5252_v35 = vmul.f32 0.03125, %v5248_v34 }
0x23e2   : > { %v5255_v36 = vadd.f32 1e-05, %v5253_v33 }
0x23e3   : > { %v5254_v14 = vadd.f32 1e-05, %v5252_v35 }
0x23e4   : > { %7572 = vrsqrt.f32 %v5255_v36 }
0x23e5   : > { %7574 = vrsqrt.f32 %v5254_v14 }
0x23ee   : > { %v7573_v37 = vpop.eup %7572 }
0x23ef   : > { %v7575_v39 = vpop.eup %7574  ;;  %v5259_v40 = vmul.f32 %v7573_v37, %v5243_v22 }
0x23f0   : > { %v5258_v7 = vmul.f32 %v7575_v39, %v5242_v59 }
0x23f1   : > { %v5267_v41 = vmul.f32 %v6431_v16, %v5259_v40 }
0x23f2   : > { %v5266_v42 = vmul.f32 %v6431_v16, %v5258_v7 }
0x23f3   : > { %v5275_v44 = vadd.f32 %v6432_v17, %v5267_v41 }
0x23f4   : > { %v5274_v43 = vadd.f32 %v6432_v17, %v5266_v42 }
0x23f6   : > { %7090 = vmatprep.mubr.msk.f32.mxu1 %vm638_vm0, %v5274_v43 }
0x23f7   : > { %7091 = vmatmul.mubr.msk.f32.vlgmr.msra.gmra.mrb[40].mxu1 %vm638_vm0, %v5275_v44 }
0x24ca   : > { %v7092_v54 = vpop.f32.mrb[40].mxu1 }
0x24cb   : > { %v8713_v46 = vadd.f32 %v7092_v54, %v6443_v45  ;;  %v5368_v47 = vpop.f32.mrb[41].mxu1 }
0x24cc   : > { %v8715_v29 = vadd.f32 %v6443_v45, %v5368_v47 }
0x24cd   : > { %5387 = vrot.lane.b32.xlu0 %v8713_v46, %s9043_s4 }
0x24ce   : > { %5378 = vrot.lane.b32.xlu1 %v8715_v29, %s9043_s4 }
0x253f   : > { %v5388_v48 = vpop.permute.xlu0 %5387 }
0x2540   : > { %v5390_v50 = vmul.f32 %v5388_v48, %v8715_v29  ;;  %v5379_v28 = vpop.permute.xlu1 %5378  ;;  %v5425_v52 = vmul.f32 %v5388_v48, %v8713_v46 }
0x2541   : > { %v5420_v51 = vmul.f32 %v5379_v28, %v8713_v46  ;;  %v5381_v56 = vmul.f32 %v5379_v28, %v8715_v29 }
0x2542   : > { %5464 = vrot.lane.b32.xlu1 %v5390_v50, %s9044_s21  ;;  %v5426_v57 = vsel %vm867_vm2, %v5425_v52, 0.0  ;;  %v5391_v62 = vsel %vm867_vm2, %v5390_v50, 0.0 }
0x2543   : > { %5497 = vrot.lane.b32.xlu0 %v5420_v51, %s9044_s21  ;;  %v5382_v61 = vsel %vm867_vm2, %v5381_v56, 0.0  ;;  %v5421_v63 = vsel %vm867_vm2, %v5420_v51, 0.0 }
0x2546   : > { %5505 = vrot.lane.b32.xlu1 %v5425_v52, %s9044_s21 }
0x2547   : > { %5537 = vrot.lane.b32.xlu0 %v5381_v56, %s9045_s28 }
0x254a   : > { %5544 = vrot.lane.b32.xlu1 %v5390_v50, %s9045_s28 }
0x254b   : > { %5576 = vrot.lane.b32.xlu0 %v5420_v51, %s9045_s28 }
0x254e   : > { %5583 = vrot.lane.b32.xlu1 %v5425_v52, %s9045_s28 }
0x254f   : > { %5615 = vrot.lane.b32.xlu0 %v5381_v56, %s9046_s29 }
0x2552   : > { %5622 = vrot.lane.b32.xlu1 %v5390_v50, %s9046_s29 }
0x2553   : > { %5654 = vrot.lane.b32.xlu0 %v5420_v51, %s9046_s29 }
0x2556   : > { %5456 = vrot.lane.b32.xlu1 %v5381_v56, %s9044_s21 }
0x255a   : > { %5661 = vrot.lane.b32.xlu1 %v5425_v52, %s9046_s29 }
0x2572   : > { %5427 = vadd.xlane.f32.xlu0 %v5426_v57 }
0x2576   : > { %5383 = vadd.xlane.f32.xlu0 %v5382_v61 }
0x257e   : > { %5392 = vadd.xlane.f32.xlu1 %v5391_v62 }
0x2582   : > { %5422 = vadd.xlane.f32.xlu1 %v5421_v63 }
0x25b4   : > { %v5465_v0 = vpop.permute.xlu1 %5464 }
0x25b5   : > { %v5467_v55 = vsel %vm867_vm2, %v5465_v0, 0.0  ;;  %v5498_v3 = vpop.permute.xlu0 %5497 }
0x25b6   : > { %v5500_v15 = vsel %vm867_vm2, %v5498_v3, 0.0  ;;  %5468 = vadd.xlane.f32.xlu0 %v5467_v55 }
0x25b7   : > { %5501 = vadd.xlane.f32.xlu1 %v5500_v15 }
0x25b8   : > { %v5506_v30 = vpop.permute.xlu1 %5505 }
0x25b9   : > { %v5508_v4 = vsel %vm867_vm2, %v5506_v30, 0.0  ;;  %v5538_v31 = vpop.permute.xlu0 %5537 }
0x25ba   : > { %v5540_v11 = vsel %vm867_vm2, %v5538_v31, 0.0  ;;  %5509 = vadd.xlane.f32.xlu0 %v5508_v4 }
0x25bb   : > { %5541 = vadd.xlane.f32.xlu1 %v5540_v11 }
0x25bc   : > { %v5545_v1 = vpop.permute.xlu1 %5544 }
0x25bd   : > { %v5547_v9 = vsel %vm867_vm2, %v5545_v1, 0.0  ;;  %v5577_v10 = vpop.permute.xlu0 %5576 }
0x25be   : > { %v5579_v12 = vsel %vm867_vm2, %v5577_v10, 0.0  ;;  %5548 = vadd.xlane.f32.xlu0 %v5547_v9 }
0x25bf   : > { %5580 = vadd.xlane.f32.xlu1 %v5579_v12 }
0x25c0   : > { %v5584_v18 = vpop.permute.xlu1 %5583 }
0x25c1   : > { %v5586_v19 = vsel %vm867_vm2, %v5584_v18, 0.0  ;;  %v5616_v21 = vpop.permute.xlu0 %5615 }
0x25c2   : > { %v5618_v22 = vsel %vm867_vm2, %v5616_v21, 0.0  ;;  %5587 = vadd.xlane.f32.xlu0 %v5586_v19 }
0x25c3   : > { %5619 = vadd.xlane.f32.xlu1 %v5618_v22 }
0x25c4   : > { %v5623_v59 = vpop.permute.xlu1 %5622 }
0x25c5   : > { %v5625_v23 = vsel %vm867_vm2, %v5623_v59, 0.0  ;;  %v5655_v24 = vpop.permute.xlu0 %5654 }
0x25c6   : > { %v5657_v60 = vsel %vm867_vm2, %v5655_v24, 0.0  ;;  %5626 = vadd.xlane.f32.xlu0 %v5625_v23 }
0x25c7   : > { %5658 = vadd.xlane.f32.xlu1 %v5657_v60 }
0x25c8   : > { %v5457_v25 = vpop.permute.xlu1 %5456 }
0x25c9   : > { %v5459_v13 = vsel %vm867_vm2, %v5457_v25, 0.0 }
0x25ca   : > { %5460 = vadd.xlane.f32.xlu0 %v5459_v13 }
0x25cc   : > { %v5662_v20 = vpop.permute.xlu1 %5661 }
0x25cd   : > { %v5664_v38 = vsel %vm867_vm2, %v5662_v20, 0.0 }
0x25ce   : > { %5665 = vadd.xlane.f32.xlu0 %v5664_v38 }
0x25ff   : > { %v5428_v26 = vpop.xlane.xlu0 %5427 }
0x2600   : > { %v5429_v14 = vmul.f32 0.35355338, %v5428_v26 }
0x2603   : > { %v5384_v49 = vpop.xlane.xlu0 %5383 }
0x2604   : > { %v5385_v32 = vmul.f32 0.35355338, %v5384_v49 }
0x260b   : > { %v5393_v27 = vpop.xlane.xlu1 %5392 }
0x260c   : > { %v5394_v33 = vmul.f32 0.35355338, %v5393_v27 }
0x260e   : > { %v5395_v34 = vsel %vm2715_vm5, %v5385_v32, %v5394_v33 }
0x260f   : > { %v5423_v35 = vpop.xlane.xlu1 %5422  ;;  %v5396_v36 = vadd.f32 %v5395_v34, %v8184_v58 }
0x2610   : > { %v5424_v37 = vmul.f32 0.35355338, %v5423_v35 }
0x2611   : > { %v5397_v16 = vsel %vm2722_vm6, %v5396_v36, -inf }
0x2612   : > { %5398 = vmax.xlane.f32.xlu1 %v5397_v16  ;;  %v5430_v39 = vsel %vm2715_vm5, %v5424_v37, %v5429_v14 }
0x2613   : > { %v5431_v40 = vadd.f32 %v5430_v39, %v8188_v2 }
0x2615   : > { %v5432_v7 = vsel %vm2722_vm6, %v5431_v40, -inf }
0x2616   : > { %5433 = vmax.xlane.f32.xlu1 %v5432_v7 }
0x2643   : > { %v5469_v17 = vpop.xlane.xlu0 %5468 }
0x2644   : > { %v5502_v41 = vpop.xlane.xlu1 %5501  ;;  %v5470_v3 = vmul.f32 0.35355338, %v5469_v17 }
0x2645   : > { %v5503_v15 = vmul.f32 0.35355338, %v5502_v41 }
0x2647   : > { %v5510_v42 = vpop.xlane.xlu0 %5509 }
0x2648   : > { %v5542_v43 = vpop.xlane.xlu1 %5541  ;;  %v5511_v62 = vmul.f32 0.35355338, %v5510_v42 }
0x2649   : > { %v5543_v45 = vmul.f32 0.35355338, %v5542_v43 }
0x264a   : > { %v5512_v1 = vsel %vm2715_vm5, %v5503_v15, %v5511_v62 }
0x264b   : > { %v5549_v44 = vpop.xlane.xlu0 %5548  ;;  %v5513_v21 = vadd.f32 %v5512_v1, %v8188_v2 }
0x264c   : > { %v5550_v54 = vmul.f32 0.35355338, %v5549_v44  ;;  %v5581_v47 = vpop.xlane.xlu1 %5580 }
0x264d   : > { %v5582_v12 = vmul.f32 0.35355338, %v5581_v47  ;;  %v5514_v24 = vsel %vm2722_vm6, %v5513_v21, -inf }
0x264e   : > { %v5551_v48 = vsel %vm2715_vm5, %v5543_v45, %v5550_v54 }
0x264f   : > { %v5588_v50 = vpop.xlane.xlu0 %5587  ;;  %v5552_v28 = vadd.f32 %v5551_v48, %v8184_v58 }
0x2650   : > { %v5620_v51 = vpop.xlane.xlu1 %5619  ;;  %v5589_v31 = vmul.f32 0.35355338, %v5588_v50 }
0x2651   : > { %v5553_v52 = vsel %vm2722_vm6, %v5552_v28, -inf  ;;  %v5621_v57 = vmul.f32 0.35355338, %v5620_v51 }
0x2652   : > { %5554 = vmax.xlane.f32.xlu1 %v5553_v52  ;;  %v5590_v59 = vsel %vm2715_vm5, %v5582_v12, %v5589_v31 }
0x2653   : > { %v5627_v56 = vpop.xlane.xlu0 %5626  ;;  %v5591_v60 = vadd.f32 %v5590_v59, %v8188_v2 }
0x2654   : > { %v5628_v61 = vmul.f32 0.35355338, %v5627_v56  ;;  %v5659_v18 = vpop.xlane.xlu1 %5658 }
0x2655   : > { %v5660_v23 = vmul.f32 0.35355338, %v5659_v18 }
0x2656   : > { %v5629_v63 = vsel %vm2715_vm5, %v5621_v57, %v5628_v61 }
0x2657   : > { %v5461_v0 = vpop.xlane.xlu0 %5460  ;;  %v5630_v55 = vadd.f32 %v5629_v63, %v8184_v58 }
0x2658   : > { %v5462_v30 = vmul.f32 0.35355338, %v5461_v0 }
0x2659   : > { %v5631_v4 = vsel %vm2722_vm6, %v5630_v55, -inf }
0x265a   : > { %5632 = vmax.xlane.f32.xlu1 %v5631_v4  ;;  %v5471_v11 = vsel %vm2715_vm5, %v5462_v30, %v5470_v3 }
0x265b   : > { %v5666_v9 = vpop.xlane.xlu0 %5665  ;;  %v5472_v10 = vadd.f32 %v5471_v11, %v8184_v58  ;;  %v5592_v58 = vsel %vm2722_vm6, %v5591_v60, -inf }
0x265c   : > { %v5667_v22 = vmul.f32 0.35355338, %v5666_v9 }
0x265d   : > { %v5473_v19 = vsel %vm2722_vm6, %v5472_v10, -inf }
0x265e   : > { %5474 = vmax.xlane.f32.xlu0 %v5473_v19  ;;  %v5668_v25 = vsel %vm2715_vm5, %v5660_v23, %v5667_v22 }
0x265f   : > { %v5669_v13 = vadd.f32 %v5668_v25, %v8188_v2 }
0x2661   : > { %v5670_v20 = vsel %vm2722_vm6, %v5669_v13, -inf }
0x2662   : > { %5515 = vmax.xlane.f32.xlu0 %v5514_v24 }
0x2666   : > { %5593 = vmax.xlane.f32.xlu0 %v5592_v58 }
0x266a   : > { %5671 = vmax.xlane.f32.xlu0 %v5670_v20 }
0x269f   : > { %v5399_v38 = vpop.xlane.xlu1 %5398 }
0x26a0   : > { %v5400_v26 = vsub.f32 %v5396_v36, %v5399_v38 }
0x26a2   : > { %v5401_v49 = vmul.f32 1.442695, %v5400_v26 }
0x26a3   : > { %v5434_v27 = vpop.xlane.xlu1 %5433 }
0x26a4   : > { %7576 = vpow2.f32 %v5401_v49  ;;  %v5435_v32 = vsub.f32 %v5431_v40, %v5434_v27 }
0x26a6   : > { %v5436_v33 = vmul.f32 1.442695, %v5435_v32 }
0x26a8   : > { %7578 = vpow2.f32 %v5436_v33 }
0x26ae   : > { %v7577_v34 = vpop.eup %7576 }
0x26af   : > { %v5403_v35 = vsel %vm2722_vm6, %v7577_v34, 0.0 }
0x26b0   : > { %5404 = vadd.xlane.f32.xlu1 %v5403_v35 }
0x26b2   : > { %v7579_v14 = vpop.eup %7578 }
0x26b3   : > { %v5438_v37 = vsel %vm2722_vm6, %v7579_v14, 0.0 }
0x26b4   : > { %5439 = vadd.xlane.f32.xlu1 %v5438_v37 }
0x26df   : > { %v5555_v2 = vpop.xlane.xlu1 %5554 }
0x26e0   : > { %v5556_v16 = vsub.f32 %v5552_v28, %v5555_v2 }
0x26e2   : > { %v5557_v39 = vmul.f32 1.442695, %v5556_v16 }
0x26e4   : > { %7580 = vpow2.f32 %v5557_v39 }
0x26e7   : > { %v5633_v7 = vpop.xlane.xlu1 %5632 }
0x26e8   : > { %v5634_v36 = vsub.f32 %v5630_v55, %v5633_v7 }
0x26ea   : > { %v5635_v17 = vmul.f32 1.442695, %v5634_v36 }
0x26eb   : > { %v5475_v41 = vpop.xlane.xlu0 %5474 }
0x26ec   : > { %7582 = vpow2.f32 %v5635_v17  ;;  %v5476_v40 = vsub.f32 %v5472_v10, %v5475_v41 }
0x26ee   : > { %v8779_v42 = vpop.eup %7580  ;;  %v5477_v43 = vmul.f32 1.442695, %v5476_v40 }
0x26ef   : > { %v5516_v44 = vpop.xlane.xlu0 %5515  ;;  %v5559_v45 = vsel %vm2722_vm6, %v8779_v42, 0.0 }
0x26f0   : > { %7584 = vpow2.f32 %v5477_v43  ;;  %v5517_v54 = vsub.f32 %v5513_v21, %v5516_v44  ;;  %5560 = vadd.xlane.f32.xlu1 %v5559_v45 }
0x26f2   : > { %v5518_v47 = vmul.f32 1.442695, %v5517_v54 }
0x26f3   : > { %v5594_v48 = vpop.xlane.xlu0 %5593 }
0x26f4   : > { %7586 = vpow2.f32 %v5518_v47  ;;  %v5595_v50 = vsub.f32 %v5591_v60, %v5594_v48 }
0x26f6   : > { %v8783_v28 = vpop.eup %7582  ;;  %v5596_v51 = vmul.f32 1.442695, %v5595_v50 }
0x26f7   : > { %v5672_v52 = vpop.xlane.xlu0 %5671  ;;  %v5637_v56 = vsel %vm2722_vm6, %v8783_v28, 0.0 }
0x26f8   : > { %7588 = vpow2.f32 %v5596_v51  ;;  %v5673_v57 = vsub.f32 %v5669_v13, %v5672_v52  ;;  %5638 = vadd.xlane.f32.xlu1 %v5637_v56  ;;  %v6439_v51 = vld [vmem:[%s8983_s8 + $0x68] sm:$0xff]  ;;  %v6440_v56 = vld [vmem:[%s8983_s8 + $0x70] sm:$0xff] }
0x26fa   : > { %v7585_v61 = vpop.eup %7584  ;;  %v5674_v62 = vmul.f32 1.442695, %v5673_v57  ;;  %v6441_v57 = vld [vmem:[%s8983_s8 + $0x78] sm:$0xff] }
0x26fb   : > { %v5479_v63 = vsel %vm2722_vm6, %v7585_v61, 0.0 }
0x26fc   : > { %7590 = vpow2.f32 %v5674_v62  ;;  %5480 = vadd.xlane.f32.xlu0 %v5479_v63  ;;  %v7349_v63 = vpack.c.bf16 %v6441_v57, %v6440_v56 }
0x26fe   : > { %v7587_v0 = vpop.eup %7586 }
0x26ff   : > { %v5520_v55 = vsel %vm2722_vm6, %v7587_v0, 0.0 }
0x2700   : > { %5521 = vadd.xlane.f32.xlu0 %v5520_v55 }
0x2702   : > { %v7589_v3 = vpop.eup %7588 }
0x2703   : > { %v5598_v15 = vsel %vm2722_vm6, %v7589_v3, 0.0 }
0x2704   : > { %5599 = vadd.xlane.f32.xlu0 %v5598_v15 }
0x2706   : > { %v7591_v30 = vpop.eup %7590 }
0x2707   : > { %v5676_v4 = vsel %vm2722_vm6, %v7591_v30, 0.0 }
0x2708   : > { %5677 = vadd.xlane.f32.xlu0 %v5676_v4 }
0x273d   : > { %v5405_v31 = vpop.xlane.xlu1 %5404 }
0x273e   : > { %7592 = vrcp.f32 %v5405_v31 }
0x2741   : > { %v5440_v11 = vpop.xlane.xlu1 %5439 }
0x2742   : > { %7594 = vrcp.f32 %v5440_v11 }
0x2748   : > { %v7593_v1 = vpop.eup %7592 }
0x2749   : > { %v5407_v9 = vmul.f32 %v7593_v1, %v7577_v34 }
0x274b   : > { %5415 = vperm.xlu0 %7440, %v5407_v9   ;;  %5410 = vperm.xlu1 %7439, %v5407_v9  }
0x274c   : > { %v7595_v10 = vpop.eup %7594 }
0x274d   : > { %v5442_v12 = vmul.f32 %v7595_v10, %v7579_v14 }
0x274f   : > { %7441 = vset.pattern.permute.xlu0 %v7641_v6  ;;  %7442 = vset.pattern.permute.xlu1 %v7640_v5 }
0x2750   : > { %5450 = vperm.xlu1 %7442, %v5442_v12   ;;  %5445 = vperm.xlu0 %7441, %v5442_v12  }
0x2754   : > { %7443 = vset.pattern.permute.xlu1 %v7641_v6  ;;  %7446 = vset.pattern.permute.xlu0 %v7640_v5 }
0x277d   : > { %v5561_v21 = vpop.xlane.xlu1 %5560 }
0x2785   : > { %v5639_v59 = vpop.xlane.xlu1 %5638 }
0x2789   : > { %v5481_v18 = vpop.xlane.xlu0 %5480 }
0x278a   : > { %7596 = vrcp.f32 %v5481_v18 }
0x278d   : > { %v5522_v19 = vpop.xlane.xlu0 %5521 }
0x278e   : > { %7598 = vrcp.f32 %v5522_v19 }
0x2791   : > { %v5600_v22 = vpop.xlane.xlu0 %5599 }
0x2792   : > { %7600 = vrcp.f32 %v5600_v22 }
0x2793   : > { %7602 = vrcp.f32 %v5561_v21 }
0x2794   : > { %v7597_v23 = vpop.eup %7596  ;;  %7604 = vrcp.f32 %v5639_v59 }
0x2795   : > { %v5483_v24 = vmul.f32 %v7597_v23, %v7585_v61  ;;  %v5678_v27 = vpop.xlane.xlu0 %5677 }
0x2796   : > { %7606 = vrcp.f32 %v5678_v27 }
0x2797   : > { %5486 = vperm.xlu1 %7443, %v5483_v24  }
0x2798   : > { %v7599_v60 = vpop.eup %7598 }
0x2799   : > { %v5524_v25 = vmul.f32 %v7599_v60, %v7587_v0 }
0x279b   : > { %7444 = vset.pattern.permute.xlu1 %v7640_v5  ;;  %5532 = vperm.xlu0 %7446, %v5524_v25  }
0x279c   : > { %v7601_v58 = vpop.eup %7600  ;;  %5491 = vperm.xlu1 %7444, %v5483_v24  }
0x279d   : > { %v5602_v13 = vmul.f32 %v7601_v58, %v7589_v3  ;;  %v7603_v20 = vpop.eup %7602 }
0x279e   : > { %v7605_v38 = vpop.eup %7604  ;;  %v5563_v26 = vmul.f32 %v7603_v20, %v8779_v42 }
0x279f   : > { %7448 = vset.pattern.permute.xlu0 %v7641_v6  ;;  %v5641_v49 = vmul.f32 %v7605_v38, %v8783_v28  ;;  %v6438_v28 = vld [vmem:[%s8983_s8 + $0x60] sm:$0xff] }
0x27a0   : > { %7445 = vset.pattern.permute.xlu1 %v7641_v6  ;;  %5605 = vperm.xlu0 %7448, %v5602_v13   ;;  %v7607_v32 = vpop.eup %7606  ;;  %v7345_v52 = vpack.c.bf16 %v6439_v51, %v6438_v28  ;;  %v6462_v28 = vld [vmem:[%s8989_s14 + $0x188] sm:$0xff] }
0x27a1   : > { %5527 = vperm.xlu1 %7445, %v5524_v25   ;;  %v5680_v33 = vmul.f32 %v7607_v32, %v7591_v30  ;;  %v6446_v32 = vld [vmem:[%s8984_s9 + $0x3] ss:$0 sm:$0xff] }
0x27a2   : > { %7346 = vmatprep.subr.bf16.mxu1 %v7345_v52 }
0x27a3   : > { %7348 = vmatpush3.bf16.msra.mxu1 %v7345_v52 }
0x27a4   : > { %7450 = vset.pattern.permute.xlu0 %v7640_v5  ;;  %7350 = vmatprep.subr.bf16.mxu1 %v7349_v63 }
0x27a5   : > { %5566 = vperm.xlu1 %7445, %v5563_v26   ;;  %5649 = vperm.xlu0 %7450, %v5641_v49  }
0x27a7   : > { %7352 = vmatpush3.bf16.msra.mxu1 %v7349_v63 }
0x27a9   : > { %7447 = vset.pattern.permute.xlu1 %v7640_v5 }
0x27aa   : > { %5571 = vperm.xlu1 %7447, %v5563_v26  }
0x27ae   : > { %5610 = vperm.xlu1 %7447, %v5602_v13  }
0x27b2   : > { %7449 = vset.pattern.permute.xlu1 %v7641_v6 }
0x27b3   : > { %5644 = vperm.xlu1 %7449, %v5641_v49  }
0x27b7   : > { %5683 = vperm.xlu1 %7449, %v5680_v33  }
0x27bb   : > { %7451 = vset.pattern.permute.xlu1 %v7640_v5 }
0x27bc   : > { %5688 = vperm.xlu1 %7451, %v5680_v33  }
0x27ca   : > { %v5416_v34 = vpop.permute.xlu0 %5415  ;;  %v5411_v35 = vpop.permute.xlu1 %5410 }
0x27cb   : > { %v5418_v14 = vmul.f32 %v5416_v34, %v8713_v46  ;;  %v5413_v37 = vmul.f32 %v5411_v35, %v8715_v29 }
0x27cd   : > { %v5419_v2 = vadd.f32 %v5418_v14, %v5413_v37 }
0x27cf   : > { %v5446_v16 = vpop.permute.xlu0 %5445  ;;  %5694 = vrot.lane.b32.xlu0 %v5419_v2, %s9048_s25  ;;  %v5451_v39 = vpop.permute.xlu1 %5450 }
0x27d0   : > { %v5448_v7 = vmul.f32 %v5446_v16, %v8715_v29  ;;  %v5453_v6 = vmul.f32 %v5451_v39, %v8713_v46 }
0x27d2   : > { %v5454_v36 = vadd.f32 %v5453_v6, %v5448_v7 }
0x27d4   : > { %5713 = vrot.lane.b32.xlu1 %v5454_v36, %s9048_s25 }
0x2816   : > { %v5487_v5 = vpop.permute.xlu1 %5486 }
0x2817   : > { %v5489_v41 = vmul.f32 %v5487_v5, %v8715_v29 }
0x281a   : > { %v5533_v44 = vpop.permute.xlu0 %5532 }
0x281b   : > { %v5492_v17 = vpop.permute.xlu1 %5491  ;;  %v5535_v55 = vmul.f32 %v5533_v44, %v8713_v46  ;;  %v6454_v44 = vld [vmem:[%s8987_s12 + $0x68] sm:$0xff] }
0x281c   : > { %v5494_v40 = vmul.f32 %v5492_v17, %v8713_v46 }
0x281e   : > { %v5495_v42 = vadd.f32 %v5494_v40, %v5489_v41 }
0x281f   : > { %v5606_v47 = vpop.permute.xlu0 %5605 }
0x2820   : > { %5698 = vrot.lane.b32.xlu1 %v5495_v42, %s9048_s25  ;;  %v5528_v43 = vpop.permute.xlu1 %5527  ;;  %v5608_v4 = vmul.f32 %v5606_v47, %v8715_v29  ;;  %v6456_v47 = vld [vmem:[%s8987_s12 + $0x78] sm:$0xff] }
0x2821   : > { %v5530_v61 = vmul.f32 %v5528_v43, %v8715_v29  ;;  %v6453_v43 = vld [vmem:[%s8987_s12 + $0x60] sm:$0xff] }
0x2823   : > { %v5536_v3 = vadd.f32 %v5535_v55, %v5530_v61  ;;  %v6451_v55 = vld [vmem:[%s8985_s10 + $0x3] ss:$0 sm:$0xff] }
0x2824   : > { %v5567_v45 = vpop.permute.xlu1 %5566  ;;  %v5650_v15 = vpop.permute.xlu0 %5649 }
0x2825   : > { %v5569_v48 = vmul.f32 %v5567_v45, %v8715_v29  ;;  %v5652_v11 = vmul.f32 %v5650_v15, %v8713_v46  ;;  %v7353_v45 = vpack.c.bf16 %v6454_v44, %v6453_v43  ;;  %v6452_v15 = vld [vmem:[%s8986_s11 + $0x3] ss:$0 sm:$0xff] }
0x2827   : > { %7354 = vmatprep.subr.bf16.mxu1 %v7353_v45 }
0x2829   : > { %v5572_v54 = vpop.permute.xlu1 %5571 }
0x282a   : > { %v5574_v50 = vmul.f32 %v5572_v54, %v8713_v46  ;;  %v6455_v54 = vld [vmem:[%s8987_s12 + $0x70] sm:$0xff] }
0x282c   : > { %v5575_v62 = vadd.f32 %v5574_v50, %v5569_v48  ;;  %v7357_v48 = vpack.c.bf16 %v6456_v47, %v6455_v54  ;;  %v6461_v50 = vld [vmem:[%s8989_s14 + $0x180] sm:$0xff] }
0x282d   : > { %v5611_v0 = vpop.permute.xlu1 %5610  ;;  %v7361_v51 = vpack.c.bf16 %v6462_v28, %v6461_v50 }
0x282e   : > { %5702 = vrot.lane.b32.xlu0 %v5575_v62, %s9048_s25  ;;  %v5613_v30 = vmul.f32 %v5611_v0, %v8713_v46 }
0x2830   : > { %v5614_v9 = vadd.f32 %v5613_v30, %v5608_v4 }
0x2832   : > { %5717 = vrot.lane.b32.xlu0 %v5536_v3, %s9048_s25  ;;  %v5645_v31 = vpop.permute.xlu1 %5644 }
0x2833   : > { %v5647_v1 = vmul.f32 %v5645_v31, %v8715_v29 }
0x2835   : > { %v5653_v10 = vadd.f32 %v5652_v11, %v5647_v1  ;;  %v6463_v1 = vld [vmem:[%s8989_s14 + $0x190] sm:$0xff] }
0x2836   : > { %5721 = vrot.lane.b32.xlu0 %v5614_v9, %s9048_s25  ;;  %v5684_v12 = vpop.permute.xlu1 %5683  ;;  %v6464_v9 = vld [vmem:[%s8989_s14 + $0x198] sm:$0xff] }
0x2837   : > { %5706 = vrot.lane.b32.xlu1 %v5653_v10, %s9048_s25  ;;  %v5686_v19 = vmul.f32 %v5684_v12, %v8715_v29 }
0x283b   : > { %v5689_v18 = vpop.permute.xlu1 %5688 }
0x283c   : > { %v5691_v21 = vmul.f32 %v5689_v18, %v8713_v46  ;;  %v7365_v18 = vpack.c.bf16 %v6464_v9, %v6463_v1 }
0x283e   : > { %v5692_v22 = vadd.f32 %v5691_v21, %v5686_v19  ;;  %v6465_v19 = vld [vmem:[%s8989_s14 + $0x1a0] sm:$0xff]  ;;  %v6466_v21 = vld [vmem:[%s8989_s14 + $0x1a8] sm:$0xff] }
0x2840   : > { %5725 = vrot.lane.b32.xlu1 %v5692_v22, %s9048_s25  ;;  %v7369_v22 = vpack.c.bf16 %v6466_v21, %v6465_v19 }
0x2841   : > { %v5695_v59 = vpop.permute.xlu0 %5694 }
0x2846   : > { %v5714_v23 = vpop.permute.xlu1 %5713 }
0x2892   : > { %v5699_v60 = vpop.permute.xlu1 %5698 }
0x2893   : > { %v5709_v25 = vsel %vm867_vm2, %v5695_v59, %v5699_v60  ;;  %v6467_v59 = vld [vmem:[%s8989_s14 + $0x1b0] sm:$0xff]  ;;  %v6469_v60 = vld [vmem:[%s8989_s14 + $0x1c0] sm:$0xff] }
0x28a0   : > { %v5703_v24 = vpop.permute.xlu0 %5702 }
0x28a1   : > { %v5710_v58 = vsel %vm1541_vm3, %v5709_v25, %v5703_v24  ;;  %v6470_v25 = vld [vmem:[%s8989_s14 + $0x1c8] sm:$0xff] }
0x28a4   : > { %v5718_v13 = vpop.permute.xlu0 %5717 }
0x28a5   : > { %v5728_v46 = vsel %vm867_vm2, %v5714_v23, %v5718_v13  ;;  %v6468_v23 = vld [vmem:[%s8989_s14 + $0x1b8] sm:$0xff]  ;;  %v6471_v13 = vld [vmem:[%s8989_s14 + $0x1d0] sm:$0xff] }
0x28a6   : > { %v7373_v24 = vpack.c.bf16 %v6468_v23, %v6467_v59 }
0x28a8   : > { %v5722_v29 = vpop.permute.xlu0 %5721 }
0x28a9   : > { %v5707_v20 = vpop.permute.xlu1 %5706  ;;  %v5729_v26 = vsel %vm1541_vm3, %v5728_v46, %v5722_v29  ;;  %v6473_v29 = vld [vmem:[%s8989_s14 + $0x1e0] sm:$0xff]  ;;  %v6474_v46 = vld [vmem:[%s8989_s14 + $0x1e8] sm:$0xff] }
0x28aa   : > { %v5711_v38 = vsel %vm1543_vm4, %v5710_v58, %v5707_v20  ;;  %v7377_v58 = vpack.c.bf16 %v6470_v25, %v6469_v60  ;;  %v6472_v20 = vld [vmem:[%s8989_s14 + $0x1d8] sm:$0xff] }
0x28ab   : > { %7101 = vmatprep.mubr.msk.f32.mxu1 %vm638_vm0, %v5711_v38  ;;  %v7381_v38 = vpack.c.bf16 %v6472_v20, %v6471_v13 }
0x28b2   : > { %v5726_v49 = vpop.permute.xlu1 %5725 }
0x28b3   : > { %v5730_v27 = vsel %vm1543_vm4, %v5729_v26, %v5726_v49  ;;  %v7385_v26 = vpack.c.bf16 %v6474_v46, %v6473_v29  ;;  %v6475_v49 = vld [vmem:[%s8989_s14 + $0x1f0] sm:$0xff] }
0x28b4   : > { %7102 = vmatmul.mubr.msk.f32.vlgmr.msra.gmra.mrb[42].mxu1 %vm638_vm0, %v5730_v27  ;;  %v6476_v27 = vld [vmem:[%s8989_s14 + $0x1f8] sm:$0xff] }
0x28b5   : > { %7356 = vmatpush3.bf16.msra.mxu1 %v7353_v45 }
0x28b6   : > { %7358 = vmatprep.subr.bf16.mxu1 %v7357_v48 }
0x28b9   : > { %7360 = vmatpush3.bf16.msra.mxu1 %v7357_v48 }
0x28ba   : > { %7362 = vmatprep.subr.bf16.mxu1 %v7361_v51 }
0x2987   : > { %v7103_v33 = vpop.f32.mrb[42].mxu1 }
0x2988   : > { %v5815_v34 = vadd.f32 %v7103_v33, %v6446_v32  ;;  %v5809_v35 = vpop.f32.mrb[43].mxu1  ;;  %v6458_v33 = vld [vmem:[%s8988_s13 + $0x3] ss:$0 sm:$0xff] }
0x2989   : > { %v5810_v14 = vadd.f32 %v6446_v32, %v5809_v35  ;;  %v7389_v32 = vpack.c.bf16 %v6476_v27, %v6475_v49 }
0x298a   : > { %v8852_v37 = vadd.f32 %v5815_v34, %v8677_v8 }
0x298b   : > { %v8855_v2 = vadd.f32 %v5810_v14, %v8680_v53 }
0x298c   : > { %v5827_v16 = vsel %vm638_vm0, %v8852_v37, 0.0 }
0x298d   : > { %5828 = vadd.xlane.f32.xlu1 %v5827_v16  ;;  %v5824_v39 = vsel %vm638_vm0, %v8855_v2, 0.0 }
0x298e   : > { %5825 = vadd.xlane.f32.xlu0 %v5824_v39 }
0x2a1a   : > { %v5829_v7 = vpop.xlane.xlu1 %5828 }
0x2a1b   : > { %v5831_v6 = vmul.f32 0.03125, %v5829_v7  ;;  %v5826_v36 = vpop.xlane.xlu0 %5825 }
0x2a1c   : > { %v5830_v5 = vmul.f32 0.03125, %v5826_v36 }
0x2a1d   : > { %v5833_v17 = vsub.f32 %v8852_v37, %v5831_v6  ;;  %v6478_v6 = vld [vmem:[%s8990_s15 + $0x3] ss:$0 sm:$0xff] }
0x2a1e   : > { %v5832_v8 = vsub.f32 %v8855_v2, %v5830_v5 }
0x2a1f   : > { %v5835_v40 = vmul.f32 %v5833_v17, %v5833_v17 }
0x2a20   : > { %v5834_v41 = vmul.f32 %v5832_v8, %v5832_v8 }
0x2a21   : > { %v5839_v42 = vsel %vm638_vm0, %v5835_v40, 0.0 }
0x2a22   : > { %v5836_v53 = vsel %vm638_vm0, %v5834_v41, 0.0 }
0x2a23   : > { %5837 = vadd.xlane.f32.xlu0 %v5836_v53 }
0x2a27   : > { %5840 = vadd.xlane.f32.xlu0 %v5839_v42 }
0x2ab0   : > { %v5838_v52 = vpop.xlane.xlu0 %5837 }
0x2ab1   : > { %v5842_v56 = vmul.f32 0.03125, %v5838_v52  ;;  %v6109_v52 = vld [vmem:[%s8993_s18 + $0x8] sm:$0xff] }
0x2ab3   : > { %v5844_v57 = vadd.f32 1e-05, %v5842_v56 }
0x2ab4   : > { %v5841_v61 = vpop.xlane.xlu0 %5840 }
0x2ab5   : > { %7608 = vrsqrt.f32 %v5844_v57  ;;  %v5843_v62 = vmul.f32 0.03125, %v5841_v61  ;;  %v6110_v57 = vld [vmem:[%s8993_s18 + $0x10] sm:$0xff]  ;;  %v6111_v61 = vld [vmem:[%s8993_s18 + $0x18] sm:$0xff] }
0x2ab7   : > { %v5845_v63 = vadd.f32 1e-05, %v5843_v62  ;;  %v7397_v62 = vpack.c.bf16 %v6111_v61, %v6110_v57 }
0x2ab9   : > { %7610 = vrsqrt.f32 %v5845_v63 }
0x2abf   : > { %v7609_v0 = vpop.eup %7608 }
0x2ac0   : > { %v5848_v3 = vmul.f32 %v7609_v0, %v5832_v8 }
0x2ac2   : > { %v5856_v30 = vmul.f32 %v6451_v55, %v5848_v3 }
0x2ac3   : > { %v7611_v4 = vpop.eup %7610 }
0x2ac4   : > { %v5849_v31 = vmul.f32 %v7611_v4, %v5833_v17  ;;  %v5864_v11 = vadd.f32 %v6452_v15, %v5856_v30 }
0x2ac6   : > { %v5857_v10 = vmul.f32 %v6451_v55, %v5849_v31  ;;  %7112 = vmatprep.mubr.msk.f32.mxu1 %vm638_vm0, %v5864_v11  ;;  %v6479_v31 = vld [vmem:[%s8991_s16] ss:$0 sm:$0xff] }
0x2ac8   : > { %v5865_v12 = vadd.f32 %v6452_v15, %v5857_v10  ;;  %v6480_v10 = vld [vmem:[%s9058_s17] ss:$0 sm:$0xff] }
0x2aca   : > { %7113 = vmatmul.mubr.msk.f32.vlgmr.msra.gmra.mrb[44].mxu1 %vm638_vm0, %v5865_v12 }
0x2acb   : > { %7364 = vmatpush3.bf16.msra.mxu1 %v7361_v51 }
0x2acc   : > { %7366 = vmatprep.subr.bf16.mxu1 %v7365_v18 }
0x2acf   : > { %7368 = vmatpush3.bf16.msra.mxu1 %v7365_v18 }
0x2ad0   : > { %7370 = vmatprep.subr.bf16.mxu1 %v7369_v22 }
0x2ad3   : > { %7372 = vmatpush3.bf16.msra.mxu1 %v7369_v22  ;;  %v6481_v22 = vld [vmem:[%s9059_s20] ss:$0 sm:$0xff] }
0x2ad4   : > { %7374 = vmatprep.subr.bf16.mxu1 %v7373_v24 }
0x2ad7   : > { %7376 = vmatpush3.bf16.msra.mxu1 %v7373_v24 }
0x2ad8   : > { %7378 = vmatprep.subr.bf16.mxu1 %v7377_v58 }
0x2adb   : > { %7380 = vmatpush3.bf16.msra.mxu1 %v7377_v58 }
0x2adc   : > { %7382 = vmatprep.subr.bf16.mxu1 %v7381_v38 }
0x2adf   : > { %7384 = vmatpush3.bf16.msra.mxu1 %v7381_v38 }
0x2ae0   : > { %7386 = vmatprep.subr.bf16.mxu1 %v7385_v26 }
0x2ae3   : > { %7388 = vmatpush3.bf16.msra.mxu1 %v7385_v26 }
0x2ae4   : > { %7390 = vmatprep.subr.bf16.mxu1 %v7389_v32 }
0x2ae7   : > { %7392 = vmatpush3.bf16.msra.mxu1 %v7389_v32 }
0x2b9d   : > { %v7114_v34 = vpop.f32.mrb[44].mxu1 }
0x2b9e   : > { %v5957_v35 = vadd.f32 %v7114_v34, %v6458_v33  ;;  %v5951_v14 = vpop.f32.mrb[45].mxu1 }
0x2b9f   : > { %v5952_v16 = vadd.f32 %v6458_v33, %v5951_v14 }
0x2ba0   : > { %v5961_v7 = vmax.f32 %v5957_v35, 0.0 }
0x2ba1   : > { %v5960_v39 = vmax.f32 %v5952_v16, 0.0 }
0x2ba3   : > { %7147 = vmatprep.mubr.f32.mxu1 %v5960_v39 }
0x2ba4   : > { %7148 = vmatmul.mubr.f32.vlgmr.msra.gmra.mrb[46].mxu1 %v5961_v7 }
0x2c77   : > { %v7149_v36 = vpop.f32.mrb[46].mxu1 }
0x2c78   : > { %v6059_v5 = vadd.f32 %v7149_v36, %v6478_v6  ;;  %v6053_v17 = vpop.f32.mrb[47].mxu1 }
0x2c79   : > { %v6054_v8 = vadd.f32 %v6478_v6, %v6053_v17 }
0x2c7a   : > { %v6063_v41 = vadd.f32 %v6059_v5, %v8852_v37 }
0x2c7b   : > { %v6062_v53 = vadd.f32 %v6054_v8, %v8855_v2  ;;  %v6108_v2 = vld [vmem:[%s8993_s18] sm:$0xff] }
0x2c7c   : > { %v6069_v40 = vsel %vm638_vm0, %v6063_v41, 0.0  ;;  %v7393_v56 = vpack.c.bf16 %v6109_v52, %v6108_v2 }
0x2c7d   : > { %6070 = vadd.xlane.f32.xlu0 %v6069_v40  ;;  %v6066_v42 = vsel %vm638_vm0, %v6062_v53, 0.0 }
0x2c7e   : > { %6067 = vadd.xlane.f32.xlu1 %v6066_v42  ;;  %7394 = vmatprep.subr.bf16.mxu0 %v7393_v56 }
0x2c7f   : > { %7396 = vmatpush3.bf16.msra.mxu0 %v7393_v56 }
0x2c80   : > { %7398 = vmatprep.subr.bf16.mxu0 %v7397_v62 }
0x2c83   : > { %7400 = vmatpush3.bf16.msra.mxu0 %v7397_v62 }
0x2d0a   : > { %v6071_v43 = vpop.xlane.xlu0 %6070 }
0x2d0b   : > { %v6073_v44 = vmul.f32 0.03125, %v6071_v43  ;;  %v6068_v45 = vpop.xlane.xlu1 %6067 }
0x2d0c   : > { %v6072_v54 = vmul.f32 0.03125, %v6068_v45 }
0x2d0d   : > { %v6075_v47 = vsub.f32 %v6063_v41, %v6073_v44 }
0x2d0e   : > { %v6074_v48 = vsub.f32 %v6062_v53, %v6072_v54 }
0x2d0f   : > { %v6077_v50 = vmul.f32 %v6075_v47, %v6075_v47 }
0x2d10   : > { %v6076_v28 = vmul.f32 %v6074_v48, %v6074_v48 }
0x2d11   : > { %v6081_v51 = vsel %vm638_vm0, %v6077_v50, 0.0 }
0x2d12   : > { %6082 = vadd.xlane.f32.xlu0 %v6081_v51  ;;  %v6078_v37 = vsel %vm638_vm0, %v6076_v28, 0.0 }
0x2d13   : > { %6079 = vadd.xlane.f32.xlu1 %v6078_v37 }
0x2d9f   : > { %v6083_v63 = vpop.xlane.xlu0 %6082 }
0x2da0   : > { %v6085_v0 = vmul.f32 0.03125, %v6083_v63  ;;  %v6080_v55 = vpop.xlane.xlu1 %6079 }
0x2da1   : > { %v6084_v3 = vmul.f32 0.03125, %v6080_v55 }
0x2da2   : > { %v6087_v15 = vadd.f32 1e-05, %v6085_v0 }
0x2da3   : > { %v6086_v30 = vadd.f32 1e-05, %v6084_v3 }
0x2da4   : > { %7612 = vrsqrt.f32 %v6087_v15 }
0x2da5   : > { %7614 = vrsqrt.f32 %v6086_v30 }
0x2dae   : > { %v7613_v4 = vpop.eup %7612 }
0x2daf   : > { %v7615_v11 = vpop.eup %7614  ;;  %v6091_v1 = vmul.f32 %v7613_v4, %v6075_v47 }
0x2db0   : > { %v6090_v9 = vmul.f32 %v7615_v11, %v6074_v48 }
0x2db1   : > { %v6099_v12 = vmul.f32 %v6479_v31, %v6091_v1 }
0x2db2   : > { %v6098_v18 = vmul.f32 %v6479_v31, %v6090_v9 }
0x2db3   : > { %v6107_v21 = vadd.f32 %v6480_v10, %v6099_v12 }
0x2db4   : > { %v6106_v19 = vadd.f32 %v6480_v10, %v6098_v18 }
0x2db6   : > { %7158 = vmatprep.mubr.msk.f32.mxu0 %vm638_vm0, %v6106_v19 }
0x2db7   : > { %7159 = vmatmul.mubr.msk.f32.vlgmr.msra.gmra.mrb[50].mxu0 %vm638_vm0, %v6107_v21 }
0x2e8a   : > { %v7160_v59 = vpop.f32.mrb[50].mxu0 }
0x2e8b   : > { %v6197_v23 = vadd.f32 %v7160_v59, %v6481_v22  ;;  %v6191_v24 = vpop.f32.mrb[51].mxu0 }
0x2e8c   : > { %v6192_v60 = vadd.f32 %v6481_v22, %v6191_v24 }
0x2e8d   : > { %v6201_v25 = vmax.f32 %v6197_v23, 0.0 }
0x2e8e   : > { %v6200_v58 = vmax.f32 %v6192_v60, 0.0 }
0x2e8f   : > { %6204 = vst.msk [vmem:[%s623_s23 + $0x8] sm:$0xff] %vm6202_vm7, %v6201_v25 }
0x2e90   : > { %6203 = vst.msk [vmem:[%s623_s23] sm:$0xff] %vm6202_vm7, %v6200_v58 }
0x2e91 PF: > { %s9061_s24 = sld [smem:[#allocation2_spill]] }
0x2e97   : > { %s30_s1 = sadd.s32 1, %s9061_s24  }
0x2e98   : > { %p27_p4 = scmp.ge.s32.totalorder %s30_s1, 8  }
0x2e9a   :  { %29 = sbr.rel (!%p27_p4) target bundleno = 9 (0x9), region = 166 }

</bundles_post_ra>
